<compile_context>
chip_gen: v7x
topology: tpu7x:2x2x1
jax: 0.10.0
libtpu: 0.0.40
codegen_flags: <defaults>
</compile_context>

<pallas_src>
import jax
import jax.numpy as jnp
from jax.experimental import pallas as pl
from jax.experimental.pallas import tpu as pltpu


def _round_up(x, m):
    return (x + m - 1) // m * m


# ------------------------------ Pallas kernel -------------------------------

def _fused_gearnet_kernel(adj_ref, x_ref, wcat_ref, bias_ref, memb_ref,
                          node_ref, graph_ref,
                          act_a, act_b, stack_ref):
    """Whole GlycanGearNet forward in one kernel invocation.

    adj_ref  : (R, Np, Np)       bf16  dense relational adjacency (adj[r, v, u])
    x_ref    : (Np, Dp)          bf16  embedded + padded input node features
    wcat_ref : (L, (R+1)*Dp, Dp) bf16  per-layer [W_rel(0..R-1); W_self] stacked
    bias_ref : (L, 1, Dp)        f32   per-layer combined bias (b_rel + b_self)
    memb_ref : (Gp, Np)          bf16  graph membership (one-hot, padded)
    node_ref : (Np, Dp)          f32   output node features (last layer)
    graph_ref: (Gp, Dp)          f32   output graph features (sum readout)
    act_a/b  : (Np, Dp)          bf16  VMEM ping-pong for layer activations
    stack_ref: (Np, (R+1)*Dp)    bf16  VMEM scratch [adj[0]@x | ... | x]
    """
    num_relation = adj_ref.shape[0]
    num_layers = wcat_ref.shape[0]
    dp = x_ref.shape[1]

    ping = (act_a, act_b)
    cur = x_ref                       # layer-0 input lives in its input block
    h = None
    for l in range(num_layers):       # unrolled at trace time
        x = cur[...]                                        # (Np, Dp) bf16
        # Relation aggregation adj[r] @ x into lane-block r of the stacked
        # scratch; x itself is the (R+1)-th block (self-loop term).
        for r in range(num_relation):
            ax = jnp.dot(adj_ref[r], x, preferred_element_type=jnp.float32)
            stack_ref[:, r * dp:(r + 1) * dp] = ax.astype(jnp.bfloat16)
        stack_ref[:, num_relation * dp:(num_relation + 1) * dp] = x
        # One big-K MXU matmul covers all relations + the self loop
        # (no concatenate, no separate self-term matmul, no extra VPU add).
        h = jnp.maximum(
            jnp.dot(stack_ref[...], wcat_ref[l],
                    preferred_element_type=jnp.float32) + bias_ref[l],
            0.0)                                            # (Np, Dp) f32
        if l + 1 < num_layers:
            nxt = ping[l % 2]
            nxt[...] = h.astype(jnp.bfloat16)               # bound live ranges
            cur = nxt

    node_ref[...] = h
    # SumReadout epilogue: one-hot membership is exact in bf16, so the readout
    # is a single bf16 MXU pass with f32 accumulation.
    graph_ref[...] = jnp.dot(memb_ref[...], h.astype(jnp.bfloat16),
                             preferred_element_type=jnp.float32)


def _vmem_resident_bytes(num_relation, num_layers, np_, dp, gp):
    """Resident VMEM (single-buffered blocks + scratch + outputs)."""
    by = 0
    by += num_relation * np_ * np_ * 2                      # adjacency bf16
    by += np_ * dp * 2                                      # input features
    by += num_layers * (num_relation + 1) * dp * dp * 2     # stacked weights
    by += num_layers * 8 * dp * 4                           # biases (padded)
    by += gp * np_ * 2                                      # membership
    by += np_ * dp * 4                                      # node output f32
    by += gp * dp * 4                                       # graph output f32
    by += 2 * np_ * dp * 2                                  # ping-pong scratch
    by += np_ * (num_relation + 1) * dp * 2                 # stacked scratch
    return by


def _gearnet_call(R, Np, K, Dp, Gp, L, single_buffered):
    pm = pl.Buffered(1) if single_buffered else None

    def bspec(shape, imap):
        if pm is None:
            return pl.BlockSpec(shape, imap)
        return pl.BlockSpec(shape, imap, pipeline_mode=pm)

    resident = _vmem_resident_bytes(R, L, Np, Dp, Gp)
    if not single_buffered:
        resident *= 2
    # Scoped-VMEM limit sized to the real resident set (+ headroom); capped at
    # v7x's 64 MiB physical VMEM.  Past that the adjacency must be streamed.
    vmem_limit = min(max(int(resident * 1.5) + (4 << 20), 32 << 20), 64 << 20)

    return pl.pallas_call(
        _fused_gearnet_kernel,
        out_shape=(jax.ShapeDtypeStruct((Np, Dp), jnp.float32),
                   jax.ShapeDtypeStruct((Gp, Dp), jnp.float32)),
        grid_spec=pltpu.PrefetchScalarGridSpec(
            num_scalar_prefetch=0,
            grid=(1,),
            in_specs=[
                bspec((R, Np, Np), lambda i: (0, 0, 0)),
                bspec((Np, Dp), lambda i: (0, 0)),
                bspec((L, K, Dp), lambda i: (0, 0, 0)),
                bspec((L, 1, Dp), lambda i: (0, 0, 0)),
                bspec((Gp, Np), lambda i: (0, 0)),
            ],
            out_specs=(
                bspec((Np, Dp), lambda i: (0, 0)),
                bspec((Gp, Dp), lambda i: (0, 0)),
            ),
            scratch_shapes=[
                pltpu.VMEM((Np, Dp), jnp.bfloat16),
                pltpu.VMEM((Np, Dp), jnp.bfloat16),
                pltpu.VMEM((Np, K), jnp.bfloat16),
            ],
        ),
        compiler_params=pltpu.CompilerParams(
            dimension_semantics=("arbitrary",),
            vmem_limit_bytes=vmem_limit),
    )


def gearnet_fused(adj_p, x0_p, wcat_all, bias_all, memb_p):
    R, Np, _ = adj_p.shape
    L, K, Dp = wcat_all.shape
    Gp = memb_p.shape[0]
    args = (adj_p, x0_p, wcat_all, bias_all, memb_p)
    try:
        return _gearnet_call(R, Np, K, Dp, Gp, L, True)(*args)
    except Exception:
        # TODO(synk): this jax build rejects pl.Buffered(1); fall back to the
        # default double-buffered pipeline (2x resident VMEM for the blocks).
        return _gearnet_call(R, Np, K, Dp, Gp, L, False)(*args)


# -------------------------------- model glue --------------------------------

def init_params(key, num_unit, input_dim, hidden_dims, num_relation):
    dims = [input_dim] + list(hidden_dims)
    n_layers = len(dims) - 1
    keys = jax.random.split(key, 1 + 3 * n_layers)
    params = {
        "embedding": jax.random.normal(keys[0], (num_unit, input_dim), jnp.float32)
    }
    layers = []
    k = 1
    for i in range(n_layers):
        d_in, d_out = dims[i], dims[i + 1]
        # W_rel corresponds to nn.Linear(num_relation*d_in, d_out).weight.T
        # reshaped to (num_relation, d_in, d_out); W_self to the self-loop
        # linear; `bias` is the pre-summed (b_rel + b_self) bias vector.
        w_rel = jax.random.normal(keys[k], (num_relation, d_in, d_out), jnp.float32)
        w_rel = w_rel / jnp.sqrt(float(num_relation * d_in))
        k += 1
        w_self = jax.random.normal(keys[k], (d_in, d_out), jnp.float32)
        w_self = w_self / jnp.sqrt(float(d_in))
        k += 1
        bias = 0.01 * jax.random.normal(keys[k], (1, d_out), jnp.float32)
        k += 1
        layers.append({"w_rel": w_rel, "w_self": w_self, "bias": bias})
    params["layers"] = layers
    return params


def pack_params(params, num_relation):
    """One-time packing of weights into the kernel layout (NOT per-forward):
    per-layer stacked [W_rel(0..R-1); W_self] in bf16, zero-padded to Dp."""
    layers = params["layers"]
    dims = [params["embedding"].shape[1]] + [lp["w_self"].shape[1] for lp in layers]
    Dp = _round_up(max(dims), 128)
    L = len(layers)
    R = num_relation
    wcat = jnp.zeros((L, (R + 1) * Dp, Dp), jnp.bfloat16)
    bias = jnp.zeros((L, 1, Dp), jnp.float32)
    for l, lp in enumerate(layers):
        d_in, d_out = lp["w_self"].shape
        blk = jnp.zeros((R + 1, Dp, Dp), jnp.bfloat16)
        blk = blk.at[:R, :d_in, :d_out].set(lp["w_rel"].astype(jnp.bfloat16))
        blk = blk.at[R, :d_in, :d_out].set(lp["w_self"].astype(jnp.bfloat16))
        wcat = wcat.at[l].set(blk.reshape((R + 1) * Dp, Dp))
        bias = bias.at[l, 0, :d_out].set(lp["bias"][0])
    return {"embedding": params["embedding"], "wcat": wcat, "bias": bias,
            "dims": dims, "Dp": Dp}


def build_adjacency(edge_list, edge_weight, num_node_padded, num_relation):
    """Densify the relational scatter-add directly at the padded size and cast
    once to the kernel compute dtype (single O(R*Np^2) padded buffer instead of
    an unpadded f32 copy plus a padded bf16 copy).
    adj[r, v, u] += w for edge (u, v, r).
    TODO(synk): for large sparse glycan graphs switch to CSR + scalar-prefetch
    gather instead of a dense (R, Np, Np) adjacency."""
    u, v, r = edge_list[:, 0], edge_list[:, 1], edge_list[:, 2]
    adj = jnp.zeros((num_relation, num_node_padded, num_node_padded), jnp.float32)
    adj = adj.at[r, v, u].add(edge_weight)
    return adj.astype(jnp.bfloat16)


def glycan_gearnet_forward(packed, unit_type, adj_p, node2graph, num_graph):
    dims = packed["dims"]
    Dp = packed["Dp"]
    N = unit_type.shape[0]
    Np = adj_p.shape[1]
    Gp = _round_up(max(num_graph, 16), 16)

    # glue: embedding gather + zero padding + bf16 casts.  Padding is inert:
    # padded adjacency rows/cols, weight rows/cols, bias entries and
    # membership columns are zero, so padded node rows never leak into real
    # rows or into the readout.
    x0 = packed["embedding"][unit_type]                                  # (N, d0)
    x0_p = jnp.zeros((Np, Dp), jnp.bfloat16).at[:N, :dims[0]].set(
        x0.astype(jnp.bfloat16))
    memb = jax.nn.one_hot(node2graph, num_graph, dtype=jnp.bfloat16).T   # (G, N)
    memb_p = jnp.zeros((Gp, Np), jnp.bfloat16).at[:num_graph, :N].set(memb)

    node_p, graph_p = gearnet_fused(adj_p, x0_p, packed["wcat"],
                                    packed["bias"], memb_p)
    d_last = dims[-1]
    return {
        "node_feature": node_p[:N, :d_last],
        "graph_feature": graph_p[:num_graph, :d_last],
    }


def reference_forward(params, unit_type, adj, node2graph, num_graph):
    """Pure-JAX reference with the same mixed precision as the kernel
    (bf16 x bf16 -> f32 accumulation, stacked [relations | self] matmul)."""
    f32 = jnp.float32
    x_bf = params["embedding"][unit_type].astype(jnp.bfloat16)
    adj_bf = adj.astype(jnp.bfloat16)
    hidden = None
    for lp in params["layers"]:
        R, d_in, d_out = lp["w_rel"].shape
        ax = [
            jnp.dot(adj_bf[r], x_bf, preferred_element_type=f32).astype(jnp.bfloat16)
            for r in range(R)
        ]
        stacked = jnp.concatenate(ax + [x_bf], axis=-1)          # (N, (R+1)*d_in)
        w_cat = jnp.concatenate(
            [lp["w_rel"].reshape(R * d_in, d_out), lp["w_self"]],
            axis=0).astype(jnp.bfloat16)
        hidden = jnp.maximum(
            jnp.dot(stacked, w_cat, preferred_element_type=f32) + lp["bias"], 0.0)
        x_bf = hidden.astype(jnp.bfloat16)
    membership = jax.nn.one_hot(node2graph, num_graph, dtype=jnp.bfloat16).T
    graph_feature = jnp.dot(membership, x_bf, preferred_element_type=f32)
    return hidden, graph_feature


# ----------------------------------- main ------------------------------------

if __name__ == "__main__":
    key = jax.random.PRNGKey(0)
    num_node = 16
    num_graph = 2
    num_unit = 10
    input_dim = 32
    hidden_dims = [32, 32]
    num_relation = 3
    num_edge = 40

    k1, k2, k3, k4, k5 = jax.random.split(key, 5)
    unit_type = jax.random.randint(k1, (num_node,), 0, num_unit)
    node_in = jax.random.randint(k2, (num_edge,), 0, num_node)
    node_out = jax.random.randint(k3, (num_edge,), 0, num_node)
    relation = jax.random.randint(k4, (num_edge,), 0, num_relation)
    edge_list = jnp.stack([node_in, node_out, relation], axis=1)
    edge_weight = jnp.ones((num_edge,), jnp.float32)
    node2graph = jnp.concatenate(
        [jnp.zeros(num_node // 2, jnp.int32),
         jnp.ones(num_node - num_node // 2, jnp.int32)]
    )

    params = init_params(k5, num_unit, input_dim, hidden_dims, num_relation)
    packed = pack_params(params, num_relation)          # one-time weight packing

    Np = _round_up(max(num_node, 128), 128)
    adj_p = build_adjacency(edge_list, edge_weight, Np, num_relation)

    out = glycan_gearnet_forward(packed, unit_type, adj_p, node2graph, num_graph)
    node_feature = jax.block_until_ready(out["node_feature"])
    graph_feature = jax.block_until_ready(out["graph_feature"])

    ref_nf, ref_gf = reference_forward(params, unit_type,
                                       adj_p[:, :num_node, :num_node],
                                       node2graph, num_graph)
    assert node_feature.shape == (num_node, hidden_dims[-1])
    assert graph_feature.shape == (num_graph, hidden_dims[-1])
    assert jnp.allclose(node_feature, ref_nf, atol=1e-3, rtol=1e-3)
    assert jnp.allclose(graph_feature, ref_gf, atol=1e-3, rtol=1e-3)
    print("KERNEL_OK")
</pallas_src>

<mosaic_0001>
module attributes {stable_mosaic.version = 11 : i64} {
  func.func @_fused_gearnet_kernel(%arg0: i32, %arg1: memref<3x128x128xbf16, #tpu.memory_space<vmem>>, %arg2: memref<128x128xbf16, #tpu.memory_space<vmem>>, %arg3: memref<2x512x128xbf16, #tpu.memory_space<vmem>>, %arg4: memref<2x1x128xf32, #tpu.memory_space<vmem>>, %arg5: memref<16x128xbf16, #tpu.memory_space<vmem>>, %arg6: memref<128x128xf32, #tpu.memory_space<vmem>>, %arg7: memref<16x128xf32, #tpu.memory_space<vmem>>, %arg8: memref<128x128xbf16, #tpu.memory_space<vmem>>, %arg9: memref<128x128xbf16, #tpu.memory_space<vmem>>, %arg10: memref<128x512xbf16, #tpu.memory_space<vmem>>) attributes {dimension_semantics = [#tpu.dimension_semantics<arbitrary>], iteration_bounds = array<i64: 1>, scalar_prefetch = 0 : i64, scratch_operands = 3 : i64, tpu.core_type = #tpu.core_type<tc>, window_params = [{pipeline_mode = #tpu.pipeline_mode<synchronous>, transform_indices = @transform_0, window_bounds = array<i64: 3, 128, 128>}, {pipeline_mode = #tpu.pipeline_mode<synchronous>, transform_indices = @transform_1, window_bounds = array<i64: 128, 128>}, {pipeline_mode = #tpu.pipeline_mode<synchronous>, transform_indices = @transform_2, window_bounds = array<i64: 2, 512, 128>}, {pipeline_mode = #tpu.pipeline_mode<synchronous>, transform_indices = @transform_3, window_bounds = array<i64: 2, 1, 128>}, {pipeline_mode = #tpu.pipeline_mode<synchronous>, transform_indices = @transform_4, window_bounds = array<i64: 16, 128>}, {pipeline_mode = #tpu.pipeline_mode<synchronous>, transform_indices = @transform_5, window_bounds = array<i64: 128, 128>}, {pipeline_mode = #tpu.pipeline_mode<synchronous>, transform_indices = @transform_6, window_bounds = array<i64: 16, 128>}]} {
    %c0 = arith.constant 0 : index
    %c0_0 = arith.constant 0 : index
    %0 = vector.load %arg2[%c0, %c0_0] : memref<128x128xbf16, #tpu.memory_space<vmem>>, vector<128x128xbf16>
    %c0_1 = arith.constant 0 : index
    %c0_2 = arith.constant 0 : index
    %c0_3 = arith.constant 0 : index
    %1 = vector.load %arg1[%c0_1, %c0_2, %c0_3] : memref<3x128x128xbf16, #tpu.memory_space<vmem>>, vector<1x128x128xbf16>
    %2 = vector.shape_cast %1 : vector<1x128x128xbf16> to vector<128x128xbf16>
    %cst = arith.constant dense<0.000000e+00> : vector<128x128xf32>
    %3 = tpu.matmul %2, %0, %cst {dimension_numbers = #tpu.dot_dimension_numbers<[1], [0], [0], [1], [0, 0, 1, 1], [], []>} : vector<128x128xbf16>, vector<128x128xbf16>, vector<128x128xf32> -> vector<128x128xf32>
    %4 = arith.truncf %3 : vector<128x128xf32> to vector<128x128xbf16>
    %c0_4 = arith.constant 0 : index
    %c0_5 = arith.constant 0 : index
    %5 = vector.load %arg10[%c0_4, %c0_5] : memref<128x512xbf16, #tpu.memory_space<vmem>>, vector<128x128xbf16>
    tpu.vector_store %arg10[%c0_4, %c0_5], %4 {strides = array<i32>} : memref<128x512xbf16, #tpu.memory_space<vmem>>, vector<128x128xbf16>,
    %c1 = arith.constant 1 : index
    %c0_6 = arith.constant 0 : index
    %c0_7 = arith.constant 0 : index
    %6 = vector.load %arg1[%c1, %c0_6, %c0_7] : memref<3x128x128xbf16, #tpu.memory_space<vmem>>, vector<1x128x128xbf16>
    %7 = vector.shape_cast %6 : vector<1x128x128xbf16> to vector<128x128xbf16>
    %cst_8 = arith.constant dense<0.000000e+00> : vector<128x128xf32>
    %8 = tpu.matmul %7, %0, %cst_8 {dimension_numbers = #tpu.dot_dimension_numbers<[1], [0], [0], [1], [0, 0, 1, 1], [], []>} : vector<128x128xbf16>, vector<128x128xbf16>, vector<128x128xf32> -> vector<128x128xf32>
    %9 = arith.truncf %8 : vector<128x128xf32> to vector<128x128xbf16>
    %c0_9 = arith.constant 0 : index
    %c128 = arith.constant 128 : index
    %10 = vector.load %arg10[%c0_9, %c128] : memref<128x512xbf16, #tpu.memory_space<vmem>>, vector<128x128xbf16>
    tpu.vector_store %arg10[%c0_9, %c128], %9 {strides = array<i32>} : memref<128x512xbf16, #tpu.memory_space<vmem>>, vector<128x128xbf16>,
    %c2 = arith.constant 2 : index
    %c0_10 = arith.constant 0 : index
    %c0_11 = arith.constant 0 : index
    %11 = vector.load %arg1[%c2, %c0_10, %c0_11] : memref<3x128x128xbf16, #tpu.memory_space<vmem>>, vector<1x128x128xbf16>
    %12 = vector.shape_cast %11 : vector<1x128x128xbf16> to vector<128x128xbf16>
    %cst_12 = arith.constant dense<0.000000e+00> : vector<128x128xf32>
    %13 = tpu.matmul %12, %0, %cst_12 {dimension_numbers = #tpu.dot_dimension_numbers<[1], [0], [0], [1], [0, 0, 1, 1], [], []>} : vector<128x128xbf16>, vector<128x128xbf16>, vector<128x128xf32> -> vector<128x128xf32>
    %14 = arith.truncf %13 : vector<128x128xf32> to vector<128x128xbf16>
    %c0_13 = arith.constant 0 : index
    %c256 = arith.constant 256 : index
    %15 = vector.load %arg10[%c0_13, %c256] : memref<128x512xbf16, #tpu.memory_space<vmem>>, vector<128x128xbf16>
    tpu.vector_store %arg10[%c0_13, %c256], %14 {strides = array<i32>} : memref<128x512xbf16, #tpu.memory_space<vmem>>, vector<128x128xbf16>,
    %c0_14 = arith.constant 0 : index
    %c384 = arith.constant 384 : index
    %16 = vector.load %arg10[%c0_14, %c384] : memref<128x512xbf16, #tpu.memory_space<vmem>>, vector<128x128xbf16>
    tpu.vector_store %arg10[%c0_14, %c384], %0 {strides = array<i32>} : memref<128x512xbf16, #tpu.memory_space<vmem>>, vector<128x128xbf16>,
    %c0_15 = arith.constant 0 : index
    %c0_16 = arith.constant 0 : index
    %17 = vector.load %arg10[%c0_15, %c0_16] : memref<128x512xbf16, #tpu.memory_space<vmem>>, vector<128x512xbf16>
    %c0_17 = arith.constant 0 : index
    %c0_18 = arith.constant 0 : index
    %c0_19 = arith.constant 0 : index
    %18 = vector.load %arg3[%c0_17, %c0_18, %c0_19] : memref<2x512x128xbf16, #tpu.memory_space<vmem>>, vector<1x512x128xbf16>
    %19 = vector.shape_cast %18 : vector<1x512x128xbf16> to vector<512x128xbf16>
    %cst_20 = arith.constant dense<0.000000e+00> : vector<128x128xf32>
    %20 = tpu.matmul %17, %19, %cst_20 {dimension_numbers = #tpu.dot_dimension_numbers<[1], [0], [0], [1], [0, 0, 1, 1], [], []>} : vector<128x512xbf16>, vector<512x128xbf16>, vector<128x128xf32> -> vector<128x128xf32>
    %c0_21 = arith.constant 0 : index
    %c0_22 = arith.constant 0 : index
    %c0_23 = arith.constant 0 : index
    %21 = vector.load %arg4[%c0_21, %c0_22, %c0_23] : memref<2x1x128xf32, #tpu.memory_space<vmem>>, vector<1x1x128xf32>
    %22 = vector.shape_cast %21 : vector<1x1x128xf32> to vector<1x128xf32>
    %23 = vector.broadcast %22 : vector<1x128xf32> to vector<128x128xf32>
    %24 = arith.addf %20, %23 : vector<128x128xf32>
    %cst_24 = arith.constant 0.000000e+00 : f32
    %25 = vector.broadcast %cst_24 : f32 to vector<128x128xf32>
    %26 = arith.maximumf %24, %25 : vector<128x128xf32>
    %27 = arith.truncf %26 : vector<128x128xf32> to vector<128x128xbf16>
    %c0_25 = arith.constant 0 : index
    %c0_26 = arith.constant 0 : index
    %28 = vector.load %arg8[%c0_25, %c0_26] : memref<128x128xbf16, #tpu.memory_space<vmem>>, vector<128x128xbf16>
    tpu.vector_store %arg8[%c0_25, %c0_26], %27 {strides = array<i32>} : memref<128x128xbf16, #tpu.memory_space<vmem>>, vector<128x128xbf16>,
    %c0_27 = arith.constant 0 : index
    %c0_28 = arith.constant 0 : index
    %29 = vector.load %arg8[%c0_27, %c0_28] : memref<128x128xbf16, #tpu.memory_space<vmem>>, vector<128x128xbf16>
    %c0_29 = arith.constant 0 : index
    %c0_30 = arith.constant 0 : index
    %c0_31 = arith.constant 0 : index
    %30 = vector.load %arg1[%c0_29, %c0_30, %c0_31] : memref<3x128x128xbf16, #tpu.memory_space<vmem>>, vector<1x128x128xbf16>
    %31 = vector.shape_cast %30 : vector<1x128x128xbf16> to vector<128x128xbf16>
    %cst_32 = arith.constant dense<0.000000e+00> : vector<128x128xf32>
    %32 = tpu.matmul %31, %29, %cst_32 {dimension_numbers = #tpu.dot_dimension_numbers<[1], [0], [0], [1], [0, 0, 1, 1], [], []>} : vector<128x128xbf16>, vector<128x128xbf16>, vector<128x128xf32> -> vector<128x128xf32>
    %33 = arith.truncf %32 : vector<128x128xf32> to vector<128x128xbf16>
    %c0_33 = arith.constant 0 : index
    %c0_34 = arith.constant 0 : index
    %34 = vector.load %arg10[%c0_33, %c0_34] : memref<128x512xbf16, #tpu.memory_space<vmem>>, vector<128x128xbf16>
    tpu.vector_store %arg10[%c0_33, %c0_34], %33 {strides = array<i32>} : memref<128x512xbf16, #tpu.memory_space<vmem>>, vector<128x128xbf16>,
    %c1_35 = arith.constant 1 : index
    %c0_36 = arith.constant 0 : index
    %c0_37 = arith.constant 0 : index
    %35 = vector.load %arg1[%c1_35, %c0_36, %c0_37] : memref<3x128x128xbf16, #tpu.memory_space<vmem>>, vector<1x128x128xbf16>
    %36 = vector.shape_cast %35 : vector<1x128x128xbf16> to vector<128x128xbf16>
    %cst_38 = arith.constant dense<0.000000e+00> : vector<128x128xf32>
    %37 = tpu.matmul %36, %29, %cst_38 {dimension_numbers = #tpu.dot_dimension_numbers<[1], [0], [0], [1], [0, 0, 1, 1], [], []>} : vector<128x128xbf16>, vector<128x128xbf16>, vector<128x128xf32> -> vector<128x128xf32>
    %38 = arith.truncf %37 : vector<128x128xf32> to vector<128x128xbf16>
    %c0_39 = arith.constant 0 : index
    %c128_40 = arith.constant 128 : index
    %39 = vector.load %arg10[%c0_39, %c128_40] : memref<128x512xbf16, #tpu.memory_space<vmem>>, vector<128x128xbf16>
    tpu.vector_store %arg10[%c0_39, %c128_40], %38 {strides = array<i32>} : memref<128x512xbf16, #tpu.memory_space<vmem>>, vector<128x128xbf16>,
    %c2_41 = arith.constant 2 : index
    %c0_42 = arith.constant 0 : index
    %c0_43 = arith.constant 0 : index
    %40 = vector.load %arg1[%c2_41, %c0_42, %c0_43] : memref<3x128x128xbf16, #tpu.memory_space<vmem>>, vector<1x128x128xbf16>
    %41 = vector.shape_cast %40 : vector<1x128x128xbf16> to vector<128x128xbf16>
    %cst_44 = arith.constant dense<0.000000e+00> : vector<128x128xf32>
    %42 = tpu.matmul %41, %29, %cst_44 {dimension_numbers = #tpu.dot_dimension_numbers<[1], [0], [0], [1], [0, 0, 1, 1], [], []>} : vector<128x128xbf16>, vector<128x128xbf16>, vector<128x128xf32> -> vector<128x128xf32>
    %43 = arith.truncf %42 : vector<128x128xf32> to vector<128x128xbf16>
    %c0_45 = arith.constant 0 : index
    %c256_46 = arith.constant 256 : index
    %44 = vector.load %arg10[%c0_45, %c256_46] : memref<128x512xbf16, #tpu.memory_space<vmem>>, vector<128x128xbf16>
    tpu.vector_store %arg10[%c0_45, %c256_46], %43 {strides = array<i32>} : memref<128x512xbf16, #tpu.memory_space<vmem>>, vector<128x128xbf16>,
    %c0_47 = arith.constant 0 : index
    %c384_48 = arith.constant 384 : index
    %45 = vector.load %arg10[%c0_47, %c384_48] : memref<128x512xbf16, #tpu.memory_space<vmem>>, vector<128x128xbf16>
    tpu.vector_store %arg10[%c0_47, %c384_48], %29 {strides = array<i32>} : memref<128x512xbf16, #tpu.memory_space<vmem>>, vector<128x128xbf16>,
    %c0_49 = arith.constant 0 : index
    %c0_50 = arith.constant 0 : index
    %46 = vector.load %arg10[%c0_49, %c0_50] : memref<128x512xbf16, #tpu.memory_space<vmem>>, vector<128x512xbf16>
    %c1_51 = arith.constant 1 : index
    %c0_52 = arith.constant 0 : index
    %c0_53 = arith.constant 0 : index
    %47 = vector.load %arg3[%c1_51, %c0_52, %c0_53] : memref<2x512x128xbf16, #tpu.memory_space<vmem>>, vector<1x512x128xbf16>
    %48 = vector.shape_cast %47 : vector<1x512x128xbf16> to vector<512x128xbf16>
    %cst_54 = arith.constant dense<0.000000e+00> : vector<128x128xf32>
    %49 = tpu.matmul %46, %48, %cst_54 {dimension_numbers = #tpu.dot_dimension_numbers<[1], [0], [0], [1], [0, 0, 1, 1], [], []>} : vector<128x512xbf16>, vector<512x128xbf16>, vector<128x128xf32> -> vector<128x128xf32>
    %c1_55 = arith.constant 1 : index
    %c0_56 = arith.constant 0 : index
    %c0_57 = arith.constant 0 : index
    %50 = vector.load %arg4[%c1_55, %c0_56, %c0_57] : memref<2x1x128xf32, #tpu.memory_space<vmem>>, vector<1x1x128xf32>
    %51 = vector.shape_cast %50 : vector<1x1x128xf32> to vector<1x128xf32>
    %52 = vector.broadcast %51 : vector<1x128xf32> to vector<128x128xf32>
    %53 = arith.addf %49, %52 : vector<128x128xf32>
    %cst_58 = arith.constant 0.000000e+00 : f32
    %54 = vector.broadcast %cst_58 : f32 to vector<128x128xf32>
    %55 = arith.maximumf %53, %54 : vector<128x128xf32>
    %c0_59 = arith.constant 0 : index
    %c0_60 = arith.constant 0 : index
    %56 = vector.load %arg6[%c0_59, %c0_60] : memref<128x128xf32, #tpu.memory_space<vmem>>, vector<128x128xf32>
    tpu.vector_store %arg6[%c0_59, %c0_60], %55 {strides = array<i32>} : memref<128x128xf32, #tpu.memory_space<vmem>>, vector<128x128xf32>,
    %c0_61 = arith.constant 0 : index
    %c0_62 = arith.constant 0 : index
    %57 = vector.load %arg5[%c0_61, %c0_62] : memref<16x128xbf16, #tpu.memory_space<vmem>>, vector<16x128xbf16>
    %58 = arith.truncf %55 : vector<128x128xf32> to vector<128x128xbf16>
    %cst_63 = arith.constant dense<0.000000e+00> : vector<16x128xf32>
    %59 = tpu.matmul %57, %58, %cst_63 {dimension_numbers = #tpu.dot_dimension_numbers<[1], [0], [0], [1], [0, 0, 1, 1], [], []>} : vector<16x128xbf16>, vector<128x128xbf16>, vector<16x128xf32> -> vector<16x128xf32>
    %c0_64 = arith.constant 0 : index
    %c0_65 = arith.constant 0 : index
    %60 = vector.load %arg7[%c0_64, %c0_65] : memref<16x128xf32, #tpu.memory_space<vmem>>, vector<16x128xf32>
    tpu.vector_store %arg7[%c0_64, %c0_65], %59 {strides = array<i32>} : memref<16x128xf32, #tpu.memory_space<vmem>>, vector<16x128xf32>,
    return
  }
  func.func @transform_0(%arg0: i32) -> (i32, i32, i32) {
    %c0_i32 = arith.constant 0 : i32
    %c0_i32_0 = arith.constant 0 : i32
    %c0_i32_1 = arith.constant 0 : i32
    %c0_i32_2 = arith.constant 0 : i32
    return %c0_i32, %c0_i32_0, %c0_i32_1 : i32, i32, i32
  }
  func.func @transform_1(%arg0: i32) -> (i32, i32) {
    %c0_i32 = arith.constant 0 : i32
    %c0_i32_0 = arith.constant 0 : i32
    %c0_i32_1 = arith.constant 0 : i32
    return %c0_i32, %c0_i32_0 : i32, i32
  }
  func.func @transform_2(%arg0: i32) -> (i32, i32, i32) {
    %c0_i32 = arith.constant 0 : i32
    %c0_i32_0 = arith.constant 0 : i32
    %c0_i32_1 = arith.constant 0 : i32
    %c0_i32_2 = arith.constant 0 : i32
    return %c0_i32, %c0_i32_0, %c0_i32_1 : i32, i32, i32
  }
  func.func @transform_3(%arg0: i32) -> (i32, i32, i32) {
    %c0_i32 = arith.constant 0 : i32
    %c0_i32_0 = arith.constant 0 : i32
    %c0_i32_1 = arith.constant 0 : i32
    %c0_i32_2 = arith.constant 0 : i32
    return %c0_i32, %c0_i32_0, %c0_i32_1 : i32, i32, i32
  }
  func.func @transform_4(%arg0: i32) -> (i32, i32) {
    %c0_i32 = arith.constant 0 : i32
    %c0_i32_0 = arith.constant 0 : i32
    %c0_i32_1 = arith.constant 0 : i32
    return %c0_i32, %c0_i32_0 : i32, i32
  }
  func.func @transform_5(%arg0: i32) -> (i32, i32) {
    %c0_i32 = arith.constant 0 : i32
    %c0_i32_0 = arith.constant 0 : i32
    %c0_i32_1 = arith.constant 0 : i32
    return %c0_i32, %c0_i32_0 : i32, i32
  }
  func.func @transform_6(%arg0: i32) -> (i32, i32) {
    %c0_i32 = arith.constant 0 : i32
    %c0_i32_0 = arith.constant 0 : i32
    %c0_i32_1 = arith.constant 0 : i32
    return %c0_i32, %c0_i32_0 : i32, i32
  }
}

module attributes {stable_mosaic.version = 11 : i64} {
  func.func @_fused_gearnet_kernel(%arg0: i32, %arg1: memref<3x128x128xbf16, #tpu.memory_space<vmem>>, %arg2: memref<128x128xbf16, #tpu.memory_space<vmem>>, %arg3: memref<2x512x128xbf16, #tpu.memory_space<vmem>>, %arg4: memref<2x1x128xf32, #tpu.memory_space<vmem>>, %arg5: memref<16x128xbf16, #tpu.memory_space<vmem>>, %arg6: memref<128x128xf32, #tpu.memory_space<vmem>>, %arg7: memref<16x128xf32, #tpu.memory_space<vmem>>, %arg8: memref<128x128xbf16, #tpu.memory_space<vmem>>, %arg9: memref<128x128xbf16, #tpu.memory_space<vmem>>, %arg10: memref<128x512xbf16, #tpu.memory_space<vmem>>) attributes {dimension_semantics = [#tpu.dimension_semantics<arbitrary>], iteration_bounds = array<i64: 1>, scalar_prefetch = 0 : i64, scratch_operands = 3 : i64, tpu.core_type = #tpu.core_type<tc>, window_params = [{pipeline_mode = #tpu.pipeline_mode<synchronous>, transform_indices = @transform_0, window_bounds = array<i64: 3, 128, 128>}, {pipeline_mode = #tpu.pipeline_mode<synchronous>, transform_indices = @transform_1, window_bounds = array<i64: 128, 128>}, {pipeline_mode = #tpu.pipeline_mode<synchronous>, transform_indices = @transform_2, window_bounds = array<i64: 2, 512, 128>}, {pipeline_mode = #tpu.pipeline_mode<synchronous>, transform_indices = @transform_3, window_bounds = array<i64: 2, 1, 128>}, {pipeline_mode = #tpu.pipeline_mode<synchronous>, transform_indices = @transform_4, window_bounds = array<i64: 16, 128>}, {pipeline_mode = #tpu.pipeline_mode<synchronous>, transform_indices = @transform_5, window_bounds = array<i64: 128, 128>}, {pipeline_mode = #tpu.pipeline_mode<synchronous>, transform_indices = @transform_6, window_bounds = array<i64: 16, 128>}]} {
    %c0 = arith.constant 0 : index
    %c0_0 = arith.constant 0 : index
    %0 = vector.load %arg2[%c0, %c0_0] : memref<128x128xbf16, #tpu.memory_space<vmem>>, vector<128x128xbf16>
    %c0_1 = arith.constant 0 : index
    %c0_2 = arith.constant 0 : index
    %c0_3 = arith.constant 0 : index
    %1 = vector.load %arg1[%c0_1, %c0_2, %c0_3] : memref<3x128x128xbf16, #tpu.memory_space<vmem>>, vector<1x128x128xbf16>
    %2 = vector.shape_cast %1 : vector<1x128x128xbf16> to vector<128x128xbf16>
    %cst = arith.constant dense<0.000000e+00> : vector<128x128xf32>
    %3 = tpu.matmul %2, %0, %cst {dimension_numbers = #tpu.dot_dimension_numbers<[1], [0], [0], [1], [0, 0, 1, 1], [], []>} : vector<128x128xbf16>, vector<128x128xbf16>, vector<128x128xf32> -> vector<128x128xf32>
    %4 = arith.truncf %3 : vector<128x128xf32> to vector<128x128xbf16>
    %c0_4 = arith.constant 0 : index
    %c0_5 = arith.constant 0 : index
    %5 = vector.load %arg10[%c0_4, %c0_5] : memref<128x512xbf16, #tpu.memory_space<vmem>>, vector<128x128xbf16>
    tpu.vector_store %arg10[%c0_4, %c0_5], %4 {strides = array<i32>} : memref<128x512xbf16, #tpu.memory_space<vmem>>, vector<128x128xbf16>,
    %c1 = arith.constant 1 : index
    %c0_6 = arith.constant 0 : index
    %c0_7 = arith.constant 0 : index
    %6 = vector.load %arg1[%c1, %c0_6, %c0_7] : memref<3x128x128xbf16, #tpu.memory_space<vmem>>, vector<1x128x128xbf16>
    %7 = vector.shape_cast %6 : vector<1x128x128xbf16> to vector<128x128xbf16>
    %cst_8 = arith.constant dense<0.000000e+00> : vector<128x128xf32>
    %8 = tpu.matmul %7, %0, %cst_8 {dimension_numbers = #tpu.dot_dimension_numbers<[1], [0], [0], [1], [0, 0, 1, 1], [], []>} : vector<128x128xbf16>, vector<128x128xbf16>, vector<128x128xf32> -> vector<128x128xf32>
    %9 = arith.truncf %8 : vector<128x128xf32> to vector<128x128xbf16>
    %c0_9 = arith.constant 0 : index
    %c128 = arith.constant 128 : index
    %10 = vector.load %arg10[%c0_9, %c128] : memref<128x512xbf16, #tpu.memory_space<vmem>>, vector<128x128xbf16>
    tpu.vector_store %arg10[%c0_9, %c128], %9 {strides = array<i32>} : memref<128x512xbf16, #tpu.memory_space<vmem>>, vector<128x128xbf16>,
    %c2 = arith.constant 2 : index
    %c0_10 = arith.constant 0 : index
    %c0_11 = arith.constant 0 : index
    %11 = vector.load %arg1[%c2, %c0_10, %c0_11] : memref<3x128x128xbf16, #tpu.memory_space<vmem>>, vector<1x128x128xbf16>
    %12 = vector.shape_cast %11 : vector<1x128x128xbf16> to vector<128x128xbf16>
    %cst_12 = arith.constant dense<0.000000e+00> : vector<128x128xf32>
    %13 = tpu.matmul %12, %0, %cst_12 {dimension_numbers = #tpu.dot_dimension_numbers<[1], [0], [0], [1], [0, 0, 1, 1], [], []>} : vector<128x128xbf16>, vector<128x128xbf16>, vector<128x128xf32> -> vector<128x128xf32>
    %14 = arith.truncf %13 : vector<128x128xf32> to vector<128x128xbf16>
    %c0_13 = arith.constant 0 : index
    %c256 = arith.constant 256 : index
    %15 = vector.load %arg10[%c0_13, %c256] : memref<128x512xbf16, #tpu.memory_space<vmem>>, vector<128x128xbf16>
    tpu.vector_store %arg10[%c0_13, %c256], %14 {strides = array<i32>} : memref<128x512xbf16, #tpu.memory_space<vmem>>, vector<128x128xbf16>,
    %c0_14 = arith.constant 0 : index
    %c384 = arith.constant 384 : index
    %16 = vector.load %arg10[%c0_14, %c384] : memref<128x512xbf16, #tpu.memory_space<vmem>>, vector<128x128xbf16>
    tpu.vector_store %arg10[%c0_14, %c384], %0 {strides = array<i32>} : memref<128x512xbf16, #tpu.memory_space<vmem>>, vector<128x128xbf16>,
    %c0_15 = arith.constant 0 : index
    %c0_16 = arith.constant 0 : index
    %17 = vector.load %arg10[%c0_15, %c0_16] : memref<128x512xbf16, #tpu.memory_space<vmem>>, vector<128x512xbf16>
    %c0_17 = arith.constant 0 : index
    %c0_18 = arith.constant 0 : index
    %c0_19 = arith.constant 0 : index
    %18 = vector.load %arg3[%c0_17, %c0_18, %c0_19] : memref<2x512x128xbf16, #tpu.memory_space<vmem>>, vector<1x512x128xbf16>
    %19 = vector.shape_cast %18 : vector<1x512x128xbf16> to vector<512x128xbf16>
    %cst_20 = arith.constant dense<0.000000e+00> : vector<128x128xf32>
    %20 = tpu.matmul %17, %19, %cst_20 {dimension_numbers = #tpu.dot_dimension_numbers<[1], [0], [0], [1], [0, 0, 1, 1], [], []>} : vector<128x512xbf16>, vector<512x128xbf16>, vector<128x128xf32> -> vector<128x128xf32>
    %c0_21 = arith.constant 0 : index
    %c0_22 = arith.constant 0 : index
    %c0_23 = arith.constant 0 : index
    %21 = vector.load %arg4[%c0_21, %c0_22, %c0_23] : memref<2x1x128xf32, #tpu.memory_space<vmem>>, vector<1x1x128xf32>
    %22 = vector.shape_cast %21 : vector<1x1x128xf32> to vector<1x128xf32>
    %23 = vector.broadcast %22 : vector<1x128xf32> to vector<128x128xf32>
    %24 = arith.addf %20, %23 : vector<128x128xf32>
    %cst_24 = arith.constant 0.000000e+00 : f32
    %25 = vector.broadcast %cst_24 : f32 to vector<128x128xf32>
    %26 = arith.maximumf %24, %25 : vector<128x128xf32>
    %27 = arith.truncf %26 : vector<128x128xf32> to vector<128x128xbf16>
    %c0_25 = arith.constant 0 : index
    %c0_26 = arith.constant 0 : index
    %28 = vector.load %arg8[%c0_25, %c0_26] : memref<128x128xbf16, #tpu.memory_space<vmem>>, vector<128x128xbf16>
    tpu.vector_store %arg8[%c0_25, %c0_26], %27 {strides = array<i32>} : memref<128x128xbf16, #tpu.memory_space<vmem>>, vector<128x128xbf16>,
    %c0_27 = arith.constant 0 : index
    %c0_28 = arith.constant 0 : index
    %29 = vector.load %arg8[%c0_27, %c0_28] : memref<128x128xbf16, #tpu.memory_space<vmem>>, vector<128x128xbf16>
    %c0_29 = arith.constant 0 : index
    %c0_30 = arith.constant 0 : index
    %c0_31 = arith.constant 0 : index
    %30 = vector.load %arg1[%c0_29, %c0_30, %c0_31] : memref<3x128x128xbf16, #tpu.memory_space<vmem>>, vector<1x128x128xbf16>
    %31 = vector.shape_cast %30 : vector<1x128x128xbf16> to vector<128x128xbf16>
    %cst_32 = arith.constant dense<0.000000e+00> : vector<128x128xf32>
    %32 = tpu.matmul %31, %29, %cst_32 {dimension_numbers = #tpu.dot_dimension_numbers<[1], [0], [0], [1], [0, 0, 1, 1], [], []>} : vector<128x128xbf16>, vector<128x128xbf16>, vector<128x128xf32> -> vector<128x128xf32>
    %33 = arith.truncf %32 : vector<128x128xf32> to vector<128x128xbf16>
    %c0_33 = arith.constant 0 : index
    %c0_34 = arith.constant 0 : index
    %34 = vector.load %arg10[%c0_33, %c0_34] : memref<128x512xbf16, #tpu.memory_space<vmem>>, vector<128x128xbf16>
    tpu.vector_store %arg10[%c0_33, %c0_34], %33 {strides = array<i32>} : memref<128x512xbf16, #tpu.memory_space<vmem>>, vector<128x128xbf16>,
    %c1_35 = arith.constant 1 : index
    %c0_36 = arith.constant 0 : index
    %c0_37 = arith.constant 0 : index
    %35 = vector.load %arg1[%c1_35, %c0_36, %c0_37] : memref<3x128x128xbf16, #tpu.memory_space<vmem>>, vector<1x128x128xbf16>
    %36 = vector.shape_cast %35 : vector<1x128x128xbf16> to vector<128x128xbf16>
    %cst_38 = arith.constant dense<0.000000e+00> : vector<128x128xf32>
    %37 = tpu.matmul %36, %29, %cst_38 {dimension_numbers = #tpu.dot_dimension_numbers<[1], [0], [0], [1], [0, 0, 1, 1], [], []>} : vector<128x128xbf16>, vector<128x128xbf16>, vector<128x128xf32> -> vector<128x128xf32>
    %38 = arith.truncf %37 : vector<128x128xf32> to vector<128x128xbf16>
    %c0_39 = arith.constant 0 : index
    %c128_40 = arith.constant 128 : index
    %39 = vector.load %arg10[%c0_39, %c128_40] : memref<128x512xbf16, #tpu.memory_space<vmem>>, vector<128x128xbf16>
    tpu.vector_store %arg10[%c0_39, %c128_40], %38 {strides = array<i32>} : memref<128x512xbf16, #tpu.memory_space<vmem>>, vector<128x128xbf16>,
    %c2_41 = arith.constant 2 : index
    %c0_42 = arith.constant 0 : index
    %c0_43 = arith.constant 0 : index
    %40 = vector.load %arg1[%c2_41, %c0_42, %c0_43] : memref<3x128x128xbf16, #tpu.memory_space<vmem>>, vector<1x128x128xbf16>
    %41 = vector.shape_cast %40 : vector<1x128x128xbf16> to vector<128x128xbf16>
    %cst_44 = arith.constant dense<0.000000e+00> : vector<128x128xf32>
    %42 = tpu.matmul %41, %29, %cst_44 {dimension_numbers = #tpu.dot_dimension_numbers<[1], [0], [0], [1], [0, 0, 1, 1], [], []>} : vector<128x128xbf16>, vector<128x128xbf16>, vector<128x128xf32> -> vector<128x128xf32>
    %43 = arith.truncf %42 : vector<128x128xf32> to vector<128x128xbf16>
    %c0_45 = arith.constant 0 : index
    %c256_46 = arith.constant 256 : index
    %44 = vector.load %arg10[%c0_45, %c256_46] : memref<128x512xbf16, #tpu.memory_space<vmem>>, vector<128x128xbf16>
    tpu.vector_store %arg10[%c0_45, %c256_46], %43 {strides = array<i32>} : memref<128x512xbf16, #tpu.memory_space<vmem>>, vector<128x128xbf16>,
    %c0_47 = arith.constant 0 : index
    %c384_48 = arith.constant 384 : index
    %45 = vector.load %arg10[%c0_47, %c384_48] : memref<128x512xbf16, #tpu.memory_space<vmem>>, vector<128x128xbf16>
    tpu.vector_store %arg10[%c0_47, %c384_48], %29 {strides = array<i32>} : memref<128x512xbf16, #tpu.memory_space<vmem>>, vector<128x128xbf16>,
    %c0_49 = arith.constant 0 : index
    %c0_50 = arith.constant 0 : index
    %46 = vector.load %arg10[%c0_49, %c0_50] : memref<128x512xbf16, #tpu.memory_space<vmem>>, vector<128x512xbf16>
    %c1_51 = arith.constant 1 : index
    %c0_52 = arith.constant 0 : index
    %c0_53 = arith.constant 0 : index
    %47 = vector.load %arg3[%c1_51, %c0_52, %c0_53] : memref<2x512x128xbf16, #tpu.memory_space<vmem>>, vector<1x512x128xbf16>
    %48 = vector.shape_cast %47 : vector<1x512x128xbf16> to vector<512x128xbf16>
    %cst_54 = arith.constant dense<0.000000e+00> : vector<128x128xf32>
    %49 = tpu.matmul %46, %48, %cst_54 {dimension_numbers = #tpu.dot_dimension_numbers<[1], [0], [0], [1], [0, 0, 1, 1], [], []>} : vector<128x512xbf16>, vector<512x128xbf16>, vector<128x128xf32> -> vector<128x128xf32>
    %c1_55 = arith.constant 1 : index
    %c0_56 = arith.constant 0 : index
    %c0_57 = arith.constant 0 : index
    %50 = vector.load %arg4[%c1_55, %c0_56, %c0_57] : memref<2x1x128xf32, #tpu.memory_space<vmem>>, vector<1x1x128xf32>
    %51 = vector.shape_cast %50 : vector<1x1x128xf32> to vector<1x128xf32>
    %52 = vector.broadcast %51 : vector<1x128xf32> to vector<128x128xf32>
    %53 = arith.addf %49, %52 : vector<128x128xf32>
    %cst_58 = arith.constant 0.000000e+00 : f32
    %54 = vector.broadcast %cst_58 : f32 to vector<128x128xf32>
    %55 = arith.maximumf %53, %54 : vector<128x128xf32>
    %c0_59 = arith.constant 0 : index
    %c0_60 = arith.constant 0 : index
    %56 = vector.load %arg6[%c0_59, %c0_60] : memref<128x128xf32, #tpu.memory_space<vmem>>, vector<128x128xf32>
    tpu.vector_store %arg6[%c0_59, %c0_60], %55 {strides = array<i32>} : memref<128x128xf32, #tpu.memory_space<vmem>>, vector<128x128xf32>,
    %c0_61 = arith.constant 0 : index
    %c0_62 = arith.constant 0 : index
    %57 = vector.load %arg5[%c0_61, %c0_62] : memref<16x128xbf16, #tpu.memory_space<vmem>>, vector<16x128xbf16>
    %58 = arith.truncf %55 : vector<128x128xf32> to vector<128x128xbf16>
    %cst_63 = arith.constant dense<0.000000e+00> : vector<16x128xf32>
    %59 = tpu.matmul %57, %58, %cst_63 {dimension_numbers = #tpu.dot_dimension_numbers<[1], [0], [0], [1], [0, 0, 1, 1], [], []>} : vector<16x128xbf16>, vector<128x128xbf16>, vector<16x128xf32> -> vector<16x128xf32>
    %c0_64 = arith.constant 0 : index
    %c0_65 = arith.constant 0 : index
    %60 = vector.load %arg7[%c0_64, %c0_65] : memref<16x128xf32, #tpu.memory_space<vmem>>, vector<16x128xf32>
    tpu.vector_store %arg7[%c0_64, %c0_65], %59 {strides = array<i32>} : memref<16x128xf32, #tpu.memory_space<vmem>>, vector<16x128xf32>,
    return
  }
  func.func @transform_0(%arg0: i32) -> (i32, i32, i32) {
    %c0_i32 = arith.constant 0 : i32
    %c0_i32_0 = arith.constant 0 : i32
    %c0_i32_1 = arith.constant 0 : i32
    %c0_i32_2 = arith.constant 0 : i32
    return %c0_i32, %c0_i32_0, %c0_i32_1 : i32, i32, i32
  }
  func.func @transform_1(%arg0: i32) -> (i32, i32) {
    %c0_i32 = arith.constant 0 : i32
    %c0_i32_0 = arith.constant 0 : i32
    %c0_i32_1 = arith.constant 0 : i32
    return %c0_i32, %c0_i32_0 : i32, i32
  }
  func.func @transform_2(%arg0: i32) -> (i32, i32, i32) {
    %c0_i32 = arith.constant 0 : i32
    %c0_i32_0 = arith.constant 0 : i32
    %c0_i32_1 = arith.constant 0 : i32
    %c0_i32_2 = arith.constant 0 : i32
    return %c0_i32, %c0_i32_0, %c0_i32_1 : i32, i32, i32
  }
  func.func @transform_3(%arg0: i32) -> (i32, i32, i32) {
    %c0_i32 = arith.constant 0 : i32
    %c0_i32_0 = arith.constant 0 : i32
    %c0_i32_1 = arith.constant 0 : i32
    %c0_i32_2 = arith.constant 0 : i32
    return %c0_i32, %c0_i32_0, %c0_i32_1 : i32, i32, i32
  }
  func.func @transform_4(%arg0: i32) -> (i32, i32) {
    %c0_i32 = arith.constant 0 : i32
    %c0_i32_0 = arith.constant 0 : i32
    %c0_i32_1 = arith.constant 0 : i32
    return %c0_i32, %c0_i32_0 : i32, i32
  }
  func.func @transform_5(%arg0: i32) -> (i32, i32) {
    %c0_i32 = arith.constant 0 : i32
    %c0_i32_0 = arith.constant 0 : i32
    %c0_i32_1 = arith.constant 0 : i32
    return %c0_i32, %c0_i32_0 : i32, i32
  }
  func.func @transform_6(%arg0: i32) -> (i32, i32) {
    %c0_i32 = arith.constant 0 : i32
    %c0_i32_0 = arith.constant 0 : i32
    %c0_i32_1 = arith.constant 0 : i32
    return %c0_i32, %c0_i32_0 : i32, i32
  }
}

</mosaic_0001>

<bundles_post_ra>
// kernel: tpu_custom_call.1
= control target key start
LH: loop header
LB: loop body
LE: loop exit
PB: predicated region body
PF: predicated region fallthrough
CT: control target
= control target key end

     0   :  { %12 = vsyncpa [#allocation6], 0  ;;  %s3682_s0 = inlined_call_operand.hbm [shape: bf16[3,128,128], index: 0, kind: input, shape index: {}]   ;;  %s3683_s1 = inlined_call_operand.hbm [shape: bf16[128,128], index: 1, kind: input, shape index: {}]   ;;  %s3684_s2 = inlined_call_operand.hbm [shape: bf16[2,512,128], index: 2, kind: input, shape index: {}]   ;;  %s3685_s3 = inlined_call_operand.vmem [shape: f32[2,1,128], index: 3, kind: input, shape index: {}]   ;;  %s3686_s4 = inlined_call_operand.vmem [shape: bf16[16,128], index: 4, kind: input, shape index: {}]   ;;  %s3687_s5 = inlined_call_operand.hbm [shape: f32[128,128], index: 5, kind: output, shape index: {0}]   ;;  %s3688_s6 = inlined_call_operand.hbm [shape: f32[16,128], index: 6, kind: output, shape index: {1}]  }
   0x1   :  { %13 = vsyncpa [#allocation9], 0 }
   0x2   :  { %14 = vsyncpa [#allocation7], 0 }
   0x3   :  { %15 = vsyncpa [#allocation13], 0  ;;  %s3302_s21 = smov [#allocation8]   ;;  %s3303_s23 = smov [#allocation5]  }
   0x4   :  { %s33_s22 = sshll.u32 %s3302_s21, 4  ;;  %s21_s24 = sshll.u32 %s3303_s23, 4  ;;  %s34_s22 = int_to_ptr.vmem [resolvable:$true] %s33_s22  ;;  %s3348_s24 = int_to_ptr.vmem [resolvable:$true] %s21_s24 }
   0x5   :  { %s3184_s27 = scalar_lea.hbm %s3683_s1, 1024 }
   0x6   :  { %p3185_p0 = scmp.ne.s32.totalorder %s3683_s1, %s3184_s27  ;;  %p3188_p1 = scmp.lt.u32.totalorder %s3184_s27, %s3683_s1 }
   0x8   :  { %p3190_p2 = pnand %p3188_p1, %p3185_p0 }
   0xa   :  { %3193 = shalt.err (!%p3190_p2)
}
   0xb   :  { %s3194_s8 = scalar_lea.vmem %s34_s22, 1024  ;;  %p3199_p4 = scmp.lt.s32.totalorder %s34_s22, %s34_s22 }
   0xc   :  { %p3195_p3 = scmp.ne.s32.totalorder %s34_s22, %s3194_s8  ;;  %p3200_p5 = scmp.lt.s32.totalorder %s3194_s8, %s3194_s8 }
   0xe   :  { %p3201_p6 = por %p3200_p5, %p3199_p4 }
  0x10   :  { %p3202_p7 = pnand %p3201_p6, %p3195_p3 }
  0x12   :  { %3205 = shalt.err (!%p3202_p7)
}
  0x13   :  { %s3304_s9 = smov 64   ;;  %s3305_s10 = smov 4  }
  0x14   :  { %39 = dma.hbm_to_vmem [thread:$0]  %s3683_s1, 1024, %s34_s22, [#allocation9], %s3304_s9, %s3304_s9, %s3305_s10  }
  0x15   :  { %s3206_s15 = scalar_lea.hbm %s3682_s0, 3072 }
  0x16   :  { %p3207_p8 = scmp.ne.s32.totalorder %s3682_s0, %s3206_s15  ;;  %p3210_p9 = scmp.lt.u32.totalorder %s3206_s15, %s3682_s0 }
  0x18   :  { %p3212_p10 = pnand %p3210_p9, %p3207_p8 }
  0x1a   :  { %3215 = shalt.err (!%p3212_p10)
}
  0x1b   :  { %s3216_s20 = scalar_lea.vmem %s3348_s24, 3072  ;;  %p3221_p12 = scmp.lt.s32.totalorder %s3348_s24, %s3348_s24 }
  0x1c   :  { %p3217_p11 = scmp.ne.s32.totalorder %s3348_s24, %s3216_s20  ;;  %p3222_p13 = scmp.lt.s32.totalorder %s3216_s20, %s3216_s20 }
  0x1e   :  { %p3223_p0 = por %p3222_p13, %p3221_p12 }
  0x20   :  { %p3224_p1 = pnand %p3223_p0, %p3217_p11 }
  0x22   :  { %3227 = shalt.err (!%p3224_p1)
}
  0x23   :  { %27 = dma.hbm_to_vmem [thread:$0]  %s3682_s0, 3072, %s3348_s24, [#allocation6], %s3304_s9, %s3304_s9, %s3305_s10  }
  0x24   :  { %s3306_s22 = smov [#allocation10]   ;;  %s3228_s27 = scalar_lea.hbm %s3684_s2, 8192 }
  0x25   :  { %s45_s23 = sshll.u32 %s3306_s22, 4  ;;  %p3229_p2 = scmp.ne.s32.totalorder %s3684_s2, %s3228_s27  ;;  %s46_s23 = int_to_ptr.vmem [resolvable:$true] %s45_s23 }
  0x26   :  { %p3232_p3 = scmp.lt.u32.totalorder %s3228_s27, %s3684_s2 }
  0x28   :  { %p3234_p4 = pnand %p3232_p3, %p3229_p2 }
  0x2a   :  { %3237 = shalt.err (!%p3234_p4)
}
  0x2b   :  { %s3238_s8 = scalar_lea.vmem %s46_s23, 8192  ;;  %p3243_p6 = scmp.lt.s32.totalorder %s46_s23, %s46_s23 }
  0x2c   :  { %p3239_p5 = scmp.ne.s32.totalorder %s46_s23, %s3238_s8  ;;  %p3244_p7 = scmp.lt.s32.totalorder %s3238_s8, %s3238_s8 }
  0x2e   :  { %p3245_p8 = por %p3244_p7, %p3243_p6 }
  0x30   :  { %p3246_p9 = pnand %p3245_p8, %p3239_p5 }
  0x32   :  { %3249 = shalt.err (!%p3246_p9)
}
  0x33   :  { %51 = dma.hbm_to_vmem [thread:$0]  %s3684_s2, 8192, %s46_s23, [#allocation9], %s3304_s9, %s3304_s9, %s3305_s10  }
  0x34   :  { %3294 = dma.done.wait [#allocation6], 3072  }
  0x35   :  { %3295 = vsyncadd [#allocation6], 4294964224 }
  0x36   :  { %3296 = dma.done.wait [#allocation9], 9216  }
  0x37   :  { %3297 = vsyncadd [#allocation9], 4294958080  ;;  %v3400_v0 = vld [vmem:[#allocation8] sm:$0xff]   ;;  %v3402_v1 = vld [vmem:[#allocation8 + $0x8] sm:$0xff]   ;;  %vm3308_vm0 = vmmov 0   ;;  %s3309_s13 = smov [#allocation11]  }
  0x38   :  { %2840 = vmatprep.subr.bf16.mxu0 %v3400_v0  ;;  %2872 = vmatprep.subr.bf16.mxu1 %v3400_v0  ;;  %v3410_v2 = vld [vmem:[#allocation8 + $0x10] sm:$0xff]   ;;  %v3414_v3 = vld [vmem:[#allocation8 + $0x18] sm:$0xff]   ;;  %v3071_v4 = vld [vmem:[#allocation5] sm:$0xff]   ;;  %s2326_s14 = sshll.u32 %s3309_s13, 4  ;;  %s2327_s14 = int_to_ptr.vmem [resolvable:$true] %s2326_s14 }
  0x39   :  { %2841 = vmatpush3.bf16.msra.mxu0 %v3400_v0  ;;  %2873 = vmatpush3.bf16.msra.mxu1 %v3400_v0  ;;  %v3072_v5 = vld [vmem:[#allocation5 + $0x40] sm:$0xff]   ;;  %v3428_v7 = vld [vmem:[#allocation8 + $0x28] sm:$0xff]   ;;  %v3434_v8 = vld [vmem:[#allocation8 + $0x30] sm:$0xff]   ;;  %s3250_s15 = scalar_lea.vmem %s2327_s14, 2048  ;;  %p3255_p11 = scmp.lt.s32.totalorder %s2327_s14, %s2327_s14 }
  0x3a   :  { %2842 = vmatprep.subr.bf16.mxu0 %v3402_v1  ;;  %2874 = vmatprep.subr.bf16.mxu1 %v3402_v1  ;;  %v3422_v6 = vld [vmem:[#allocation8 + $0x20] sm:$0xff]   ;;  %v3440_v9 = vld [vmem:[#allocation8 + $0x38] sm:$0xff]   ;;  %v3073_v10 = vld [vmem:[#allocation5 + $0x8] sm:$0xff]   ;;  %p3251_p10 = scmp.ne.s32.totalorder %s2327_s14, %s3250_s15  ;;  %p3256_p12 = scmp.lt.s32.totalorder %s3250_s15, %s3250_s15 }
  0x3b   :  { %2856 = vmatprep.mubr.bf16.mxu0 %v3071_v4  ;;  %2888 = vmatprep.mubr.bf16.mxu1 %v3072_v5  ;;  %v3074_v11 = vld [vmem:[#allocation5 + $0x48] sm:$0xff]   ;;  %v3075_v12 = vld [vmem:[#allocation5 + $0x10] sm:$0xff]   ;;  %v3095_v14 = vld [vmem:[#allocation10 + $0x40] sm:$0xff]  }
  0x3c   :  { %v3078_v13 = vld [vmem:[#allocation5 + $0x50] sm:$0xff]   ;;  %v3096_v15 = vld [vmem:[#allocation10] sm:$0xff]   ;;  %v3097_v16 = vld [vmem:[#allocation10 + $0x48] sm:$0xff]   ;;  %p3257_p13 = por %p3256_p12, %p3255_p11 }
  0x3d   :  { %2843 = vmatpush3.bf16.msra.mxu0 %v3402_v1  ;;  %2875 = vmatpush3.bf16.msra.mxu1 %v3402_v1  ;;  %v3076_v17 = vld [vmem:[#allocation5 + $0x18] sm:$0xff]   ;;  %v3077_v19 = vld [vmem:[#allocation5 + $0x20] sm:$0xff]   ;;  %v3098_v21 = vld [vmem:[#allocation10 + $0x8] sm:$0xff]  }
  0x3e   :  { %2844 = vmatprep.subr.bf16.mxu0 %v3410_v2  ;;  %2876 = vmatprep.subr.bf16.mxu1 %v3410_v2  ;;  %v3080_v18 = vld [vmem:[#allocation5 + $0x58] sm:$0xff]   ;;  %v3083_v20 = vld [vmem:[#allocation5 + $0x60] sm:$0xff]   ;;  %v3099_v22 = vld [vmem:[#allocation10 + $0x50] sm:$0xff]   ;;  %p3258_p0 = pnand %p3257_p13, %p3251_p10 }
  0x3f   :  { %v3079_v23 = vld [vmem:[#allocation5 + $0x28] sm:$0xff]   ;;  %v3100_v25 = vld [vmem:[#allocation10 + $0x10] sm:$0xff]   ;;  %v3101_v28 = vld [vmem:[#allocation10 + $0x58] sm:$0xff]  }
  0x40   :  { %v3085_v24 = vld [vmem:[#allocation5 + $0x68] sm:$0xff]   ;;  %v3081_v26 = vld [vmem:[#allocation5 + $0x30] sm:$0xff]   ;;  %v3102_v29 = vld [vmem:[#allocation10 + $0x18] sm:$0xff]  }
  0x41   :  { %2845 = vmatpush3.bf16.msra.mxu0 %v3410_v2  ;;  %2877 = vmatpush3.bf16.msra.mxu1 %v3410_v2  ;;  %v3089_v27 = vld [vmem:[#allocation5 + $0x70] sm:$0xff]   ;;  %v3103_v30 = vld [vmem:[#allocation10 + $0x60] sm:$0xff]   ;;  %v3082_v31 = vld [vmem:[#allocation5 + $0x38] sm:$0xff]  }
  0x42   :  { %2846 = vmatprep.subr.bf16.mxu0 %v3414_v3  ;;  %2878 = vmatprep.subr.bf16.mxu1 %v3414_v3  ;;  %v3090_v32 = vld [vmem:[#allocation5 + $0x78] sm:$0xff]   ;;  %v3084_v33 = vld [vmem:[#allocation5 + $0x80] sm:$0xff]   ;;  %v3105_v35 = vld [vmem:[#allocation10 + $0x68] sm:$0xff]  }
  0x43   :  { %v3104_v34 = vld [vmem:[#allocation10 + $0x20] sm:$0xff]   ;;  %v3106_v36 = vld [vmem:[#allocation10 + $0x28] sm:$0xff]   ;;  %v3107_v37 = vld [vmem:[#allocation10 + $0x70] sm:$0xff]  }
  0x44   :  { %v3086_v38 = vld [vmem:[#allocation5 + $0x88] sm:$0xff]   ;;  %v3087_v39 = vld [vmem:[#allocation5 + $0x90] sm:$0xff]   ;;  %v3088_v40 = vld [vmem:[#allocation5 + $0x98] sm:$0xff]  }
  0x45   :  { %2847 = vmatpush3.bf16.msra.mxu0 %v3414_v3  ;;  %2879 = vmatpush3.bf16.msra.mxu1 %v3414_v3  ;;  %v3091_v41 = vld [vmem:[#allocation5 + $0xa0] sm:$0xff]   ;;  %v3092_v42 = vld [vmem:[#allocation5 + $0xa8] sm:$0xff]   ;;  %v3093_v43 = vld [vmem:[#allocation5 + $0xb0] sm:$0xff]  }
  0x46   :  { %2848 = vmatprep.subr.bf16.mxu0 %v3422_v6  ;;  %2880 = vmatprep.subr.bf16.mxu1 %v3422_v6  ;;  %v3094_v44 = vld [vmem:[#allocation5 + $0xb8] sm:$0xff]   ;;  %v3108_v45 = vld [vmem:[#allocation10 + $0x30] sm:$0xff]   ;;  %v3111_v48 = vld [vmem:[#allocation10 + $0xc0] sm:$0xff]  }
  0x47   :  { %v3109_v46 = vld [vmem:[#allocation10 + $0x78] sm:$0xff]   ;;  %v3112_v49 = vld [vmem:[#allocation10 + $0x80] sm:$0xff]   ;;  %v3113_v50 = vld [vmem:[#allocation10 + $0xc8] sm:$0xff]  }
  0x48   :  { %v3110_v47 = vld [vmem:[#allocation10 + $0x38] sm:$0xff]   ;;  %v3114_v51 = vld [vmem:[#allocation10 + $0x88] sm:$0xff]   ;;  %v3115_v52 = vld [vmem:[#allocation10 + $0xd0] sm:$0xff]  }
  0x49   :  { %2849 = vmatpush3.bf16.msra.mxu0 %v3422_v6  ;;  %2881 = vmatpush3.bf16.msra.mxu1 %v3422_v6  ;;  %v3116_v53 = vld [vmem:[#allocation10 + $0x90] sm:$0xff]   ;;  %v3117_v54 = vld [vmem:[#allocation10 + $0xd8] sm:$0xff]   ;;  %v3119_v56 = vld [vmem:[#allocation10 + $0xe0] sm:$0xff]  }
  0x4a   :  { %2850 = vmatprep.subr.bf16.mxu0 %v3428_v7  ;;  %2882 = vmatprep.subr.bf16.mxu1 %v3428_v7  ;;  %v3118_v55 = vld [vmem:[#allocation10 + $0x98] sm:$0xff]   ;;  %v3120_v57 = vld [vmem:[#allocation10 + $0xa0] sm:$0xff]   ;;  %v3121_v58 = vld [vmem:[#allocation10 + $0xe8] sm:$0xff]  }
  0x4b   :  { %v3122_v59 = vld [vmem:[#allocation10 + $0xa8] sm:$0xff]   ;;  %v3123_v60 = vld [vmem:[#allocation10 + $0xf0] sm:$0xff]   ;;  %v3125_v62 = vld [vmem:[#allocation10 + $0xf8] sm:$0xff]  }
  0x4c   :  { %v3124_v61 = vld [vmem:[#allocation10 + $0xb0] sm:$0xff]   ;;  %v3126_v63 = vld [vmem:[#allocation10 + $0xb8] sm:$0xff]  }
  0x4d   :  { %2851 = vmatpush3.bf16.msra.mxu0 %v3428_v7  ;;  %2883 = vmatpush3.bf16.msra.mxu1 %v3428_v7 }
  0x4e   :  { %2852 = vmatprep.subr.bf16.mxu0 %v3434_v8  ;;  %2884 = vmatprep.subr.bf16.mxu1 %v3434_v8 }
  0x51   :  { %2853 = vmatpush3.bf16.msra.mxu0 %v3434_v8  ;;  %2885 = vmatpush3.bf16.msra.mxu1 %v3434_v8 }
  0x52   :  { %2854 = vmatprep.subr.bf16.mxu0 %v3440_v9  ;;  %2886 = vmatprep.subr.bf16.mxu1 %v3440_v9 }
  0x55   :  { %2855 = vmatpush3.bf16.msra.mxu0 %v3440_v9  ;;  %2887 = vmatpush3.bf16.msra.mxu1 %v3440_v9 }
  0x56   :  { %2904 = vmatprep.subr.bf16.mxu0 %v3400_v0  ;;  %2527 = vmatprep.subr.bf16.mxu1 %v3095_v14 }
  0x58   :  { %2857 = vmatmul.mubr.bf16.vlgmr.msra.gmra.mrb[0].mxu0 %v3073_v10  ;;  %2889 = vmatmul.mubr.bf16.vlgmr.msra.gmra.mrb[0].mxu1 %v3074_v11 }
  0x59   :  { %2905 = vmatpush3.bf16.msra.mxu0 %v3400_v0  ;;  %2860 = vmatprep.mubr.bf16.mxu0 %v3075_v12 }
  0x5a   :  { %2906 = vmatprep.subr.bf16.mxu0 %v3402_v1  ;;  %2892 = vmatprep.mubr.bf16.mxu1 %v3078_v13 }
  0x5b   :  { %2528 = vmatpush3.bf16.msra.mxu1 %v3096_v15 }
  0x5c   :  { %2529 = vmatprep.subr.bf16.mxu1 %v3097_v16 }
  0x5d   :  { %2907 = vmatpush3.bf16.msra.mxu0 %v3402_v1 }
  0x5e   :  { %2908 = vmatprep.subr.bf16.mxu0 %v3410_v2 }
  0x5f   :  { %2530 = vmatpush3.bf16.msra.mxu1 %v3098_v21 }
  0x60   :  { %2861 = vmatmul.mubr.bf16.gmra.mrb[4].mxu0 %v3076_v17  ;;  %2893 = vmatmul.mubr.bf16.gmra.mrb[4].mxu1 %v3080_v18 }
  0x61   :  { %2909 = vmatpush3.bf16.msra.mxu0 %v3410_v2  ;;  %2864 = vmatprep.mubr.bf16.mxu0 %v3077_v19 }
  0x62   :  { %2910 = vmatprep.subr.bf16.mxu0 %v3414_v3  ;;  %2896 = vmatprep.mubr.bf16.mxu1 %v3083_v20 }
  0x63   :  { %2531 = vmatprep.subr.bf16.mxu1 %v3099_v22 }
  0x64   :  { %2532 = vmatpush3.bf16.msra.mxu1 %v3100_v25 }
  0x65   :  { %2911 = vmatpush3.bf16.msra.mxu0 %v3414_v3  ;;  %2533 = vmatprep.subr.bf16.mxu1 %v3101_v28 }
  0x66   :  { %2912 = vmatprep.subr.bf16.mxu0 %v3422_v6 }
  0x68   :  { %2865 = vmatmul.mubr.bf16.gmra.mrb[8].mxu0 %v3079_v23  ;;  %2897 = vmatmul.mubr.bf16.gmra.mrb[8].mxu1 %v3085_v24 }
  0x69   :  { %2913 = vmatpush3.bf16.msra.mxu0 %v3422_v6  ;;  %2868 = vmatprep.mubr.bf16.mxu0 %v3081_v26 }
  0x6a   :  { %2914 = vmatprep.subr.bf16.mxu0 %v3428_v7  ;;  %2900 = vmatprep.mubr.bf16.mxu1 %v3089_v27 }
  0x6b   :  { %2534 = vmatpush3.bf16.msra.mxu1 %v3102_v29 }
  0x6c   :  { %2535 = vmatprep.subr.bf16.mxu1 %v3103_v30 }
  0x6d   :  { %2915 = vmatpush3.bf16.msra.mxu0 %v3428_v7 }
  0x6e   :  { %2916 = vmatprep.subr.bf16.mxu0 %v3434_v8 }
  0x6f   :  { %2536 = vmatpush3.bf16.msra.mxu1 %v3104_v34 }
  0x70   :  { %2869 = vmatmul.mubr.bf16.gmra.mrb[12].mxu0 %v3082_v31  ;;  %2901 = vmatmul.mubr.bf16.gmra.mrb[12].mxu1 %v3090_v32 }
  0x71   :  { %2917 = vmatpush3.bf16.msra.mxu0 %v3434_v8  ;;  %2920 = vmatprep.mubr.bf16.mxu0 %v3084_v33 }
  0x72   :  { %2918 = vmatprep.subr.bf16.mxu0 %v3440_v9  ;;  %2537 = vmatprep.subr.bf16.mxu1 %v3105_v35 }
  0x73   :  { %2538 = vmatpush3.bf16.msra.mxu1 %v3106_v36 }
  0x74   :  { %2539 = vmatprep.subr.bf16.mxu1 %v3107_v37 }
  0x75   :  { %2919 = vmatpush3.bf16.msra.mxu0 %v3440_v9 }
  0x76   :  { %2591 = vmatprep.subr.bf16.mxu0 %v3111_v48 }
  0x77   :  { %2540 = vmatpush3.bf16.msra.mxu1 %v3108_v45 }
  0x78   :  { %2921 = vmatmul.mubr.bf16.vlgmr.msra.gmra.mrb[16].mxu0 %v3086_v38  ;;  %2541 = vmatprep.subr.bf16.mxu1 %v3109_v46 }
  0x79   :  { %2924 = vmatprep.mubr.bf16.mxu0 %v3087_v39  ;;  %2592 = vmatpush3.bf16.msra.mxu0 %v3112_v49 }
  0x7a   :  { %2593 = vmatprep.subr.bf16.mxu0 %v3113_v50 }
  0x7b   :  { %2542 = vmatpush3.bf16.msra.mxu1 %v3110_v47 }
  0x7d   :  { %2594 = vmatpush3.bf16.msra.mxu0 %v3114_v51 }
  0x7e   :  { %2595 = vmatprep.subr.bf16.mxu0 %v3115_v52 }
  0x80   :  { %2925 = vmatmul.mubr.bf16.gmra.mrb[20].mxu0 %v3088_v40 }
  0x81   :  { %2928 = vmatprep.mubr.bf16.mxu0 %v3091_v41  ;;  %2596 = vmatpush3.bf16.msra.mxu0 %v3116_v53 }
  0x82   :  { %2597 = vmatprep.subr.bf16.mxu0 %v3117_v54 }
  0x85   :  { %2598 = vmatpush3.bf16.msra.mxu0 %v3118_v55 }
  0x86   :  { %2599 = vmatprep.subr.bf16.mxu0 %v3119_v56 }
  0x88   :  { %2929 = vmatmul.mubr.bf16.gmra.mrb[24].mxu0 %v3092_v42 }
  0x89   :  { %2932 = vmatprep.mubr.bf16.mxu0 %v3093_v43  ;;  %2600 = vmatpush3.bf16.msra.mxu0 %v3120_v57 }
  0x8a   :  { %2601 = vmatprep.subr.bf16.mxu0 %v3121_v58 }
  0x8d   :  { %2602 = vmatpush3.bf16.msra.mxu0 %v3122_v59 }
  0x8e   :  { %2603 = vmatprep.subr.bf16.mxu0 %v3123_v60 }
  0x90   :  { %2933 = vmatmul.mubr.bf16.gmra.mrb[28].mxu0 %v3094_v44 }
  0x91   :  { %1095 = vmatprep.mubr.bf16.mxu0 %v3400_v0  ;;  %2604 = vmatpush3.bf16.msra.mxu0 %v3124_v61 }
  0x92   :  { %2605 = vmatprep.subr.bf16.mxu0 %v3125_v62 }
  0x95   :  { %2606 = vmatpush3.bf16.msra.mxu0 %v3126_v63 }
 0x12b   :  { %v2858_v0 = vpop.f32.mrb[0].mxu0  ;;  %v2890_v4 = vpop.f32.mrb[0].mxu1 }
 0x12c   :  { %v228_v5 = vpop.f32.mrb[1].mxu0  ;;  %v406_v10 = vpop.f32.mrb[1].mxu1 }
 0x12d   :  { %v2859_v11 = vpop.f32.mrb[2].mxu0  ;;  %v2891_v12 = vpop.f32.mrb[2].mxu1 }
 0x12e   :  { %v292_v13 = vpack.c.bf16 %v2859_v11, %v2858_v0  ;;  %v470_v14 = vpack.c.bf16 %v2891_v12, %v2890_v4  ;;  %v231_v15 = vpop.f32.mrb[3].mxu0  ;;  %v409_v16 = vpop.f32.mrb[3].mxu1 }
 0x12f   :  { %v291_v17 = vpack.c.bf16 %v231_v15, %v228_v5  ;;  %v469_v18 = vpack.c.bf16 %v409_v16, %v406_v10 }
 0x131   :  { %998 = vmatprep.mubr.bf16.mxu1 %v469_v18 }
 0x132   :  { %999 = vmatmul.mubr.bf16.vlgmr.msra.gmra.mrb[16].mxu1 %v291_v17 }
 0x133   :  { %v2862_v19 = vpop.f32.mrb[4].mxu0  ;;  %1006 = vmatprep.mubr.bf16.mxu1 %v470_v14  ;;  %v2894_v20 = vpop.f32.mrb[4].mxu1 }
 0x134   :  { %v244_v21 = vpop.f32.mrb[5].mxu0  ;;  %v422_v22 = vpop.f32.mrb[5].mxu1 }
 0x135   :  { %v2863_v23 = vpop.f32.mrb[6].mxu0  ;;  %v2895_v24 = vpop.f32.mrb[6].mxu1 }
 0x136   :  { %v294_v25 = vpack.c.bf16 %v2863_v23, %v2862_v19  ;;  %v247_v26 = vpop.f32.mrb[7].mxu0  ;;  %v472_v27 = vpack.c.bf16 %v2895_v24, %v2894_v20  ;;  %v425_v28 = vpop.f32.mrb[7].mxu1 }
 0x137   :  { %v293_v29 = vpack.c.bf16 %v247_v26, %v244_v21  ;;  %v471_v30 = vpack.c.bf16 %v425_v28, %v422_v22 }
 0x13a   :  { %1007 = vmatmul.mubr.bf16.gmra.mrb[20].mxu1 %v292_v13 }
 0x13b   :  { %v2866_v31 = vpop.f32.mrb[8].mxu0  ;;  %1014 = vmatprep.mubr.bf16.mxu1 %v471_v30  ;;  %v2898_v32 = vpop.f32.mrb[8].mxu1 }
 0x13c   :  { %v260_v33 = vpop.f32.mrb[9].mxu0  ;;  %v438_v34 = vpop.f32.mrb[9].mxu1 }
 0x13d   :  { %v2867_v35 = vpop.f32.mrb[10].mxu0  ;;  %v2899_v36 = vpop.f32.mrb[10].mxu1 }
 0x13e   :  { %v296_v37 = vpack.c.bf16 %v2867_v35, %v2866_v31  ;;  %v263_v38 = vpop.f32.mrb[11].mxu0  ;;  %v474_v39 = vpack.c.bf16 %v2899_v36, %v2898_v32  ;;  %v441_v40 = vpop.f32.mrb[11].mxu1 }
 0x13f   :  { %v295_v41 = vpack.c.bf16 %v263_v38, %v260_v33  ;;  %v473_v42 = vpack.c.bf16 %v441_v40, %v438_v34 }
 0x142   :  { %1015 = vmatmul.mubr.bf16.gmra.mrb[24].mxu1 %v293_v29 }
 0x143   :  { %v2870_v43 = vpop.f32.mrb[12].mxu0  ;;  %1022 = vmatprep.mubr.bf16.mxu1 %v472_v27  ;;  %v2902_v44 = vpop.f32.mrb[12].mxu1 }
 0x144   :  { %v276_v45 = vpop.f32.mrb[13].mxu0  ;;  %v454_v46 = vpop.f32.mrb[13].mxu1 }
 0x145   :  { %v2871_v47 = vpop.f32.mrb[14].mxu0  ;;  %v2903_v48 = vpop.f32.mrb[14].mxu1 }
 0x146   :  { %v298_v49 = vpack.c.bf16 %v2871_v47, %v2870_v43  ;;  %v279_v50 = vpop.f32.mrb[15].mxu0  ;;  %v476_v51 = vpack.c.bf16 %v2903_v48, %v2902_v44  ;;  %v457_v52 = vpop.f32.mrb[15].mxu1 }
 0x147   :  { %v297_v53 = vpack.c.bf16 %v279_v50, %v276_v45  ;;  %v475_v54 = vpack.c.bf16 %v457_v52, %v454_v46 }
 0x14a   :  { %1023 = vmatmul.mubr.bf16.gmra.mrb[28].mxu1 %v294_v25 }
 0x14b   :  { %v2922_v55 = vpop.f32.mrb[16].mxu0  ;;  %1030 = vmatprep.mubr.bf16.mxu1 %v473_v42 }
 0x14c   :  { %v584_v56 = vpop.f32.mrb[17].mxu0 }
 0x14d   :  { %v2923_v57 = vpop.f32.mrb[18].mxu0 }
 0x14e   :  { %v648_v58 = vpack.c.bf16 %v2923_v57, %v2922_v55  ;;  %v587_v59 = vpop.f32.mrb[19].mxu0 }
 0x14f   :  { %v647_v60 = vpack.c.bf16 %v587_v59, %v584_v56 }
 0x151   :  { %1096 = vmatmul.mubr.bf16.vlgmr.msra.gmra.mrb[32].mxu0 %v647_v60 }
 0x152   :  { %1031 = vmatmul.mubr.bf16.gmra.mrb[32].mxu1 %v295_v41  ;;  %1103 = vmatprep.mubr.bf16.mxu0 %v3402_v1  ;;  %v3479_v41 = vld [vmem:[%s3685_s3] ss:$0 sm:$0xff] }
 0x153   :  { %v2926_v61 = vpop.f32.mrb[20].mxu0  ;;  %1038 = vmatprep.mubr.bf16.mxu1 %v474_v39 }
 0x154   :  { %v600_v62 = vpop.f32.mrb[21].mxu0 }
 0x155   :  { %v2927_v63 = vpop.f32.mrb[22].mxu0 }
 0x156   :  { %v650_v0 = vpack.c.bf16 %v2927_v63, %v2926_v61  ;;  %v603_v4 = vpop.f32.mrb[23].mxu0 }
 0x157   :  { %v649_v5 = vpack.c.bf16 %v603_v4, %v600_v62 }
 0x159   :  { %1104 = vmatmul.mubr.bf16.gmra.mrb[36].mxu0 %v648_v58 }
 0x15a   :  { %1039 = vmatmul.mubr.bf16.gmra.mrb[36].mxu1 %v296_v37  ;;  %1111 = vmatprep.mubr.bf16.mxu0 %v3410_v2  ;;  %v3127_v2 = vld [vmem:[#allocation5] sm:$0xff]  }
 0x15b   :  { %1046 = vmatprep.mubr.bf16.mxu1 %v475_v54  ;;  %v2930_v10 = vpop.f32.mrb[24].mxu0 }
 0x15c   :  { %v616_v11 = vpop.f32.mrb[25].mxu0 }
 0x15d   :  { %v2931_v12 = vpop.f32.mrb[26].mxu0 }
 0x15e   :  { %v652_v13 = vpack.c.bf16 %v2931_v12, %v2930_v10  ;;  %v619_v14 = vpop.f32.mrb[27].mxu0 }
 0x15f   :  { %v651_v15 = vpack.c.bf16 %v619_v14, %v616_v11 }
 0x161   :  { %1112 = vmatmul.mubr.bf16.gmra.mrb[40].mxu0 %v649_v5 }
 0x162   :  { %1047 = vmatmul.mubr.bf16.gmra.mrb[40].mxu1 %v297_v53  ;;  %1119 = vmatprep.mubr.bf16.mxu0 %v3414_v3  ;;  %v3128_v3 = vld [vmem:[#allocation5 + $0x40] sm:$0xff]  }
 0x163   :  { %1054 = vmatprep.mubr.bf16.mxu1 %v476_v51  ;;  %v2934_v1 = vpop.f32.mrb[28].mxu0 }
 0x164   :  { %v632_v16 = vpop.f32.mrb[29].mxu0 }
 0x165   :  { %v2935_v17 = vpop.f32.mrb[30].mxu0 }
 0x166   :  { %v654_v18 = vpack.c.bf16 %v2935_v17, %v2934_v1  ;;  %v635_v19 = vpop.f32.mrb[31].mxu0 }
 0x167   :  { %v653_v20 = vpack.c.bf16 %v635_v19, %v632_v16 }
 0x169   :  { %1120 = vmatmul.mubr.bf16.gmra.mrb[44].mxu0 %v650_v0 }
 0x16a   :  { %1055 = vmatmul.mubr.bf16.gmra.mrb[44].mxu1 %v298_v49  ;;  %1127 = vmatprep.mubr.bf16.mxu0 %v3422_v6 }
 0x16b   :  { %2952 = vmatprep.mubr.bf16.mxu1 %v3127_v2 }
 0x171   :  { %1128 = vmatmul.mubr.bf16.gmra.mrb[48].mxu0 %v651_v15 }
 0x172   :  { %1135 = vmatprep.mubr.bf16.mxu0 %v3428_v7 }
 0x179   :  { %1136 = vmatmul.mubr.bf16.gmra.mrb[52].mxu0 %v652_v13 }
 0x17a   :  { %1143 = vmatprep.mubr.bf16.mxu0 %v3434_v8 }
 0x181   :  { %1144 = vmatmul.mubr.bf16.gmra.mrb[56].mxu0 %v653_v20 }
 0x182   :  { %1151 = vmatprep.mubr.bf16.mxu0 %v3440_v9 }
 0x189   :  { %1152 = vmatmul.mubr.bf16.gmra.mrb[60].mxu0 %v654_v18 }
 0x18a   :  { %2984 = vmatprep.mubr.bf16.mxu0 %v3128_v3 }
 0x205   :  { %v2543_v21 = vpop.f32.mrb[16].mxu1 }
 0x206   :  { %v2544_v22 = vpop.f32.mrb[17].mxu1 }
 0x207   :  { %v2545_v23 = vadd.f32 %v2544_v22, %v2543_v21  ;;  %v2546_v24 = vpop.f32.mrb[18].mxu1 }
 0x208   :  { %v2547_v25 = vpop.f32.mrb[19].mxu1 }
 0x209   :  { %v2548_v6 = vadd.f32 %v2547_v25, %v2546_v24  ;;  %v1001_v45 = vadd.f32 %v2545_v23, %v3479_v41 }
 0x20b   :  { %v1004_v52 = vadd.f32 %v2548_v6, %v3479_v41 }
 0x20d   :  { %v2549_v26 = vpop.f32.mrb[20].mxu1 }
 0x20e   :  { %v2550_v27 = vpop.f32.mrb[21].mxu1 }
 0x20f   :  { %v2551_v7 = vadd.f32 %v2550_v27, %v2549_v26  ;;  %v2552_v28 = vpop.f32.mrb[22].mxu1 }
 0x210   :  { %v2553_v29 = vpop.f32.mrb[23].mxu1 }
 0x211   :  { %v2554_v8 = vadd.f32 %v2553_v29, %v2552_v28  ;;  %v1009_v63 = vadd.f32 %v2551_v7, %v3479_v41 }
 0x213   :  { %v1012_v14 = vadd.f32 %v2554_v8, %v3479_v41 }
 0x215   :  { %v2555_v30 = vpop.f32.mrb[24].mxu1 }
 0x216   :  { %v2556_v31 = vpop.f32.mrb[25].mxu1 }
 0x217   :  { %v2557_v9 = vadd.f32 %v2556_v31, %v2555_v30  ;;  %v2558_v32 = vpop.f32.mrb[26].mxu1 }
 0x218   :  { %v2559_v33 = vpop.f32.mrb[27].mxu1 }
 0x219   :  { %v2560_v34 = vadd.f32 %v2559_v33, %v2558_v32  ;;  %v1017_v22 = vadd.f32 %v2557_v9, %v3479_v41 }
 0x21b   :  { %v1020_v28 = vadd.f32 %v2560_v34, %v3479_v41 }
 0x21d   :  { %v2561_v35 = vpop.f32.mrb[28].mxu1 }
 0x21e   :  { %v2562_v36 = vpop.f32.mrb[29].mxu1 }
 0x21f   :  { %v3472_v37 = vadd.f32 %v2562_v36, %v2561_v35  ;;  %v2564_v38 = vpop.f32.mrb[30].mxu1 }
 0x220   :  { %v2565_v39 = vpop.f32.mrb[31].mxu1 }
 0x221   :  { %v3474_v40 = vadd.f32 %v2565_v39, %v2564_v38  ;;  %v1025_v34 = vadd.f32 %v3472_v37, %v3479_v41 }
 0x224   :  { %v2607_v42 = vpop.f32.mrb[32].mxu0 }
 0x225   :  { %v2567_v43 = vpop.f32.mrb[32].mxu1  ;;  %v2608_v44 = vpop.f32.mrb[33].mxu0 }
 0x226   :  { %v2609_v46 = vadd.f32 %v2608_v44, %v2607_v42  ;;  %v2568_v47 = vpop.f32.mrb[33].mxu1  ;;  %v2610_v48 = vpop.f32.mrb[34].mxu0 }
 0x227   :  { %v3482_v49 = vadd.f32 %v2568_v47, %v2567_v43  ;;  %v2570_v50 = vpop.f32.mrb[34].mxu1  ;;  %v2611_v51 = vpop.f32.mrb[35].mxu0 }
 0x228   :  { %v1098_v53 = vadd.f32 %v2609_v46, %v1001_v45  ;;  %v2612_v54 = vadd.f32 %v2611_v51, %v2610_v48  ;;  %v2571_v55 = vpop.f32.mrb[35].mxu1  ;;  %v1028_v48 = vadd.f32 %v3474_v40, %v3479_v41 }
 0x229   :  { %v3485_v56 = vadd.f32 %v2571_v55, %v2570_v50  ;;  %v1033_v40 = vadd.f32 %v3482_v49, %v3479_v41 }
 0x22a   :  { %v1101_v57 = vadd.f32 %v2612_v54, %v1004_v52  ;;  %v1160_v58 = vmax.f32 %v1098_v53, 0.0 }
 0x22c   :  { %v1161_v59 = vmax.f32 %v1101_v57, 0.0  ;;  %v2613_v60 = vpop.f32.mrb[36].mxu0 }
 0x22d   :  { %v2573_v61 = vpop.f32.mrb[36].mxu1  ;;  %v2614_v62 = vpop.f32.mrb[37].mxu0 }
 0x22e   :  { %v3488_v0 = vpack.c.bf16 %v1161_v59, %v1160_v58  ;;  %v2615_v4 = vadd.f32 %v2614_v62, %v2613_v60  ;;  %v2574_v5 = vpop.f32.mrb[37].mxu1  ;;  %v2616_v10 = vpop.f32.mrb[38].mxu0 }
 0x22f   :  { %v3490_v11 = vadd.f32 %v2574_v5, %v2573_v61  ;;  %v2576_v12 = vpop.f32.mrb[38].mxu1  ;;  %v2617_v13 = vpop.f32.mrb[39].mxu0 }
 0x230   :  { %v1106_v15 = vadd.f32 %v2615_v4, %v1009_v63  ;;  %v2618_v1 = vadd.f32 %v2617_v13, %v2616_v10  ;;  %v2577_v16 = vpop.f32.mrb[39].mxu1  ;;  %2936 = vmatprep.subr.bf16.mxu1 %v3488_v0  ;;  %2968 = vmatprep.subr.bf16.mxu0 %v3488_v0  ;;  %v1036_v63 = vadd.f32 %v3485_v56, %v3479_v41 }
 0x231   :  { %v3495_v17 = vadd.f32 %v2577_v16, %v2576_v12  ;;  %2937 = vmatpush3.bf16.msra.mxu1 %v3488_v0  ;;  %2969 = vmatpush3.bf16.msra.mxu0 %v3488_v0 }
 0x232   :  { %v1109_v18 = vadd.f32 %v2618_v1, %v1012_v14  ;;  %v1162_v19 = vmax.f32 %v1106_v15, 0.0  ;;  %v1041_v15 = vadd.f32 %v3490_v11, %v3479_v41 }
 0x234   :  { %v1163_v20 = vmax.f32 %v1109_v18, 0.0  ;;  %v2619_v2 = vpop.f32.mrb[40].mxu0 }
 0x235   :  { %v2579_v3 = vpop.f32.mrb[40].mxu1  ;;  %v2620_v21 = vpop.f32.mrb[41].mxu0 }
 0x236   :  { %v3500_v23 = vpack.c.bf16 %v1163_v20, %v1162_v19  ;;  %v2621_v24 = vadd.f32 %v2620_v21, %v2619_v2  ;;  %v2580_v25 = vpop.f32.mrb[41].mxu1  ;;  %v2622_v6 = vpop.f32.mrb[42].mxu0  ;;  %v1044_v19 = vadd.f32 %v3495_v17, %v3479_v41 }
 0x237   :  { %v3502_v26 = vadd.f32 %v2580_v25, %v2579_v3  ;;  %v2582_v27 = vpop.f32.mrb[42].mxu1  ;;  %v2623_v7 = vpop.f32.mrb[43].mxu0 }
 0x238   :  { %v1114_v29 = vadd.f32 %v2621_v24, %v1017_v22  ;;  %v2624_v8 = vadd.f32 %v2623_v7, %v2622_v6  ;;  %v2583_v30 = vpop.f32.mrb[43].mxu1  ;;  %2938 = vmatprep.subr.bf16.mxu1 %v3500_v23  ;;  %2970 = vmatprep.subr.bf16.mxu0 %v3500_v23 }
 0x239   :  { %v3507_v31 = vadd.f32 %v2583_v30, %v2582_v27  ;;  %2939 = vmatpush3.bf16.msra.mxu1 %v3500_v23  ;;  %2971 = vmatpush3.bf16.msra.mxu0 %v3500_v23  ;;  %v1049_v25 = vadd.f32 %v3502_v26, %v3479_v41 }
 0x23a   :  { %v1117_v9 = vadd.f32 %v2624_v8, %v1020_v28  ;;  %v1164_v32 = vmax.f32 %v1114_v29, 0.0 }
 0x23b   :  { %v1052_v28 = vadd.f32 %v3507_v31, %v3479_v41 }
 0x23c   :  { %v1165_v33 = vmax.f32 %v1117_v9, 0.0  ;;  %v2625_v35 = vpop.f32.mrb[44].mxu0 }
 0x23d   :  { %v2585_v36 = vpop.f32.mrb[44].mxu1  ;;  %v2626_v38 = vpop.f32.mrb[45].mxu0 }
 0x23e   :  { %v3513_v39 = vpack.c.bf16 %v1165_v33, %v1164_v32  ;;  %v2627_v42 = vadd.f32 %v2626_v38, %v2625_v35  ;;  %v2586_v43 = vpop.f32.mrb[45].mxu1  ;;  %v2628_v44 = vpop.f32.mrb[46].mxu0 }
 0x23f   :  { %v3515_v45 = vadd.f32 %v2586_v43, %v2585_v36  ;;  %v2588_v46 = vpop.f32.mrb[46].mxu1  ;;  %v2629_v47 = vpop.f32.mrb[47].mxu0 }
 0x240   :  { %v1122_v50 = vadd.f32 %v2627_v42, %v1025_v34  ;;  %v2630_v51 = vadd.f32 %v2629_v47, %v2628_v44  ;;  %v2589_v52 = vpop.f32.mrb[47].mxu1  ;;  %2940 = vmatprep.subr.bf16.mxu1 %v3513_v39  ;;  %2972 = vmatprep.subr.bf16.mxu0 %v3513_v39 }
 0x241   :  { %v3521_v37 = vadd.f32 %v2589_v52, %v2588_v46  ;;  %2941 = vmatpush3.bf16.msra.mxu1 %v3513_v39  ;;  %2973 = vmatpush3.bf16.msra.mxu0 %v3513_v39  ;;  %v1057_v35 = vadd.f32 %v3515_v45, %v3479_v41  ;;  %v3131_v52 = vld [vmem:[#allocation5 + $0x10] sm:$0xff]  }
 0x242   :  { %v1125_v53 = vadd.f32 %v2630_v51, %v1028_v48  ;;  %v1166_v54 = vmax.f32 %v1122_v50, 0.0  ;;  %v3151_v50 = vld [vmem:[#allocation10 + $0x140] sm:$0xff]   ;;  %v3130_v51 = vld [vmem:[#allocation5 + $0x48] sm:$0xff]  }
 0x243   :  { %v1060_v42 = vadd.f32 %v3521_v37, %v3479_v41  ;;  %v3129_v41 = vld [vmem:[#allocation5 + $0x8] sm:$0xff]   ;;  %v3134_v37 = vld [vmem:[#allocation5 + $0x50] sm:$0xff]  }
 0x244   :  { %v1167_v55 = vmax.f32 %v1125_v53, 0.0  ;;  %v2631_v57 = vpop.f32.mrb[48].mxu0  ;;  %v3152_v53 = vld [vmem:[#allocation10 + $0x100] sm:$0xff]  }
 0x245   :  { %v2632_v58 = vpop.f32.mrb[49].mxu0 }
 0x246   :  { %v3527_v59 = vpack.c.bf16 %v1167_v55, %v1166_v54  ;;  %v2633_v60 = vadd.f32 %v2632_v58, %v2631_v57  ;;  %v2634_v61 = vpop.f32.mrb[50].mxu0  ;;  %v3153_v54 = vld [vmem:[#allocation10 + $0x148] sm:$0xff]   ;;  %v3132_v57 = vld [vmem:[#allocation5 + $0x18] sm:$0xff]  }
 0x247   :  { %v2635_v62 = vpop.f32.mrb[51].mxu0  ;;  %v3154_v55 = vld [vmem:[#allocation10 + $0x108] sm:$0xff]   ;;  %v3136_v58 = vld [vmem:[#allocation5 + $0x58] sm:$0xff]  }
 0x248   :  { %v1130_v4 = vadd.f32 %v2633_v60, %v1033_v40  ;;  %v2636_v5 = vadd.f32 %v2635_v62, %v2634_v61  ;;  %2942 = vmatprep.subr.bf16.mxu1 %v3527_v59  ;;  %2974 = vmatprep.subr.bf16.mxu0 %v3527_v59  ;;  %v3133_v40 = vld [vmem:[#allocation5 + $0x20] sm:$0xff]   ;;  %v3155_v61 = vld [vmem:[#allocation10 + $0x150] sm:$0xff]  }
 0x249   :  { %2943 = vmatpush3.bf16.msra.mxu1 %v3527_v59  ;;  %2975 = vmatpush3.bf16.msra.mxu0 %v3527_v59  ;;  %v3139_v60 = vld [vmem:[#allocation5 + $0x60] sm:$0xff]   ;;  %v3156_v62 = vld [vmem:[#allocation10 + $0x110] sm:$0xff]  }
 0x24a   :  { %v1133_v10 = vadd.f32 %v2636_v5, %v1036_v63  ;;  %v1168_v49 = vmax.f32 %v1130_v4, 0.0  ;;  %v3157_v63 = vld [vmem:[#allocation10 + $0x158] sm:$0xff]   ;;  %v3135_v4 = vld [vmem:[#allocation5 + $0x28] sm:$0xff]  }
 0x24b   :  { %v3141_v5 = vld [vmem:[#allocation5 + $0x68] sm:$0xff]  }
 0x24c   :  { %v1169_v12 = vmax.f32 %v1133_v10, 0.0  ;;  %v2637_v13 = vpop.f32.mrb[52].mxu0  ;;  %v3137_v10 = vld [vmem:[#allocation5 + $0x30] sm:$0xff]  }
 0x24d   :  { %v2638_v14 = vpop.f32.mrb[53].mxu0 }
 0x24e   :  { %v3537_v1 = vpack.c.bf16 %v1169_v12, %v1168_v49  ;;  %v2639_v56 = vadd.f32 %v2638_v14, %v2637_v13  ;;  %v2640_v16 = vpop.f32.mrb[54].mxu0  ;;  %v3145_v49 = vld [vmem:[#allocation5 + $0x70] sm:$0xff]   ;;  %v3158_v12 = vld [vmem:[#allocation10 + $0x118] sm:$0xff]   ;;  %v3159_v13 = vld [vmem:[#allocation10 + $0x160] sm:$0xff]  }
 0x24f   :  { %v2641_v18 = vpop.f32.mrb[55].mxu0  ;;  %v3160_v14 = vld [vmem:[#allocation10 + $0x120] sm:$0xff]  }
 0x250   :  { %v1138_v20 = vadd.f32 %v2639_v56, %v1041_v15  ;;  %v2642_v2 = vadd.f32 %v2641_v18, %v2640_v16  ;;  %2944 = vmatprep.subr.bf16.mxu1 %v3537_v1  ;;  %2976 = vmatprep.subr.bf16.mxu0 %v3537_v1  ;;  %v3138_v15 = vld [vmem:[#allocation5 + $0x38] sm:$0xff]   ;;  %v3140_v16 = vld [vmem:[#allocation5 + $0x80] sm:$0xff]   ;;  %v3161_v18 = vld [vmem:[#allocation10 + $0x168] sm:$0xff]  }
 0x251   :  { %2945 = vmatpush3.bf16.msra.mxu1 %v3537_v1  ;;  %2977 = vmatpush3.bf16.msra.mxu0 %v3537_v1  ;;  %v3147_v56 = vld [vmem:[#allocation5 + $0x78] sm:$0xff]  }
 0x252   :  { %v1141_v3 = vadd.f32 %v2642_v2, %v1044_v19  ;;  %v1170_v11 = vmax.f32 %v1138_v20, 0.0  ;;  %v3162_v19 = vld [vmem:[#allocation10 + $0x128] sm:$0xff]   ;;  %v3163_v20 = vld [vmem:[#allocation10 + $0x170] sm:$0xff]  }
 0x253   :  { %v3142_v2 = vld [vmem:[#allocation5 + $0x88] sm:$0xff]  }
 0x254   :  { %v1171_v21 = vmax.f32 %v1141_v3, 0.0  ;;  %v2643_v22 = vpop.f32.mrb[56].mxu0  ;;  %v3143_v3 = vld [vmem:[#allocation5 + $0x90] sm:$0xff]  }
 0x255   :  { %v2644_v24 = vpop.f32.mrb[57].mxu0 }
 0x256   :  { %v3547_v6 = vpack.c.bf16 %v1171_v21, %v1170_v11  ;;  %v2645_v17 = vadd.f32 %v2644_v24, %v2643_v22  ;;  %v2646_v27 = vpop.f32.mrb[58].mxu0  ;;  %v3144_v11 = vld [vmem:[#allocation5 + $0x98] sm:$0xff]   ;;  %v3146_v21 = vld [vmem:[#allocation5 + $0xa0] sm:$0xff]   ;;  %v3148_v22 = vld [vmem:[#allocation5 + $0xa8] sm:$0xff]  }
 0x257   :  { %v2647_v7 = vpop.f32.mrb[59].mxu0  ;;  %v3149_v24 = vld [vmem:[#allocation5 + $0xb0] sm:$0xff]  }
 0x258   :  { %v1146_v29 = vadd.f32 %v2645_v17, %v1049_v25  ;;  %v2648_v8 = vadd.f32 %v2647_v7, %v2646_v27  ;;  %2946 = vmatprep.subr.bf16.mxu1 %v3547_v6  ;;  %2978 = vmatprep.subr.bf16.mxu0 %v3547_v6  ;;  %v3150_v25 = vld [vmem:[#allocation5 + $0xb8] sm:$0xff]   ;;  %v3164_v17 = vld [vmem:[#allocation10 + $0x130] sm:$0xff]  }
 0x259   :  { %2947 = vmatpush3.bf16.msra.mxu1 %v3547_v6  ;;  %2979 = vmatpush3.bf16.msra.mxu0 %v3547_v6  ;;  %v3165_v27 = vld [vmem:[#allocation10 + $0x178] sm:$0xff]  }
 0x25a   :  { %v1149_v30 = vadd.f32 %v2648_v8, %v1052_v28  ;;  %v1172_v26 = vmax.f32 %v1146_v29, 0.0  ;;  %v3166_v7 = vld [vmem:[#allocation10 + $0x138] sm:$0xff]   ;;  %v3167_v28 = vld [vmem:[#allocation10 + $0x1c0] sm:$0xff]   ;;  %v3169_v8 = vld [vmem:[#allocation10 + $0x1c8] sm:$0xff]  }
 0x25b   :  { %v3168_v29 = vld [vmem:[#allocation10 + $0x180] sm:$0xff]  }
 0x25c   :  { %v1173_v9 = vmax.f32 %v1149_v30, 0.0  ;;  %v2649_v32 = vpop.f32.mrb[60].mxu0  ;;  %v3170_v30 = vld [vmem:[#allocation10 + $0x188] sm:$0xff]  }
 0x25d   :  { %v2650_v33 = vpop.f32.mrb[61].mxu0 }
 0x25e   :  { %v3557_v36 = vpack.c.bf16 %v1173_v9, %v1172_v26  ;;  %v2651_v31 = vadd.f32 %v2650_v33, %v2649_v32  ;;  %v2652_v38 = vpop.f32.mrb[62].mxu0  ;;  %v3171_v26 = vld [vmem:[#allocation10 + $0x1d0] sm:$0xff]   ;;  %v3173_v32 = vld [vmem:[#allocation10 + $0x1d8] sm:$0xff]   ;;  %v3175_v33 = vld [vmem:[#allocation10 + $0x1e0] sm:$0xff]  }
 0x25f   :  { %v2653_v34 = vpop.f32.mrb[63].mxu0  ;;  %v3172_v9 = vld [vmem:[#allocation10 + $0x190] sm:$0xff]  }
 0x260   :  { %v1154_v43 = vadd.f32 %v2651_v31, %v1057_v35  ;;  %v2654_v44 = vadd.f32 %v2653_v34, %v2652_v38  ;;  %2948 = vmatprep.subr.bf16.mxu1 %v3557_v36  ;;  %2980 = vmatprep.subr.bf16.mxu0 %v3557_v36  ;;  %v3176_v35 = vld [vmem:[#allocation10 + $0x1a0] sm:$0xff]   ;;  %v3177_v31 = vld [vmem:[#allocation10 + $0x1e8] sm:$0xff]   ;;  %v3179_v34 = vld [vmem:[#allocation10 + $0x1f0] sm:$0xff]  }
 0x261   :  { %2949 = vmatpush3.bf16.msra.mxu1 %v3557_v36  ;;  %2981 = vmatpush3.bf16.msra.mxu0 %v3557_v36  ;;  %v3178_v38 = vld [vmem:[#allocation10 + $0x1a8] sm:$0xff]  }
 0x262   :  { %v1157_v46 = vadd.f32 %v2654_v44, %v1060_v42  ;;  %v1174_v45 = vmax.f32 %v1154_v43, 0.0  ;;  %v3180_v42 = vld [vmem:[#allocation10 + $0x1b0] sm:$0xff]   ;;  %v3181_v43 = vld [vmem:[#allocation10 + $0x1f8] sm:$0xff]  }
 0x263   :  { %v3182_v44 = vld [vmem:[#allocation10 + $0x1b8] sm:$0xff]  }
 0x264   :  { %v1175_v47 = vmax.f32 %v1157_v46, 0.0 }
 0x266   :  { %v3565_v48 = vpack.c.bf16 %v1175_v47, %v1174_v45 }
 0x268   :  { %2950 = vmatprep.subr.bf16.mxu1 %v3565_v48  ;;  %2982 = vmatprep.subr.bf16.mxu0 %v3565_v48 }
 0x269   :  { %2951 = vmatpush3.bf16.msra.mxu1 %v3565_v48  ;;  %2983 = vmatpush3.bf16.msra.mxu0 %v3565_v48 }
 0x26a   :  { %3000 = vmatprep.subr.bf16.mxu1 %v3488_v0  ;;  %2703 = vmatprep.subr.bf16.mxu0 %v3151_v50 }
 0x26c   :  { %2953 = vmatmul.mubr.bf16.vlgmr.msra.gmra.mrb[48].mxu1 %v3129_v41  ;;  %2985 = vmatmul.mubr.bf16.vlgmr.msra.gmra.mrb[64].mxu0 %v3130_v51 }
 0x26d   :  { %3001 = vmatpush3.bf16.msra.mxu1 %v3488_v0  ;;  %2956 = vmatprep.mubr.bf16.mxu1 %v3131_v52 }
 0x26e   :  { %3002 = vmatprep.subr.bf16.mxu1 %v3500_v23  ;;  %2988 = vmatprep.mubr.bf16.mxu0 %v3134_v37 }
 0x26f   :  { %2704 = vmatpush3.bf16.msra.mxu0 %v3152_v53 }
 0x270   :  { %2705 = vmatprep.subr.bf16.mxu0 %v3153_v54 }
 0x271   :  { %3003 = vmatpush3.bf16.msra.mxu1 %v3500_v23 }
 0x272   :  { %3004 = vmatprep.subr.bf16.mxu1 %v3513_v39 }
 0x273   :  { %2706 = vmatpush3.bf16.msra.mxu0 %v3154_v55 }
 0x274   :  { %2957 = vmatmul.mubr.bf16.gmra.mrb[52].mxu1 %v3132_v57  ;;  %2989 = vmatmul.mubr.bf16.gmra.mrb[68].mxu0 %v3136_v58 }
 0x275   :  { %3005 = vmatpush3.bf16.msra.mxu1 %v3513_v39  ;;  %2960 = vmatprep.mubr.bf16.mxu1 %v3133_v40 }
 0x276   :  { %3006 = vmatprep.subr.bf16.mxu1 %v3527_v59  ;;  %2992 = vmatprep.mubr.bf16.mxu0 %v3139_v60 }
 0x277   :  { %2707 = vmatprep.subr.bf16.mxu0 %v3155_v61 }
 0x278   :  { %2708 = vmatpush3.bf16.msra.mxu0 %v3156_v62 }
 0x279   :  { %3007 = vmatpush3.bf16.msra.mxu1 %v3527_v59  ;;  %2709 = vmatprep.subr.bf16.mxu0 %v3157_v63 }
 0x27a   :  { %3008 = vmatprep.subr.bf16.mxu1 %v3537_v1 }
 0x27c   :  { %2961 = vmatmul.mubr.bf16.gmra.mrb[56].mxu1 %v3135_v4  ;;  %2993 = vmatmul.mubr.bf16.gmra.mrb[72].mxu0 %v3141_v5 }
 0x27d   :  { %3009 = vmatpush3.bf16.msra.mxu1 %v3537_v1  ;;  %2964 = vmatprep.mubr.bf16.mxu1 %v3137_v10 }
 0x27e   :  { %3010 = vmatprep.subr.bf16.mxu1 %v3547_v6  ;;  %2996 = vmatprep.mubr.bf16.mxu0 %v3145_v49 }
 0x27f   :  { %2710 = vmatpush3.bf16.msra.mxu0 %v3158_v12 }
 0x280   :  { %2711 = vmatprep.subr.bf16.mxu0 %v3159_v13 }
 0x281   :  { %3011 = vmatpush3.bf16.msra.mxu1 %v3547_v6 }
 0x282   :  { %3012 = vmatprep.subr.bf16.mxu1 %v3557_v36 }
 0x283   :  { %2712 = vmatpush3.bf16.msra.mxu0 %v3160_v14 }
 0x284   :  { %2965 = vmatmul.mubr.bf16.gmra.mrb[60].mxu1 %v3138_v15  ;;  %2997 = vmatmul.mubr.bf16.gmra.mrb[76].mxu0 %v3147_v56 }
 0x285   :  { %3013 = vmatpush3.bf16.msra.mxu1 %v3557_v36  ;;  %3016 = vmatprep.mubr.bf16.mxu1 %v3140_v16 }
 0x286   :  { %3014 = vmatprep.subr.bf16.mxu1 %v3565_v48  ;;  %2713 = vmatprep.subr.bf16.mxu0 %v3161_v18 }
 0x287   :  { %2714 = vmatpush3.bf16.msra.mxu0 %v3162_v19 }
 0x288   :  { %2715 = vmatprep.subr.bf16.mxu0 %v3163_v20 }
 0x289   :  { %3015 = vmatpush3.bf16.msra.mxu1 %v3565_v48 }
 0x28a   :  { %2767 = vmatprep.subr.bf16.mxu1 %v3167_v28 }
 0x28b   :  { %2716 = vmatpush3.bf16.msra.mxu0 %v3164_v17 }
 0x28c   :  { %3017 = vmatmul.mubr.bf16.vlgmr.msra.gmra.mrb[64].mxu1 %v3142_v2  ;;  %2717 = vmatprep.subr.bf16.mxu0 %v3165_v27 }
 0x28d   :  { %3020 = vmatprep.mubr.bf16.mxu1 %v3143_v3  ;;  %2768 = vmatpush3.bf16.msra.mxu1 %v3168_v29 }
 0x28e   :  { %2769 = vmatprep.subr.bf16.mxu1 %v3169_v8 }
 0x28f   :  { %2718 = vmatpush3.bf16.msra.mxu0 %v3166_v7 }
 0x291   :  { %2770 = vmatpush3.bf16.msra.mxu1 %v3170_v30 }
 0x292   :  { %2771 = vmatprep.subr.bf16.mxu1 %v3171_v26 }
 0x294   :  { %3021 = vmatmul.mubr.bf16.gmra.mrb[68].mxu1 %v3144_v11 }
 0x295   :  { %3024 = vmatprep.mubr.bf16.mxu1 %v3146_v21  ;;  %2772 = vmatpush3.bf16.msra.mxu1 %v3172_v9 }
 0x296   :  { %2773 = vmatprep.subr.bf16.mxu1 %v3173_v32 }
 0x29c   :  { %3025 = vmatmul.mubr.bf16.gmra.mrb[72].mxu1 %v3148_v22 }
 0x29d   :  { %3028 = vmatprep.mubr.bf16.mxu1 %v3149_v24 }
 0x2a4   :  { %3029 = vmatmul.mubr.bf16.gmra.mrb[76].mxu1 %v3150_v25 }
 0x2a5   :  { %2165 = vmatprep.mubr.bf16.mxu1 %v3488_v0  ;;  %v3174_v0 = vld [vmem:[#allocation10 + $0x198] sm:$0xff]  }
 0x2a6   :  { %2774 = vmatpush3.bf16.msra.mxu1 %v3174_v0 }
 0x2a7   :  { %2775 = vmatprep.subr.bf16.mxu1 %v3175_v33 }
 0x2aa   :  { %2776 = vmatpush3.bf16.msra.mxu1 %v3176_v35 }
 0x2ab   :  { %2777 = vmatprep.subr.bf16.mxu1 %v3177_v31 }
 0x2ae   :  { %2778 = vmatpush3.bf16.msra.mxu1 %v3178_v38 }
 0x2af   :  { %2779 = vmatprep.subr.bf16.mxu1 %v3179_v34 }
 0x2b2   :  { %2780 = vmatpush3.bf16.msra.mxu1 %v3180_v42 }
 0x2b3   :  { %2781 = vmatprep.subr.bf16.mxu1 %v3181_v43 }
 0x2b6   :  { %2782 = vmatpush3.bf16.msra.mxu1 %v3182_v44 }
 0x33f   :  { %v2954_v46 = vpop.f32.mrb[48].mxu1  ;;  %v2986_v45 = vpop.f32.mrb[64].mxu0 }
 0x340   :  { %v1298_v47 = vpop.f32.mrb[49].mxu1  ;;  %v1475_v50 = vpop.f32.mrb[65].mxu0 }
 0x341   :  { %v2955_v41 = vpop.f32.mrb[50].mxu1  ;;  %v2987_v51 = vpop.f32.mrb[66].mxu0 }
 0x342   :  { %v1362_v52 = vpack.c.bf16 %v2955_v41, %v2954_v46  ;;  %v1539_v37 = vpack.c.bf16 %v2987_v51, %v2986_v45  ;;  %v1301_v53 = vpop.f32.mrb[51].mxu1  ;;  %v1478_v54 = vpop.f32.mrb[67].mxu0 }
 0x343   :  { %v1361_v55 = vpack.c.bf16 %v1301_v53, %v1298_v47  ;;  %v1538_v57 = vpack.c.bf16 %v1478_v54, %v1475_v50 }
 0x345   :  { %2068 = vmatprep.mubr.bf16.mxu0 %v1538_v57 }
 0x346   :  { %2069 = vmatmul.mubr.bf16.vlgmr.msra.gmra.mrb[80].mxu0 %v1361_v55 }
 0x347   :  { %v2958_v58 = vpop.f32.mrb[52].mxu1  ;;  %2076 = vmatprep.mubr.bf16.mxu0 %v1539_v37  ;;  %v2990_v40 = vpop.f32.mrb[68].mxu0 }
 0x348   :  { %v1314_v60 = vpop.f32.mrb[53].mxu1  ;;  %v1491_v61 = vpop.f32.mrb[69].mxu0 }
 0x349   :  { %v2959_v62 = vpop.f32.mrb[54].mxu1  ;;  %v2991_v63 = vpop.f32.mrb[70].mxu0 }
 0x34a   :  { %v1364_v4 = vpack.c.bf16 %v2959_v62, %v2958_v58  ;;  %v1317_v5 = vpop.f32.mrb[55].mxu1  ;;  %v1541_v10 = vpack.c.bf16 %v2991_v63, %v2990_v40  ;;  %v1494_v49 = vpop.f32.mrb[71].mxu0 }
 0x34b   :  { %v1363_v12 = vpack.c.bf16 %v1317_v5, %v1314_v60  ;;  %v1540_v13 = vpack.c.bf16 %v1494_v49, %v1491_v61 }
 0x34e   :  { %2077 = vmatmul.mubr.bf16.gmra.mrb[84].mxu0 %v1362_v52 }
 0x34f   :  { %v2962_v14 = vpop.f32.mrb[56].mxu1  ;;  %2084 = vmatprep.mubr.bf16.mxu0 %v1540_v13  ;;  %v2994_v15 = vpop.f32.mrb[72].mxu0 }
 0x350   :  { %v1330_v56 = vpop.f32.mrb[57].mxu1  ;;  %v1507_v16 = vpop.f32.mrb[73].mxu0 }
 0x351   :  { %v2963_v18 = vpop.f32.mrb[58].mxu1  ;;  %v2995_v19 = vpop.f32.mrb[74].mxu0 }
 0x352   :  { %v1366_v20 = vpack.c.bf16 %v2963_v18, %v2962_v14  ;;  %v1333_v2 = vpop.f32.mrb[59].mxu1  ;;  %v1543_v3 = vpack.c.bf16 %v2995_v19, %v2994_v15  ;;  %v1510_v11 = vpop.f32.mrb[75].mxu0 }
 0x353   :  { %v1365_v21 = vpack.c.bf16 %v1333_v2, %v1330_v56  ;;  %v1542_v22 = vpack.c.bf16 %v1510_v11, %v1507_v16  ;;  %v3604_v11 = vld [vmem:[%s3685_s3 + $0x1] ss:$0 sm:$0xff] }
 0x356   :  { %2085 = vmatmul.mubr.bf16.gmra.mrb[88].mxu0 %v1363_v12 }
 0x357   :  { %v2966_v24 = vpop.f32.mrb[60].mxu1  ;;  %2092 = vmatprep.mubr.bf16.mxu0 %v1541_v10  ;;  %v2998_v25 = vpop.f32.mrb[76].mxu0 }
 0x358   :  { %v1346_v17 = vpop.f32.mrb[61].mxu1  ;;  %v1523_v27 = vpop.f32.mrb[77].mxu0 }
 0x359   :  { %v2967_v7 = vpop.f32.mrb[62].mxu1  ;;  %v2999_v28 = vpop.f32.mrb[78].mxu0 }
 0x35a   :  { %v1368_v29 = vpack.c.bf16 %v2967_v7, %v2966_v24  ;;  %v1349_v8 = vpop.f32.mrb[63].mxu1  ;;  %v1545_v30 = vpack.c.bf16 %v2999_v28, %v2998_v25  ;;  %v1526_v26 = vpop.f32.mrb[79].mxu0 }
 0x35b   :  { %v1367_v9 = vpack.c.bf16 %v1349_v8, %v1346_v17  ;;  %v1544_v32 = vpack.c.bf16 %v1526_v26, %v1523_v27 }
 0x35e   :  { %2093 = vmatmul.mubr.bf16.gmra.mrb[92].mxu0 %v1364_v4 }
 0x35f   :  { %v3018_v0 = vpop.f32.mrb[64].mxu1  ;;  %2100 = vmatprep.mubr.bf16.mxu0 %v1542_v22 }
 0x360   :  { %v1652_v33 = vpop.f32.mrb[65].mxu1 }
 0x361   :  { %v3019_v35 = vpop.f32.mrb[66].mxu1 }
 0x362   :  { %v1716_v31 = vpack.c.bf16 %v3019_v35, %v3018_v0  ;;  %v1655_v38 = vpop.f32.mrb[67].mxu1 }
 0x363   :  { %v1715_v34 = vpack.c.bf16 %v1655_v38, %v1652_v33 }
 0x365   :  { %2166 = vmatmul.mubr.bf16.vlgmr.msra.gmra.mrb[80].mxu1 %v1715_v34 }
 0x366   :  { %2101 = vmatmul.mubr.bf16.gmra.mrb[96].mxu0 %v1365_v21  ;;  %2173 = vmatprep.mubr.bf16.mxu1 %v3500_v23 }
 0x367   :  { %v3022_v42 = vpop.f32.mrb[68].mxu1  ;;  %2108 = vmatprep.mubr.bf16.mxu0 %v1543_v3 }
 0x368   :  { %v1668_v43 = vpop.f32.mrb[69].mxu1 }
 0x369   :  { %v3023_v44 = vpop.f32.mrb[70].mxu1 }
 0x36a   :  { %v1718_v46 = vpack.c.bf16 %v3023_v44, %v3022_v42  ;;  %v1671_v45 = vpop.f32.mrb[71].mxu1 }
 0x36b   :  { %v1717_v47 = vpack.c.bf16 %v1671_v45, %v1668_v43 }
 0x36d   :  { %2174 = vmatmul.mubr.bf16.gmra.mrb[84].mxu1 %v1716_v31 }
 0x36e   :  { %2109 = vmatmul.mubr.bf16.gmra.mrb[100].mxu0 %v1366_v20  ;;  %2181 = vmatprep.mubr.bf16.mxu1 %v3513_v39  ;;  %v3307_v39 = vmov 0.0  }
 0x36f   :  { %2116 = vmatprep.mubr.bf16.mxu0 %v1544_v32  ;;  %v3026_v50 = vpop.f32.mrb[72].mxu1  ;;  %3032 = vmatprep.subr.bf16.mxu0 %v3307_v39 }
 0x370   :  { %v1684_v41 = vpop.f32.mrb[73].mxu1 }
 0x371   :  { %v3027_v51 = vpop.f32.mrb[74].mxu1 }
 0x372   :  { %v1720_v52 = vpack.c.bf16 %v3027_v51, %v3026_v50  ;;  %v1687_v37 = vpop.f32.mrb[75].mxu1 }
 0x373   :  { %v1719_v53 = vpack.c.bf16 %v1687_v37, %v1684_v41 }
 0x375   :  { %2182 = vmatmul.mubr.bf16.gmra.mrb[88].mxu1 %v1717_v47 }
 0x376   :  { %2117 = vmatmul.mubr.bf16.gmra.mrb[104].mxu0 %v1367_v9  ;;  %2189 = vmatprep.mubr.bf16.mxu1 %v3527_v59 }
 0x377   :  { %2124 = vmatprep.mubr.bf16.mxu0 %v1545_v30  ;;  %v3030_v23 = vpop.f32.mrb[76].mxu1 }
 0x378   :  { %v1700_v54 = vpop.f32.mrb[77].mxu1 }
 0x379   :  { %v3031_v55 = vpop.f32.mrb[78].mxu1 }
 0x37a   :  { %v1722_v57 = vpack.c.bf16 %v3031_v55, %v3030_v23  ;;  %v1703_v58 = vpop.f32.mrb[79].mxu1 }
 0x37b   :  { %v1721_v40 = vpack.c.bf16 %v1703_v58, %v1700_v54 }
 0x37d   :  { %2190 = vmatmul.mubr.bf16.gmra.mrb[92].mxu1 %v1718_v46 }
 0x37e   :  { %2125 = vmatmul.mubr.bf16.gmra.mrb[108].mxu0 %v1368_v29  ;;  %2197 = vmatprep.mubr.bf16.mxu1 %v3537_v1 }
 0x37f   :  { %3048 = vmatprep.mubr.msk.bf16.mxu0 %vm3308_vm0, %v3307_v39 }
 0x385   :  { %2198 = vmatmul.mubr.bf16.gmra.mrb[96].mxu1 %v1719_v53 }
 0x386   :  { %2205 = vmatprep.mubr.bf16.mxu1 %v3547_v6 }
 0x38d   :  { %2206 = vmatmul.mubr.bf16.gmra.mrb[100].mxu1 %v1720_v52 }
 0x38e   :  { %2213 = vmatprep.mubr.bf16.mxu1 %v3557_v36 }
 0x395   :  { %2214 = vmatmul.mubr.bf16.gmra.mrb[104].mxu1 %v1721_v40 }
 0x396   :  { %2221 = vmatprep.mubr.bf16.mxu1 %v3565_v48 }
 0x39d   :  { %2222 = vmatmul.mubr.bf16.gmra.mrb[108].mxu1 %v1722_v57 }
 0x419   :  { %v2719_v59 = vpop.f32.mrb[80].mxu0 }
 0x41a   :  { %v2720_v60 = vpop.f32.mrb[81].mxu0 }
 0x41b   :  { %v2721_v61 = vadd.f32 %v2720_v60, %v2719_v59  ;;  %v2722_v1 = vpop.f32.mrb[82].mxu0 }
 0x41c   :  { %v2723_v62 = vpop.f32.mrb[83].mxu0 }
 0x41d   :  { %v2724_v63 = vadd.f32 %v2723_v62, %v2722_v1  ;;  %v2071_v25 = vadd.f32 %v2721_v61, %v3604_v11 }
 0x41f   :  { %v2074_v30 = vadd.f32 %v2724_v63, %v3604_v11 }
 0x421   :  { %v2725_v6 = vpop.f32.mrb[84].mxu0 }
 0x422   :  { %v2726_v4 = vpop.f32.mrb[85].mxu0 }
 0x423   :  { %v2727_v5 = vadd.f32 %v2726_v4, %v2725_v6  ;;  %v2728_v36 = vpop.f32.mrb[86].mxu0 }
 0x424   :  { %v2729_v10 = vpop.f32.mrb[87].mxu0 }
 0x425   :  { %v2730_v49 = vadd.f32 %v2729_v10, %v2728_v36  ;;  %v2079_v43 = vadd.f32 %v2727_v5, %v3604_v11 }
 0x427   :  { %v2082_v52 = vadd.f32 %v2730_v49, %v3604_v11 }
 0x429   :  { %v2731_v48 = vpop.f32.mrb[88].mxu0 }
 0x42a   :  { %v2732_v12 = vpop.f32.mrb[89].mxu0 }
 0x42b   :  { %v2733_v13 = vadd.f32 %v2732_v12, %v2731_v48  ;;  %v2734_v14 = vpop.f32.mrb[90].mxu0 }
 0x42c   :  { %v2735_v15 = vpop.f32.mrb[91].mxu0 }
 0x42d   :  { %v2736_v56 = vadd.f32 %v2735_v15, %v2734_v14  ;;  %v2087_v61 = vadd.f32 %v2733_v13, %v3604_v11 }
 0x42f   :  { %v2090_v10 = vadd.f32 %v2736_v56, %v3604_v11 }
 0x431   :  { %v2737_v16 = vpop.f32.mrb[92].mxu0 }
 0x432   :  { %v2738_v18 = vpop.f32.mrb[93].mxu0 }
 0x433   :  { %v3597_v19 = vadd.f32 %v2738_v18, %v2737_v16  ;;  %v2740_v20 = vpop.f32.mrb[94].mxu0 }
 0x434   :  { %v2741_v2 = vpop.f32.mrb[95].mxu0 }
 0x435   :  { %v3599_v3 = vadd.f32 %v2741_v2, %v2740_v20 }
 0x438   :  { %v2783_v21 = vpop.f32.mrb[80].mxu1 }
 0x439   :  { %v2743_v22 = vpop.f32.mrb[96].mxu0  ;;  %v2784_v24 = vpop.f32.mrb[81].mxu1 }
 0x43a   :  { %v2785_v17 = vadd.f32 %v2784_v24, %v2783_v21  ;;  %v2744_v27 = vpop.f32.mrb[97].mxu0  ;;  %v2786_v7 = vpop.f32.mrb[82].mxu1  ;;  %v2095_v21 = vadd.f32 %v3597_v19, %v3604_v11 }
 0x43b   :  { %v3607_v28 = vadd.f32 %v2744_v27, %v2743_v22  ;;  %v2746_v29 = vpop.f32.mrb[98].mxu0  ;;  %v2787_v8 = vpop.f32.mrb[83].mxu1 }
 0x43c   :  { %v2168_v26 = vadd.f32 %v2785_v17, %v2071_v25  ;;  %v2788_v9 = vadd.f32 %v2787_v8, %v2786_v7  ;;  %v2747_v32 = vpop.f32.mrb[99].mxu0 }
 0x43d   :  { %v3610_v0 = vadd.f32 %v2747_v32, %v2746_v29  ;;  %v2098_v29 = vadd.f32 %v3599_v3, %v3604_v11 }
 0x43e   :  { %v2230_v33 = vmax.f32 %v2168_v26, 0.0  ;;  %v2171_v35 = vadd.f32 %v2788_v9, %v2074_v30 }
 0x440   :  { %2246 = vst [vmem:[#allocation11] sm:$0xff] %v2230_v33  ;;  %v2231_v31 = vmax.f32 %v2171_v35, 0.0  ;;  %v2789_v38 = vpop.f32.mrb[84].mxu1 }
 0x441   :  { %v2749_v34 = vpop.f32.mrb[100].mxu0  ;;  %v2790_v42 = vpop.f32.mrb[85].mxu1 }
 0x442   :  { %2247 = vst [vmem:[#allocation11 + $0x8] sm:$0xff] %v2231_v31  ;;  %v2264_v44 = vpack.c.bf16 %v2231_v31, %v2230_v33  ;;  %v2791_v46 = vadd.f32 %v2790_v42, %v2789_v38  ;;  %v2750_v45 = vpop.f32.mrb[101].mxu0  ;;  %v2792_v47 = vpop.f32.mrb[86].mxu1  ;;  %v2103_v38 = vadd.f32 %v3607_v28, %v3604_v11 }
 0x443   :  { %v3613_v50 = vadd.f32 %v2750_v45, %v2749_v34  ;;  %v2752_v41 = vpop.f32.mrb[102].mxu0  ;;  %v2793_v51 = vpop.f32.mrb[87].mxu1 }
 0x444   :  { %v2176_v37 = vadd.f32 %v2791_v46, %v2079_v43  ;;  %v2794_v53 = vadd.f32 %v2793_v51, %v2792_v47  ;;  %v2753_v23 = vpop.f32.mrb[103].mxu0  ;;  %3033 = vmatpush3.bf16.msra.mxu0 %v2264_v44  ;;  %v2106_v44 = vadd.f32 %v3610_v0, %v3604_v11 }
 0x445   :  { %v3616_v54 = vadd.f32 %v2753_v23, %v2752_v41  ;;  %3034 = vmatprep.subr.bf16.mxu0 %v3307_v39  ;;  %v2111_v28 = vadd.f32 %v3613_v50, %v3604_v11 }
 0x446   :  { %v2232_v55 = vmax.f32 %v2176_v37, 0.0  ;;  %v2179_v57 = vadd.f32 %v2794_v53, %v2082_v52 }
 0x447   :  { %v2114_v0 = vadd.f32 %v3616_v54, %v3604_v11 }
 0x448   :  { %2248 = vst [vmem:[#allocation11 + $0x10] sm:$0xff] %v2232_v55  ;;  %v2233_v58 = vmax.f32 %v2179_v57, 0.0  ;;  %v2795_v40 = vpop.f32.mrb[88].mxu1 }
 0x449   :  { %v2755_v59 = vpop.f32.mrb[104].mxu0  ;;  %v2796_v60 = vpop.f32.mrb[89].mxu1 }
 0x44a   :  { %2249 = vst [vmem:[#allocation11 + $0x18] sm:$0xff] %v2233_v58  ;;  %v2265_v1 = vpack.c.bf16 %v2233_v58, %v2232_v55  ;;  %v2797_v62 = vadd.f32 %v2796_v60, %v2795_v40  ;;  %v2756_v63 = vpop.f32.mrb[105].mxu0  ;;  %v2798_v6 = vpop.f32.mrb[90].mxu1 }
 0x44b   :  { %v3620_v4 = vadd.f32 %v2756_v63, %v2755_v59  ;;  %v2758_v5 = vpop.f32.mrb[106].mxu0  ;;  %v2799_v36 = vpop.f32.mrb[91].mxu1 }
 0x44c   :  { %v2184_v49 = vadd.f32 %v2797_v62, %v2087_v61  ;;  %v2800_v48 = vadd.f32 %v2799_v36, %v2798_v6  ;;  %v2759_v12 = vpop.f32.mrb[107].mxu0  ;;  %3035 = vmatpush3.bf16.msra.mxu0 %v2265_v1 }
 0x44d   :  { %v3623_v14 = vadd.f32 %v2759_v12, %v2758_v5  ;;  %3036 = vmatprep.subr.bf16.mxu0 %v3307_v39  ;;  %v2119_v50 = vadd.f32 %v3620_v4, %v3604_v11 }
 0x44e   :  { %v2234_v13 = vmax.f32 %v2184_v49, 0.0  ;;  %v2187_v15 = vadd.f32 %v2800_v48, %v2090_v10 }
 0x44f   :  { %v2122_v54 = vadd.f32 %v3623_v14, %v3604_v11 }
 0x450   :  { %2250 = vst [vmem:[#allocation11 + $0x20] sm:$0xff] %v2234_v13  ;;  %v2235_v16 = vmax.f32 %v2187_v15, 0.0  ;;  %v2801_v18 = vpop.f32.mrb[92].mxu1 }
 0x451   :  { %v2761_v20 = vpop.f32.mrb[108].mxu0  ;;  %v2802_v2 = vpop.f32.mrb[93].mxu1 }
 0x452   :  { %2251 = vst [vmem:[#allocation11 + $0x28] sm:$0xff] %v2235_v16  ;;  %v2266_v56 = vpack.c.bf16 %v2235_v16, %v2234_v13  ;;  %v2803_v22 = vadd.f32 %v2802_v2, %v2801_v18  ;;  %v2762_v24 = vpop.f32.mrb[109].mxu0  ;;  %v2804_v25 = vpop.f32.mrb[94].mxu1 }
 0x453   :  { %v3628_v17 = vadd.f32 %v2762_v24, %v2761_v20  ;;  %v2764_v27 = vpop.f32.mrb[110].mxu0  ;;  %v2805_v7 = vpop.f32.mrb[95].mxu1 }
 0x454   :  { %v2192_v8 = vadd.f32 %v2803_v22, %v2095_v21  ;;  %v2806_v30 = vadd.f32 %v2805_v7, %v2804_v25  ;;  %v2765_v26 = vpop.f32.mrb[111].mxu0  ;;  %3037 = vmatpush3.bf16.msra.mxu0 %v2266_v56 }
 0x455   :  { %v3632_v9 = vadd.f32 %v2765_v26, %v2764_v27  ;;  %3038 = vmatprep.subr.bf16.mxu0 %v3307_v39  ;;  %v2127_v4 = vadd.f32 %v3628_v17, %v3604_v11  ;;  %v3183_v17 = vld [vmem:[%s3686_s4] sm:$0xff]  }
 0x456   :  { %v2236_v19 = vmax.f32 %v2192_v8, 0.0  ;;  %v2195_v32 = vadd.f32 %v2806_v30, %v2098_v29 }
 0x457   :  { %v2130_v14 = vadd.f32 %v3632_v9, %v3604_v11 }
 0x458   :  { %2252 = vst [vmem:[#allocation11 + $0x30] sm:$0xff] %v2236_v19  ;;  %v2237_v33 = vmax.f32 %v2195_v32, 0.0  ;;  %v2807_v35 = vpop.f32.mrb[96].mxu1 }
 0x459   :  { %v2808_v31 = vpop.f32.mrb[97].mxu1 }
 0x45a   :  { %2253 = vst [vmem:[#allocation11 + $0x38] sm:$0xff] %v2237_v33  ;;  %v2267_v34 = vpack.c.bf16 %v2237_v33, %v2236_v19  ;;  %v2809_v3 = vadd.f32 %v2808_v31, %v2807_v35  ;;  %v2810_v42 = vpop.f32.mrb[98].mxu1 }
 0x45b   :  { %v2811_v43 = vpop.f32.mrb[99].mxu1 }
 0x45c   :  { %v2200_v46 = vadd.f32 %v2809_v3, %v2103_v38  ;;  %v2812_v45 = vadd.f32 %v2811_v43, %v2810_v42  ;;  %3039 = vmatpush3.bf16.msra.mxu0 %v2267_v34 }
 0x45d   :  { %3040 = vmatprep.subr.bf16.mxu0 %v3307_v39 }
 0x45e   :  { %v2238_v47 = vmax.f32 %v2200_v46, 0.0  ;;  %v2203_v41 = vadd.f32 %v2812_v45, %v2106_v44 }
 0x460   :  { %2254 = vst [vmem:[#allocation11 + $0x40] sm:$0xff] %v2238_v47  ;;  %v2239_v51 = vmax.f32 %v2203_v41, 0.0  ;;  %v2813_v52 = vpop.f32.mrb[100].mxu1 }
 0x461   :  { %v2814_v37 = vpop.f32.mrb[101].mxu1 }
 0x462   :  { %2255 = vst [vmem:[#allocation11 + $0x48] sm:$0xff] %v2239_v51  ;;  %v2268_v53 = vpack.c.bf16 %v2239_v51, %v2238_v47  ;;  %v2815_v23 = vadd.f32 %v2814_v37, %v2813_v52  ;;  %v2816_v55 = vpop.f32.mrb[102].mxu1 }
 0x463   :  { %v2817_v57 = vpop.f32.mrb[103].mxu1 }
 0x464   :  { %v2208_v58 = vadd.f32 %v2815_v23, %v2111_v28  ;;  %v2818_v40 = vadd.f32 %v2817_v57, %v2816_v55  ;;  %3041 = vmatpush3.bf16.msra.mxu0 %v2268_v53 }
 0x465   :  { %3042 = vmatprep.subr.bf16.mxu0 %v3307_v39 }
 0x466   :  { %v2240_v59 = vmax.f32 %v2208_v58, 0.0  ;;  %v2211_v60 = vadd.f32 %v2818_v40, %v2114_v0 }
 0x468   :  { %2256 = vst [vmem:[#allocation11 + $0x50] sm:$0xff] %v2240_v59  ;;  %v2241_v61 = vmax.f32 %v2211_v60, 0.0  ;;  %v2819_v1 = vpop.f32.mrb[104].mxu1 }
 0x469   :  { %v2820_v62 = vpop.f32.mrb[105].mxu1 }
 0x46a   :  { %2257 = vst [vmem:[#allocation11 + $0x58] sm:$0xff] %v2241_v61  ;;  %v2269_v63 = vpack.c.bf16 %v2241_v61, %v2240_v59  ;;  %v2821_v6 = vadd.f32 %v2820_v62, %v2819_v1  ;;  %v2822_v5 = vpop.f32.mrb[106].mxu1 }
 0x46b   :  { %v2823_v36 = vpop.f32.mrb[107].mxu1 }
 0x46c   :  { %v2216_v10 = vadd.f32 %v2821_v6, %v2119_v50  ;;  %v2824_v49 = vadd.f32 %v2823_v36, %v2822_v5  ;;  %3043 = vmatpush3.bf16.msra.mxu0 %v2269_v63 }
 0x46d   :  { %3044 = vmatprep.subr.bf16.mxu0 %v3307_v39 }
 0x46e   :  { %v2242_v48 = vmax.f32 %v2216_v10, 0.0  ;;  %v2219_v12 = vadd.f32 %v2824_v49, %v2122_v54 }
 0x470   :  { %2258 = vst [vmem:[#allocation11 + $0x60] sm:$0xff] %v2242_v48  ;;  %v2243_v13 = vmax.f32 %v2219_v12, 0.0  ;;  %v2825_v15 = vpop.f32.mrb[108].mxu1 }
 0x471   :  { %v2826_v16 = vpop.f32.mrb[109].mxu1 }
 0x472   :  { %2259 = vst [vmem:[#allocation11 + $0x68] sm:$0xff] %v2243_v13  ;;  %v2270_v18 = vpack.c.bf16 %v2243_v13, %v2242_v48  ;;  %v2827_v20 = vadd.f32 %v2826_v16, %v2825_v15  ;;  %v2828_v2 = vpop.f32.mrb[110].mxu1 }
 0x473   :  { %v2829_v21 = vpop.f32.mrb[111].mxu1 }
 0x474   :  { %v2224_v56 = vadd.f32 %v2827_v20, %v2127_v4  ;;  %v2830_v22 = vadd.f32 %v2829_v21, %v2828_v2  ;;  %3045 = vmatpush3.bf16.msra.mxu0 %v2270_v18 }
 0x475   :  { %3046 = vmatprep.subr.bf16.mxu0 %v3307_v39 }
 0x476   :  { %v2244_v24 = vmax.f32 %v2224_v56, 0.0  ;;  %v2227_v25 = vadd.f32 %v2830_v22, %v2130_v14 }
 0x478   :  { %2260 = vst [vmem:[#allocation11 + $0x70] sm:$0xff] %v2244_v24  ;;  %v2245_v27 = vmax.f32 %v2227_v25, 0.0 }
 0x47a   :  { %2261 = vst [vmem:[#allocation11 + $0x78] sm:$0xff] %v2245_v27  ;;  %v2271_v7 = vpack.c.bf16 %v2245_v27, %v2244_v24 }
 0x47c   :  { %3047 = vmatpush3.bf16.msra.mxu0 %v2271_v7 }
 0x47f   :  { %3049 = vmatmul.mubr.bf16.vlgmr.msra.gmra.mrb[112].mxu0 %v3183_v17 }
 0x480   :  { %3261 = shalt.err (!%p3258_p0)
}
 0x481   :  { %s3262_s18 = scalar_lea.hbm %s3687_s5, 2048 }
 0x482   :  { %p3263_p1 = scmp.ne.s32.totalorder %s3687_s5, %s3262_s18  ;;  %p3266_p2 = scmp.lt.u32.totalorder %s3262_s18, %s3687_s5 }
 0x484   :  { %p3268_p3 = pnand %p3266_p2, %p3263_p1 }
 0x486   :  { %3271 = shalt.err (!%p3268_p3)
}
 0x487   :  { %s3310_s21 = smov 128   ;;  %s3311_s22 = smov 8  }
 0x488   :  { %2332 = dma.vmem_to_hbm [thread:$0]  %s2327_s14, 2048, %s3687_s5, [#allocation7], %s3310_s21, %s3310_s21, %s3311_s22  }
 0x489   :  { %s3312_s26 = smov [#allocation12]  }
 0x48a   :  { %s2338_s27 = sshll.u32 %s3312_s26, 4  ;;  %s2339_s27 = int_to_ptr.vmem [resolvable:$true] %s2338_s27 }
 0x48b   :  { %s3272_s28 = scalar_lea.vmem %s2339_s27, 256  ;;  %p3277_p5 = scmp.lt.s32.totalorder %s2339_s27, %s2339_s27 }
 0x48c   :  { %p3273_p4 = scmp.ne.s32.totalorder %s2339_s27, %s3272_s28  ;;  %p3278_p6 = scmp.lt.s32.totalorder %s3272_s28, %s3272_s28 }
 0x48e   :  { %p3279_p7 = por %p3278_p6, %p3277_p5 }
 0x490   :  { %p3280_p8 = pnand %p3279_p7, %p3273_p4 }
 0x552   :  { %v2312_v39 = vpop.f32.mrb[112].mxu0 }
 0x553   :  { %2319 = vst [vmem:[#allocation12] sm:$0xff] %v2312_v39  ;;  %v3050_v11 = vpop.f32.mrb[113].mxu0 }
 0x554   :  { %v2315_v29 = vpop.f32.mrb[114].mxu0 }
 0x555   :  { %2320 = vst [vmem:[#allocation12 + $0x8] sm:$0xff] %v2315_v29  ;;  %v3051_v8 = vpop.f32.mrb[115].mxu0 }
 0x556   :  { %3283 = shalt.err (!%p3280_p8)
}
 0x557   :  { %s3284_s5 = scalar_lea.hbm %s3688_s6, 256 }
 0x558   :  { %p3285_p9 = scmp.ne.s32.totalorder %s3688_s6, %s3284_s5  ;;  %p3288_p10 = scmp.lt.u32.totalorder %s3284_s5, %s3688_s6 }
 0x55a   :  { %p3290_p11 = pnand %p3288_p10, %p3285_p9 }
 0x55c   :  { %3293 = shalt.err (!%p3290_p11)
}
 0x55d   :  { %2344 = dma.vmem_to_hbm [thread:$0]  %s2339_s27, 256, %s3688_s6, [#allocation13], %s3310_s21, %s3310_s21, %s3311_s22  }
 0x55e   :  { %3298 = dma.done.wait [#allocation7], 2048  }
 0x55f   :  { %3299 = vsyncadd [#allocation7], 4294965248 }
 0x560   :  { %3300 = dma.done.wait [#allocation13], 256  }
 0x561   :  { %3301 = vsyncadd [#allocation13], 4294967040 }
 0x562   :  { %2351 = vsyncpa [#allocation6], 1 }
 0x563   :  { %2352 = vsyncpa [#allocation9], 1 }
 0x564   :  { %2353 = vsyncpa [#allocation7], 1 }
 0x565   :  { %2354 = vsyncpa [#allocation13], 1 }

// kernel: tpu_custom_call.1
= control target key start
LH: loop header
LB: loop body
LE: loop exit
PB: predicated region body
PF: predicated region fallthrough
CT: control target
= control target key end

     0   :  { %12 = vsyncpa [#allocation6], 0  ;;  %s3682_s0 = inlined_call_operand.hbm [shape: bf16[3,128,128], index: 0, kind: input, shape index: {}]   ;;  %s3683_s1 = inlined_call_operand.hbm [shape: bf16[128,128], index: 1, kind: input, shape index: {}]   ;;  %s3684_s2 = inlined_call_operand.hbm [shape: bf16[2,512,128], index: 2, kind: input, shape index: {}]   ;;  %s3685_s3 = inlined_call_operand.vmem [shape: f32[2,1,128], index: 3, kind: input, shape index: {}]   ;;  %s3686_s4 = inlined_call_operand.vmem [shape: bf16[16,128], index: 4, kind: input, shape index: {}]   ;;  %s3687_s5 = inlined_call_operand.hbm [shape: f32[128,128], index: 5, kind: output, shape index: {0}]   ;;  %s3688_s6 = inlined_call_operand.hbm [shape: f32[16,128], index: 6, kind: output, shape index: {1}]  }
   0x1   :  { %13 = vsyncpa [#allocation9], 0 }
   0x2   :  { %14 = vsyncpa [#allocation7], 0 }
   0x3   :  { %15 = vsyncpa [#allocation13], 0  ;;  %s3302_s21 = smov [#allocation8]   ;;  %s3303_s23 = smov [#allocation5]  }
   0x4   :  { %s33_s22 = sshll.u32 %s3302_s21, 4  ;;  %s21_s24 = sshll.u32 %s3303_s23, 4  ;;  %s34_s22 = int_to_ptr.vmem [resolvable:$true] %s33_s22  ;;  %s3348_s24 = int_to_ptr.vmem [resolvable:$true] %s21_s24 }
   0x5   :  { %s3184_s27 = scalar_lea.hbm %s3683_s1, 1024 }
   0x6   :  { %p3185_p0 = scmp.ne.s32.totalorder %s3683_s1, %s3184_s27  ;;  %p3188_p1 = scmp.lt.u32.totalorder %s3184_s27, %s3683_s1 }
   0x8   :  { %p3190_p2 = pnand %p3188_p1, %p3185_p0 }
   0xa   :  { %3193 = shalt.err (!%p3190_p2)
}
   0xb   :  { %s3194_s8 = scalar_lea.vmem %s34_s22, 1024  ;;  %p3199_p4 = scmp.lt.s32.totalorder %s34_s22, %s34_s22 }
   0xc   :  { %p3195_p3 = scmp.ne.s32.totalorder %s34_s22, %s3194_s8  ;;  %p3200_p5 = scmp.lt.s32.totalorder %s3194_s8, %s3194_s8 }
   0xe   :  { %p3201_p6 = por %p3200_p5, %p3199_p4 }
  0x10   :  { %p3202_p7 = pnand %p3201_p6, %p3195_p3 }
  0x12   :  { %3205 = shalt.err (!%p3202_p7)
}
  0x13   :  { %s3304_s9 = smov 64   ;;  %s3305_s10 = smov 4  }
  0x14   :  { %39 = dma.hbm_to_vmem [thread:$0]  %s3683_s1, 1024, %s34_s22, [#allocation9], %s3304_s9, %s3304_s9, %s3305_s10  }
  0x15   :  { %s3206_s15 = scalar_lea.hbm %s3682_s0, 3072 }
  0x16   :  { %p3207_p8 = scmp.ne.s32.totalorder %s3682_s0, %s3206_s15  ;;  %p3210_p9 = scmp.lt.u32.totalorder %s3206_s15, %s3682_s0 }
  0x18   :  { %p3212_p10 = pnand %p3210_p9, %p3207_p8 }
  0x1a   :  { %3215 = shalt.err (!%p3212_p10)
}
  0x1b   :  { %s3216_s20 = scalar_lea.vmem %s3348_s24, 3072  ;;  %p3221_p12 = scmp.lt.s32.totalorder %s3348_s24, %s3348_s24 }
  0x1c   :  { %p3217_p11 = scmp.ne.s32.totalorder %s3348_s24, %s3216_s20  ;;  %p3222_p13 = scmp.lt.s32.totalorder %s3216_s20, %s3216_s20 }
  0x1e   :  { %p3223_p0 = por %p3222_p13, %p3221_p12 }
  0x20   :  { %p3224_p1 = pnand %p3223_p0, %p3217_p11 }
  0x22   :  { %3227 = shalt.err (!%p3224_p1)
}
  0x23   :  { %27 = dma.hbm_to_vmem [thread:$0]  %s3682_s0, 3072, %s3348_s24, [#allocation6], %s3304_s9, %s3304_s9, %s3305_s10  }
  0x24   :  { %s3306_s22 = smov [#allocation10]   ;;  %s3228_s27 = scalar_lea.hbm %s3684_s2, 8192 }
  0x25   :  { %s45_s23 = sshll.u32 %s3306_s22, 4  ;;  %p3229_p2 = scmp.ne.s32.totalorder %s3684_s2, %s3228_s27  ;;  %s46_s23 = int_to_ptr.vmem [resolvable:$true] %s45_s23 }
  0x26   :  { %p3232_p3 = scmp.lt.u32.totalorder %s3228_s27, %s3684_s2 }
  0x28   :  { %p3234_p4 = pnand %p3232_p3, %p3229_p2 }
  0x2a   :  { %3237 = shalt.err (!%p3234_p4)
}
  0x2b   :  { %s3238_s8 = scalar_lea.vmem %s46_s23, 8192  ;;  %p3243_p6 = scmp.lt.s32.totalorder %s46_s23, %s46_s23 }
  0x2c   :  { %p3239_p5 = scmp.ne.s32.totalorder %s46_s23, %s3238_s8  ;;  %p3244_p7 = scmp.lt.s32.totalorder %s3238_s8, %s3238_s8 }
  0x2e   :  { %p3245_p8 = por %p3244_p7, %p3243_p6 }
  0x30   :  { %p3246_p9 = pnand %p3245_p8, %p3239_p5 }
  0x32   :  { %3249 = shalt.err (!%p3246_p9)
}
  0x33   :  { %51 = dma.hbm_to_vmem [thread:$0]  %s3684_s2, 8192, %s46_s23, [#allocation9], %s3304_s9, %s3304_s9, %s3305_s10  }
  0x34   :  { %3294 = dma.done.wait [#allocation6], 3072  }
  0x35   :  { %3295 = vsyncadd [#allocation6], 4294964224 }
  0x36   :  { %3296 = dma.done.wait [#allocation9], 9216  }
  0x37   :  { %3297 = vsyncadd [#allocation9], 4294958080  ;;  %v3400_v0 = vld [vmem:[#allocation8] sm:$0xff]   ;;  %v3402_v1 = vld [vmem:[#allocation8 + $0x8] sm:$0xff]   ;;  %vm3308_vm0 = vmmov 0   ;;  %s3309_s13 = smov [#allocation11]  }
  0x38   :  { %2840 = vmatprep.subr.bf16.mxu0 %v3400_v0  ;;  %2872 = vmatprep.subr.bf16.mxu1 %v3400_v0  ;;  %v3410_v2 = vld [vmem:[#allocation8 + $0x10] sm:$0xff]   ;;  %v3414_v3 = vld [vmem:[#allocation8 + $0x18] sm:$0xff]   ;;  %v3071_v4 = vld [vmem:[#allocation5] sm:$0xff]   ;;  %s2326_s14 = sshll.u32 %s3309_s13, 4  ;;  %s2327_s14 = int_to_ptr.vmem [resolvable:$true] %s2326_s14 }
  0x39   :  { %2841 = vmatpush3.bf16.msra.mxu0 %v3400_v0  ;;  %2873 = vmatpush3.bf16.msra.mxu1 %v3400_v0  ;;  %v3072_v5 = vld [vmem:[#allocation5 + $0x40] sm:$0xff]   ;;  %v3428_v7 = vld [vmem:[#allocation8 + $0x28] sm:$0xff]   ;;  %v3434_v8 = vld [vmem:[#allocation8 + $0x30] sm:$0xff]   ;;  %s3250_s15 = scalar_lea.vmem %s2327_s14, 2048  ;;  %p3255_p11 = scmp.lt.s32.totalorder %s2327_s14, %s2327_s14 }
  0x3a   :  { %2842 = vmatprep.subr.bf16.mxu0 %v3402_v1  ;;  %2874 = vmatprep.subr.bf16.mxu1 %v3402_v1  ;;  %v3422_v6 = vld [vmem:[#allocation8 + $0x20] sm:$0xff]   ;;  %v3440_v9 = vld [vmem:[#allocation8 + $0x38] sm:$0xff]   ;;  %v3073_v10 = vld [vmem:[#allocation5 + $0x8] sm:$0xff]   ;;  %p3251_p10 = scmp.ne.s32.totalorder %s2327_s14, %s3250_s15  ;;  %p3256_p12 = scmp.lt.s32.totalorder %s3250_s15, %s3250_s15 }
  0x3b   :  { %2856 = vmatprep.mubr.bf16.mxu0 %v3071_v4  ;;  %2888 = vmatprep.mubr.bf16.mxu1 %v3072_v5  ;;  %v3074_v11 = vld [vmem:[#allocation5 + $0x48] sm:$0xff]   ;;  %v3075_v12 = vld [vmem:[#allocation5 + $0x10] sm:$0xff]   ;;  %v3095_v14 = vld [vmem:[#allocation10 + $0x40] sm:$0xff]  }
  0x3c   :  { %v3078_v13 = vld [vmem:[#allocation5 + $0x50] sm:$0xff]   ;;  %v3096_v15 = vld [vmem:[#allocation10] sm:$0xff]   ;;  %v3097_v16 = vld [vmem:[#allocation10 + $0x48] sm:$0xff]   ;;  %p3257_p13 = por %p3256_p12, %p3255_p11 }
  0x3d   :  { %2843 = vmatpush3.bf16.msra.mxu0 %v3402_v1  ;;  %2875 = vmatpush3.bf16.msra.mxu1 %v3402_v1  ;;  %v3076_v17 = vld [vmem:[#allocation5 + $0x18] sm:$0xff]   ;;  %v3077_v19 = vld [vmem:[#allocation5 + $0x20] sm:$0xff]   ;;  %v3098_v21 = vld [vmem:[#allocation10 + $0x8] sm:$0xff]  }
  0x3e   :  { %2844 = vmatprep.subr.bf16.mxu0 %v3410_v2  ;;  %2876 = vmatprep.subr.bf16.mxu1 %v3410_v2  ;;  %v3080_v18 = vld [vmem:[#allocation5 + $0x58] sm:$0xff]   ;;  %v3083_v20 = vld [vmem:[#allocation5 + $0x60] sm:$0xff]   ;;  %v3099_v22 = vld [vmem:[#allocation10 + $0x50] sm:$0xff]   ;;  %p3258_p0 = pnand %p3257_p13, %p3251_p10 }
  0x3f   :  { %v3079_v23 = vld [vmem:[#allocation5 + $0x28] sm:$0xff]   ;;  %v3100_v25 = vld [vmem:[#allocation10 + $0x10] sm:$0xff]   ;;  %v3101_v28 = vld [vmem:[#allocation10 + $0x58] sm:$0xff]  }
  0x40   :  { %v3085_v24 = vld [vmem:[#allocation5 + $0x68] sm:$0xff]   ;;  %v3081_v26 = vld [vmem:[#allocation5 + $0x30] sm:$0xff]   ;;  %v3102_v29 = vld [vmem:[#allocation10 + $0x18] sm:$0xff]  }
  0x41   :  { %2845 = vmatpush3.bf16.msra.mxu0 %v3410_v2  ;;  %2877 = vmatpush3.bf16.msra.mxu1 %v3410_v2  ;;  %v3089_v27 = vld [vmem:[#allocation5 + $0x70] sm:$0xff]   ;;  %v3103_v30 = vld [vmem:[#allocation10 + $0x60] sm:$0xff]   ;;  %v3082_v31 = vld [vmem:[#allocation5 + $0x38] sm:$0xff]  }
  0x42   :  { %2846 = vmatprep.subr.bf16.mxu0 %v3414_v3  ;;  %2878 = vmatprep.subr.bf16.mxu1 %v3414_v3  ;;  %v3090_v32 = vld [vmem:[#allocation5 + $0x78] sm:$0xff]   ;;  %v3084_v33 = vld [vmem:[#allocation5 + $0x80] sm:$0xff]   ;;  %v3105_v35 = vld [vmem:[#allocation10 + $0x68] sm:$0xff]  }
  0x43   :  { %v3104_v34 = vld [vmem:[#allocation10 + $0x20] sm:$0xff]   ;;  %v3106_v36 = vld [vmem:[#allocation10 + $0x28] sm:$0xff]   ;;  %v3107_v37 = vld [vmem:[#allocation10 + $0x70] sm:$0xff]  }
  0x44   :  { %v3086_v38 = vld [vmem:[#allocation5 + $0x88] sm:$0xff]   ;;  %v3087_v39 = vld [vmem:[#allocation5 + $0x90] sm:$0xff]   ;;  %v3088_v40 = vld [vmem:[#allocation5 + $0x98] sm:$0xff]  }
  0x45   :  { %2847 = vmatpush3.bf16.msra.mxu0 %v3414_v3  ;;  %2879 = vmatpush3.bf16.msra.mxu1 %v3414_v3  ;;  %v3091_v41 = vld [vmem:[#allocation5 + $0xa0] sm:$0xff]   ;;  %v3092_v42 = vld [vmem:[#allocation5 + $0xa8] sm:$0xff]   ;;  %v3093_v43 = vld [vmem:[#allocation5 + $0xb0] sm:$0xff]  }
  0x46   :  { %2848 = vmatprep.subr.bf16.mxu0 %v3422_v6  ;;  %2880 = vmatprep.subr.bf16.mxu1 %v3422_v6  ;;  %v3094_v44 = vld [vmem:[#allocation5 + $0xb8] sm:$0xff]   ;;  %v3108_v45 = vld [vmem:[#allocation10 + $0x30] sm:$0xff]   ;;  %v3111_v48 = vld [vmem:[#allocation10 + $0xc0] sm:$0xff]  }
  0x47   :  { %v3109_v46 = vld [vmem:[#allocation10 + $0x78] sm:$0xff]   ;;  %v3112_v49 = vld [vmem:[#allocation10 + $0x80] sm:$0xff]   ;;  %v3113_v50 = vld [vmem:[#allocation10 + $0xc8] sm:$0xff]  }
  0x48   :  { %v3110_v47 = vld [vmem:[#allocation10 + $0x38] sm:$0xff]   ;;  %v3114_v51 = vld [vmem:[#allocation10 + $0x88] sm:$0xff]   ;;  %v3115_v52 = vld [vmem:[#allocation10 + $0xd0] sm:$0xff]  }
  0x49   :  { %2849 = vmatpush3.bf16.msra.mxu0 %v3422_v6  ;;  %2881 = vmatpush3.bf16.msra.mxu1 %v3422_v6  ;;  %v3116_v53 = vld [vmem:[#allocation10 + $0x90] sm:$0xff]   ;;  %v3117_v54 = vld [vmem:[#allocation10 + $0xd8] sm:$0xff]   ;;  %v3119_v56 = vld [vmem:[#allocation10 + $0xe0] sm:$0xff]  }
  0x4a   :  { %2850 = vmatprep.subr.bf16.mxu0 %v3428_v7  ;;  %2882 = vmatprep.subr.bf16.mxu1 %v3428_v7  ;;  %v3118_v55 = vld [vmem:[#allocation10 + $0x98] sm:$0xff]   ;;  %v3120_v57 = vld [vmem:[#allocation10 + $0xa0] sm:$0xff]   ;;  %v3121_v58 = vld [vmem:[#allocation10 + $0xe8] sm:$0xff]  }
  0x4b   :  { %v3122_v59 = vld [vmem:[#allocation10 + $0xa8] sm:$0xff]   ;;  %v3123_v60 = vld [vmem:[#allocation10 + $0xf0] sm:$0xff]   ;;  %v3125_v62 = vld [vmem:[#allocation10 + $0xf8] sm:$0xff]  }
  0x4c   :  { %v3124_v61 = vld [vmem:[#allocation10 + $0xb0] sm:$0xff]   ;;  %v3126_v63 = vld [vmem:[#allocation10 + $0xb8] sm:$0xff]  }
  0x4d   :  { %2851 = vmatpush3.bf16.msra.mxu0 %v3428_v7  ;;  %2883 = vmatpush3.bf16.msra.mxu1 %v3428_v7 }
  0x4e   :  { %2852 = vmatprep.subr.bf16.mxu0 %v3434_v8  ;;  %2884 = vmatprep.subr.bf16.mxu1 %v3434_v8 }
  0x51   :  { %2853 = vmatpush3.bf16.msra.mxu0 %v3434_v8  ;;  %2885 = vmatpush3.bf16.msra.mxu1 %v3434_v8 }
  0x52   :  { %2854 = vmatprep.subr.bf16.mxu0 %v3440_v9  ;;  %2886 = vmatprep.subr.bf16.mxu1 %v3440_v9 }
  0x55   :  { %2855 = vmatpush3.bf16.msra.mxu0 %v3440_v9  ;;  %2887 = vmatpush3.bf16.msra.mxu1 %v3440_v9 }
  0x56   :  { %2904 = vmatprep.subr.bf16.mxu0 %v3400_v0  ;;  %2527 = vmatprep.subr.bf16.mxu1 %v3095_v14 }
  0x58   :  { %2857 = vmatmul.mubr.bf16.vlgmr.msra.gmra.mrb[0].mxu0 %v3073_v10  ;;  %2889 = vmatmul.mubr.bf16.vlgmr.msra.gmra.mrb[0].mxu1 %v3074_v11 }
  0x59   :  { %2905 = vmatpush3.bf16.msra.mxu0 %v3400_v0  ;;  %2860 = vmatprep.mubr.bf16.mxu0 %v3075_v12 }
  0x5a   :  { %2906 = vmatprep.subr.bf16.mxu0 %v3402_v1  ;;  %2892 = vmatprep.mubr.bf16.mxu1 %v3078_v13 }
  0x5b   :  { %2528 = vmatpush3.bf16.msra.mxu1 %v3096_v15 }
  0x5c   :  { %2529 = vmatprep.subr.bf16.mxu1 %v3097_v16 }
  0x5d   :  { %2907 = vmatpush3.bf16.msra.mxu0 %v3402_v1 }
  0x5e   :  { %2908 = vmatprep.subr.bf16.mxu0 %v3410_v2 }
  0x5f   :  { %2530 = vmatpush3.bf16.msra.mxu1 %v3098_v21 }
  0x60   :  { %2861 = vmatmul.mubr.bf16.gmra.mrb[4].mxu0 %v3076_v17  ;;  %2893 = vmatmul.mubr.bf16.gmra.mrb[4].mxu1 %v3080_v18 }
  0x61   :  { %2909 = vmatpush3.bf16.msra.mxu0 %v3410_v2  ;;  %2864 = vmatprep.mubr.bf16.mxu0 %v3077_v19 }
  0x62   :  { %2910 = vmatprep.subr.bf16.mxu0 %v3414_v3  ;;  %2896 = vmatprep.mubr.bf16.mxu1 %v3083_v20 }
  0x63   :  { %2531 = vmatprep.subr.bf16.mxu1 %v3099_v22 }
  0x64   :  { %2532 = vmatpush3.bf16.msra.mxu1 %v3100_v25 }
  0x65   :  { %2911 = vmatpush3.bf16.msra.mxu0 %v3414_v3  ;;  %2533 = vmatprep.subr.bf16.mxu1 %v3101_v28 }
  0x66   :  { %2912 = vmatprep.subr.bf16.mxu0 %v3422_v6 }
  0x68   :  { %2865 = vmatmul.mubr.bf16.gmra.mrb[8].mxu0 %v3079_v23  ;;  %2897 = vmatmul.mubr.bf16.gmra.mrb[8].mxu1 %v3085_v24 }
  0x69   :  { %2913 = vmatpush3.bf16.msra.mxu0 %v3422_v6  ;;  %2868 = vmatprep.mubr.bf16.mxu0 %v3081_v26 }
  0x6a   :  { %2914 = vmatprep.subr.bf16.mxu0 %v3428_v7  ;;  %2900 = vmatprep.mubr.bf16.mxu1 %v3089_v27 }
  0x6b   :  { %2534 = vmatpush3.bf16.msra.mxu1 %v3102_v29 }
  0x6c   :  { %2535 = vmatprep.subr.bf16.mxu1 %v3103_v30 }
  0x6d   :  { %2915 = vmatpush3.bf16.msra.mxu0 %v3428_v7 }
  0x6e   :  { %2916 = vmatprep.subr.bf16.mxu0 %v3434_v8 }
  0x6f   :  { %2536 = vmatpush3.bf16.msra.mxu1 %v3104_v34 }
  0x70   :  { %2869 = vmatmul.mubr.bf16.gmra.mrb[12].mxu0 %v3082_v31  ;;  %2901 = vmatmul.mubr.bf16.gmra.mrb[12].mxu1 %v3090_v32 }
  0x71   :  { %2917 = vmatpush3.bf16.msra.mxu0 %v3434_v8  ;;  %2920 = vmatprep.mubr.bf16.mxu0 %v3084_v33 }
  0x72   :  { %2918 = vmatprep.subr.bf16.mxu0 %v3440_v9  ;;  %2537 = vmatprep.subr.bf16.mxu1 %v3105_v35 }
  0x73   :  { %2538 = vmatpush3.bf16.msra.mxu1 %v3106_v36 }
  0x74   :  { %2539 = vmatprep.subr.bf16.mxu1 %v3107_v37 }
  0x75   :  { %2919 = vmatpush3.bf16.msra.mxu0 %v3440_v9 }
  0x76   :  { %2591 = vmatprep.subr.bf16.mxu0 %v3111_v48 }
  0x77   :  { %2540 = vmatpush3.bf16.msra.mxu1 %v3108_v45 }
  0x78   :  { %2921 = vmatmul.mubr.bf16.vlgmr.msra.gmra.mrb[16].mxu0 %v3086_v38  ;;  %2541 = vmatprep.subr.bf16.mxu1 %v3109_v46 }
  0x79   :  { %2924 = vmatprep.mubr.bf16.mxu0 %v3087_v39  ;;  %2592 = vmatpush3.bf16.msra.mxu0 %v3112_v49 }
  0x7a   :  { %2593 = vmatprep.subr.bf16.mxu0 %v3113_v50 }
  0x7b   :  { %2542 = vmatpush3.bf16.msra.mxu1 %v3110_v47 }
  0x7d   :  { %2594 = vmatpush3.bf16.msra.mxu0 %v3114_v51 }
  0x7e   :  { %2595 = vmatprep.subr.bf16.mxu0 %v3115_v52 }
  0x80   :  { %2925 = vmatmul.mubr.bf16.gmra.mrb[20].mxu0 %v3088_v40 }
  0x81   :  { %2928 = vmatprep.mubr.bf16.mxu0 %v3091_v41  ;;  %2596 = vmatpush3.bf16.msra.mxu0 %v3116_v53 }
  0x82   :  { %2597 = vmatprep.subr.bf16.mxu0 %v3117_v54 }
  0x85   :  { %2598 = vmatpush3.bf16.msra.mxu0 %v3118_v55 }
  0x86   :  { %2599 = vmatprep.subr.bf16.mxu0 %v3119_v56 }
  0x88   :  { %2929 = vmatmul.mubr.bf16.gmra.mrb[24].mxu0 %v3092_v42 }
  0x89   :  { %2932 = vmatprep.mubr.bf16.mxu0 %v3093_v43  ;;  %2600 = vmatpush3.bf16.msra.mxu0 %v3120_v57 }
  0x8a   :  { %2601 = vmatprep.subr.bf16.mxu0 %v3121_v58 }
  0x8d   :  { %2602 = vmatpush3.bf16.msra.mxu0 %v3122_v59 }
  0x8e   :  { %2603 = vmatprep.subr.bf16.mxu0 %v3123_v60 }
  0x90   :  { %2933 = vmatmul.mubr.bf16.gmra.mrb[28].mxu0 %v3094_v44 }
  0x91   :  { %1095 = vmatprep.mubr.bf16.mxu0 %v3400_v0  ;;  %2604 = vmatpush3.bf16.msra.mxu0 %v3124_v61 }
  0x92   :  { %2605 = vmatprep.subr.bf16.mxu0 %v3125_v62 }
  0x95   :  { %2606 = vmatpush3.bf16.msra.mxu0 %v3126_v63 }
 0x12b   :  { %v2858_v0 = vpop.f32.mrb[0].mxu0  ;;  %v2890_v4 = vpop.f32.mrb[0].mxu1 }
 0x12c   :  { %v228_v5 = vpop.f32.mrb[1].mxu0  ;;  %v406_v10 = vpop.f32.mrb[1].mxu1 }
 0x12d   :  { %v2859_v11 = vpop.f32.mrb[2].mxu0  ;;  %v2891_v12 = vpop.f32.mrb[2].mxu1 }
 0x12e   :  { %v292_v13 = vpack.c.bf16 %v2859_v11, %v2858_v0  ;;  %v470_v14 = vpack.c.bf16 %v2891_v12, %v2890_v4  ;;  %v231_v15 = vpop.f32.mrb[3].mxu0  ;;  %v409_v16 = vpop.f32.mrb[3].mxu1 }
 0x12f   :  { %v291_v17 = vpack.c.bf16 %v231_v15, %v228_v5  ;;  %v469_v18 = vpack.c.bf16 %v409_v16, %v406_v10 }
 0x131   :  { %998 = vmatprep.mubr.bf16.mxu1 %v469_v18 }
 0x132   :  { %999 = vmatmul.mubr.bf16.vlgmr.msra.gmra.mrb[16].mxu1 %v291_v17 }
 0x133   :  { %v2862_v19 = vpop.f32.mrb[4].mxu0  ;;  %1006 = vmatprep.mubr.bf16.mxu1 %v470_v14  ;;  %v2894_v20 = vpop.f32.mrb[4].mxu1 }
 0x134   :  { %v244_v21 = vpop.f32.mrb[5].mxu0  ;;  %v422_v22 = vpop.f32.mrb[5].mxu1 }
 0x135   :  { %v2863_v23 = vpop.f32.mrb[6].mxu0  ;;  %v2895_v24 = vpop.f32.mrb[6].mxu1 }
 0x136   :  { %v294_v25 = vpack.c.bf16 %v2863_v23, %v2862_v19  ;;  %v247_v26 = vpop.f32.mrb[7].mxu0  ;;  %v472_v27 = vpack.c.bf16 %v2895_v24, %v2894_v20  ;;  %v425_v28 = vpop.f32.mrb[7].mxu1 }
 0x137   :  { %v293_v29 = vpack.c.bf16 %v247_v26, %v244_v21  ;;  %v471_v30 = vpack.c.bf16 %v425_v28, %v422_v22 }
 0x13a   :  { %1007 = vmatmul.mubr.bf16.gmra.mrb[20].mxu1 %v292_v13 }
 0x13b   :  { %v2866_v31 = vpop.f32.mrb[8].mxu0  ;;  %1014 = vmatprep.mubr.bf16.mxu1 %v471_v30  ;;  %v2898_v32 = vpop.f32.mrb[8].mxu1 }
 0x13c   :  { %v260_v33 = vpop.f32.mrb[9].mxu0  ;;  %v438_v34 = vpop.f32.mrb[9].mxu1 }
 0x13d   :  { %v2867_v35 = vpop.f32.mrb[10].mxu0  ;;  %v2899_v36 = vpop.f32.mrb[10].mxu1 }
 0x13e   :  { %v296_v37 = vpack.c.bf16 %v2867_v35, %v2866_v31  ;;  %v263_v38 = vpop.f32.mrb[11].mxu0  ;;  %v474_v39 = vpack.c.bf16 %v2899_v36, %v2898_v32  ;;  %v441_v40 = vpop.f32.mrb[11].mxu1 }
 0x13f   :  { %v295_v41 = vpack.c.bf16 %v263_v38, %v260_v33  ;;  %v473_v42 = vpack.c.bf16 %v441_v40, %v438_v34 }
 0x142   :  { %1015 = vmatmul.mubr.bf16.gmra.mrb[24].mxu1 %v293_v29 }
 0x143   :  { %v2870_v43 = vpop.f32.mrb[12].mxu0  ;;  %1022 = vmatprep.mubr.bf16.mxu1 %v472_v27  ;;  %v2902_v44 = vpop.f32.mrb[12].mxu1 }
 0x144   :  { %v276_v45 = vpop.f32.mrb[13].mxu0  ;;  %v454_v46 = vpop.f32.mrb[13].mxu1 }
 0x145   :  { %v2871_v47 = vpop.f32.mrb[14].mxu0  ;;  %v2903_v48 = vpop.f32.mrb[14].mxu1 }
 0x146   :  { %v298_v49 = vpack.c.bf16 %v2871_v47, %v2870_v43  ;;  %v279_v50 = vpop.f32.mrb[15].mxu0  ;;  %v476_v51 = vpack.c.bf16 %v2903_v48, %v2902_v44  ;;  %v457_v52 = vpop.f32.mrb[15].mxu1 }
 0x147   :  { %v297_v53 = vpack.c.bf16 %v279_v50, %v276_v45  ;;  %v475_v54 = vpack.c.bf16 %v457_v52, %v454_v46 }
 0x14a   :  { %1023 = vmatmul.mubr.bf16.gmra.mrb[28].mxu1 %v294_v25 }
 0x14b   :  { %v2922_v55 = vpop.f32.mrb[16].mxu0  ;;  %1030 = vmatprep.mubr.bf16.mxu1 %v473_v42 }
 0x14c   :  { %v584_v56 = vpop.f32.mrb[17].mxu0 }
 0x14d   :  { %v2923_v57 = vpop.f32.mrb[18].mxu0 }
 0x14e   :  { %v648_v58 = vpack.c.bf16 %v2923_v57, %v2922_v55  ;;  %v587_v59 = vpop.f32.mrb[19].mxu0 }
 0x14f   :  { %v647_v60 = vpack.c.bf16 %v587_v59, %v584_v56 }
 0x151   :  { %1096 = vmatmul.mubr.bf16.vlgmr.msra.gmra.mrb[32].mxu0 %v647_v60 }
 0x152   :  { %1031 = vmatmul.mubr.bf16.gmra.mrb[32].mxu1 %v295_v41  ;;  %1103 = vmatprep.mubr.bf16.mxu0 %v3402_v1  ;;  %v3479_v41 = vld [vmem:[%s3685_s3] ss:$0 sm:$0xff] }
 0x153   :  { %v2926_v61 = vpop.f32.mrb[20].mxu0  ;;  %1038 = vmatprep.mubr.bf16.mxu1 %v474_v39 }
 0x154   :  { %v600_v62 = vpop.f32.mrb[21].mxu0 }
 0x155   :  { %v2927_v63 = vpop.f32.mrb[22].mxu0 }
 0x156   :  { %v650_v0 = vpack.c.bf16 %v2927_v63, %v2926_v61  ;;  %v603_v4 = vpop.f32.mrb[23].mxu0 }
 0x157   :  { %v649_v5 = vpack.c.bf16 %v603_v4, %v600_v62 }
 0x159   :  { %1104 = vmatmul.mubr.bf16.gmra.mrb[36].mxu0 %v648_v58 }
 0x15a   :  { %1039 = vmatmul.mubr.bf16.gmra.mrb[36].mxu1 %v296_v37  ;;  %1111 = vmatprep.mubr.bf16.mxu0 %v3410_v2  ;;  %v3127_v2 = vld [vmem:[#allocation5] sm:$0xff]  }
 0x15b   :  { %1046 = vmatprep.mubr.bf16.mxu1 %v475_v54  ;;  %v2930_v10 = vpop.f32.mrb[24].mxu0 }
 0x15c   :  { %v616_v11 = vpop.f32.mrb[25].mxu0 }
 0x15d   :  { %v2931_v12 = vpop.f32.mrb[26].mxu0 }
 0x15e   :  { %v652_v13 = vpack.c.bf16 %v2931_v12, %v2930_v10  ;;  %v619_v14 = vpop.f32.mrb[27].mxu0 }
 0x15f   :  { %v651_v15 = vpack.c.bf16 %v619_v14, %v616_v11 }
 0x161   :  { %1112 = vmatmul.mubr.bf16.gmra.mrb[40].mxu0 %v649_v5 }
 0x162   :  { %1047 = vmatmul.mubr.bf16.gmra.mrb[40].mxu1 %v297_v53  ;;  %1119 = vmatprep.mubr.bf16.mxu0 %v3414_v3  ;;  %v3128_v3 = vld [vmem:[#allocation5 + $0x40] sm:$0xff]  }
 0x163   :  { %1054 = vmatprep.mubr.bf16.mxu1 %v476_v51  ;;  %v2934_v1 = vpop.f32.mrb[28].mxu0 }
 0x164   :  { %v632_v16 = vpop.f32.mrb[29].mxu0 }
 0x165   :  { %v2935_v17 = vpop.f32.mrb[30].mxu0 }
 0x166   :  { %v654_v18 = vpack.c.bf16 %v2935_v17, %v2934_v1  ;;  %v635_v19 = vpop.f32.mrb[31].mxu0 }
 0x167   :  { %v653_v20 = vpack.c.bf16 %v635_v19, %v632_v16 }
 0x169   :  { %1120 = vmatmul.mubr.bf16.gmra.mrb[44].mxu0 %v650_v0 }
 0x16a   :  { %1055 = vmatmul.mubr.bf16.gmra.mrb[44].mxu1 %v298_v49  ;;  %1127 = vmatprep.mubr.bf16.mxu0 %v3422_v6 }
 0x16b   :  { %2952 = vmatprep.mubr.bf16.mxu1 %v3127_v2 }
 0x171   :  { %1128 = vmatmul.mubr.bf16.gmra.mrb[48].mxu0 %v651_v15 }
 0x172   :  { %1135 = vmatprep.mubr.bf16.mxu0 %v3428_v7 }
 0x179   :  { %1136 = vmatmul.mubr.bf16.gmra.mrb[52].mxu0 %v652_v13 }
 0x17a   :  { %1143 = vmatprep.mubr.bf16.mxu0 %v3434_v8 }
 0x181   :  { %1144 = vmatmul.mubr.bf16.gmra.mrb[56].mxu0 %v653_v20 }
 0x182   :  { %1151 = vmatprep.mubr.bf16.mxu0 %v3440_v9 }
 0x189   :  { %1152 = vmatmul.mubr.bf16.gmra.mrb[60].mxu0 %v654_v18 }
 0x18a   :  { %2984 = vmatprep.mubr.bf16.mxu0 %v3128_v3 }
 0x205   :  { %v2543_v21 = vpop.f32.mrb[16].mxu1 }
 0x206   :  { %v2544_v22 = vpop.f32.mrb[17].mxu1 }
 0x207   :  { %v2545_v23 = vadd.f32 %v2544_v22, %v2543_v21  ;;  %v2546_v24 = vpop.f32.mrb[18].mxu1 }
 0x208   :  { %v2547_v25 = vpop.f32.mrb[19].mxu1 }
 0x209   :  { %v2548_v6 = vadd.f32 %v2547_v25, %v2546_v24  ;;  %v1001_v45 = vadd.f32 %v2545_v23, %v3479_v41 }
 0x20b   :  { %v1004_v52 = vadd.f32 %v2548_v6, %v3479_v41 }
 0x20d   :  { %v2549_v26 = vpop.f32.mrb[20].mxu1 }
 0x20e   :  { %v2550_v27 = vpop.f32.mrb[21].mxu1 }
 0x20f   :  { %v2551_v7 = vadd.f32 %v2550_v27, %v2549_v26  ;;  %v2552_v28 = vpop.f32.mrb[22].mxu1 }
 0x210   :  { %v2553_v29 = vpop.f32.mrb[23].mxu1 }
 0x211   :  { %v2554_v8 = vadd.f32 %v2553_v29, %v2552_v28  ;;  %v1009_v63 = vadd.f32 %v2551_v7, %v3479_v41 }
 0x213   :  { %v1012_v14 = vadd.f32 %v2554_v8, %v3479_v41 }
 0x215   :  { %v2555_v30 = vpop.f32.mrb[24].mxu1 }
 0x216   :  { %v2556_v31 = vpop.f32.mrb[25].mxu1 }
 0x217   :  { %v2557_v9 = vadd.f32 %v2556_v31, %v2555_v30  ;;  %v2558_v32 = vpop.f32.mrb[26].mxu1 }
 0x218   :  { %v2559_v33 = vpop.f32.mrb[27].mxu1 }
 0x219   :  { %v2560_v34 = vadd.f32 %v2559_v33, %v2558_v32  ;;  %v1017_v22 = vadd.f32 %v2557_v9, %v3479_v41 }
 0x21b   :  { %v1020_v28 = vadd.f32 %v2560_v34, %v3479_v41 }
 0x21d   :  { %v2561_v35 = vpop.f32.mrb[28].mxu1 }
 0x21e   :  { %v2562_v36 = vpop.f32.mrb[29].mxu1 }
 0x21f   :  { %v3472_v37 = vadd.f32 %v2562_v36, %v2561_v35  ;;  %v2564_v38 = vpop.f32.mrb[30].mxu1 }
 0x220   :  { %v2565_v39 = vpop.f32.mrb[31].mxu1 }
 0x221   :  { %v3474_v40 = vadd.f32 %v2565_v39, %v2564_v38  ;;  %v1025_v34 = vadd.f32 %v3472_v37, %v3479_v41 }
 0x224   :  { %v2607_v42 = vpop.f32.mrb[32].mxu0 }
 0x225   :  { %v2567_v43 = vpop.f32.mrb[32].mxu1  ;;  %v2608_v44 = vpop.f32.mrb[33].mxu0 }
 0x226   :  { %v2609_v46 = vadd.f32 %v2608_v44, %v2607_v42  ;;  %v2568_v47 = vpop.f32.mrb[33].mxu1  ;;  %v2610_v48 = vpop.f32.mrb[34].mxu0 }
 0x227   :  { %v3482_v49 = vadd.f32 %v2568_v47, %v2567_v43  ;;  %v2570_v50 = vpop.f32.mrb[34].mxu1  ;;  %v2611_v51 = vpop.f32.mrb[35].mxu0 }
 0x228   :  { %v1098_v53 = vadd.f32 %v2609_v46, %v1001_v45  ;;  %v2612_v54 = vadd.f32 %v2611_v51, %v2610_v48  ;;  %v2571_v55 = vpop.f32.mrb[35].mxu1  ;;  %v1028_v48 = vadd.f32 %v3474_v40, %v3479_v41 }
 0x229   :  { %v3485_v56 = vadd.f32 %v2571_v55, %v2570_v50  ;;  %v1033_v40 = vadd.f32 %v3482_v49, %v3479_v41 }
 0x22a   :  { %v1101_v57 = vadd.f32 %v2612_v54, %v1004_v52  ;;  %v1160_v58 = vmax.f32 %v1098_v53, 0.0 }
 0x22c   :  { %v1161_v59 = vmax.f32 %v1101_v57, 0.0  ;;  %v2613_v60 = vpop.f32.mrb[36].mxu0 }
 0x22d   :  { %v2573_v61 = vpop.f32.mrb[36].mxu1  ;;  %v2614_v62 = vpop.f32.mrb[37].mxu0 }
 0x22e   :  { %v3488_v0 = vpack.c.bf16 %v1161_v59, %v1160_v58  ;;  %v2615_v4 = vadd.f32 %v2614_v62, %v2613_v60  ;;  %v2574_v5 = vpop.f32.mrb[37].mxu1  ;;  %v2616_v10 = vpop.f32.mrb[38].mxu0 }
 0x22f   :  { %v3490_v11 = vadd.f32 %v2574_v5, %v2573_v61  ;;  %v2576_v12 = vpop.f32.mrb[38].mxu1  ;;  %v2617_v13 = vpop.f32.mrb[39].mxu0 }
 0x230   :  { %v1106_v15 = vadd.f32 %v2615_v4, %v1009_v63  ;;  %v2618_v1 = vadd.f32 %v2617_v13, %v2616_v10  ;;  %v2577_v16 = vpop.f32.mrb[39].mxu1  ;;  %2936 = vmatprep.subr.bf16.mxu1 %v3488_v0  ;;  %2968 = vmatprep.subr.bf16.mxu0 %v3488_v0  ;;  %v1036_v63 = vadd.f32 %v3485_v56, %v3479_v41 }
 0x231   :  { %v3495_v17 = vadd.f32 %v2577_v16, %v2576_v12  ;;  %2937 = vmatpush3.bf16.msra.mxu1 %v3488_v0  ;;  %2969 = vmatpush3.bf16.msra.mxu0 %v3488_v0 }
 0x232   :  { %v1109_v18 = vadd.f32 %v2618_v1, %v1012_v14  ;;  %v1162_v19 = vmax.f32 %v1106_v15, 0.0  ;;  %v1041_v15 = vadd.f32 %v3490_v11, %v3479_v41 }
 0x234   :  { %v1163_v20 = vmax.f32 %v1109_v18, 0.0  ;;  %v2619_v2 = vpop.f32.mrb[40].mxu0 }
 0x235   :  { %v2579_v3 = vpop.f32.mrb[40].mxu1  ;;  %v2620_v21 = vpop.f32.mrb[41].mxu0 }
 0x236   :  { %v3500_v23 = vpack.c.bf16 %v1163_v20, %v1162_v19  ;;  %v2621_v24 = vadd.f32 %v2620_v21, %v2619_v2  ;;  %v2580_v25 = vpop.f32.mrb[41].mxu1  ;;  %v2622_v6 = vpop.f32.mrb[42].mxu0  ;;  %v1044_v19 = vadd.f32 %v3495_v17, %v3479_v41 }
 0x237   :  { %v3502_v26 = vadd.f32 %v2580_v25, %v2579_v3  ;;  %v2582_v27 = vpop.f32.mrb[42].mxu1  ;;  %v2623_v7 = vpop.f32.mrb[43].mxu0 }
 0x238   :  { %v1114_v29 = vadd.f32 %v2621_v24, %v1017_v22  ;;  %v2624_v8 = vadd.f32 %v2623_v7, %v2622_v6  ;;  %v2583_v30 = vpop.f32.mrb[43].mxu1  ;;  %2938 = vmatprep.subr.bf16.mxu1 %v3500_v23  ;;  %2970 = vmatprep.subr.bf16.mxu0 %v3500_v23 }
 0x239   :  { %v3507_v31 = vadd.f32 %v2583_v30, %v2582_v27  ;;  %2939 = vmatpush3.bf16.msra.mxu1 %v3500_v23  ;;  %2971 = vmatpush3.bf16.msra.mxu0 %v3500_v23  ;;  %v1049_v25 = vadd.f32 %v3502_v26, %v3479_v41 }
 0x23a   :  { %v1117_v9 = vadd.f32 %v2624_v8, %v1020_v28  ;;  %v1164_v32 = vmax.f32 %v1114_v29, 0.0 }
 0x23b   :  { %v1052_v28 = vadd.f32 %v3507_v31, %v3479_v41 }
 0x23c   :  { %v1165_v33 = vmax.f32 %v1117_v9, 0.0  ;;  %v2625_v35 = vpop.f32.mrb[44].mxu0 }
 0x23d   :  { %v2585_v36 = vpop.f32.mrb[44].mxu1  ;;  %v2626_v38 = vpop.f32.mrb[45].mxu0 }
 0x23e   :  { %v3513_v39 = vpack.c.bf16 %v1165_v33, %v1164_v32  ;;  %v2627_v42 = vadd.f32 %v2626_v38, %v2625_v35  ;;  %v2586_v43 = vpop.f32.mrb[45].mxu1  ;;  %v2628_v44 = vpop.f32.mrb[46].mxu0 }
 0x23f   :  { %v3515_v45 = vadd.f32 %v2586_v43, %v2585_v36  ;;  %v2588_v46 = vpop.f32.mrb[46].mxu1  ;;  %v2629_v47 = vpop.f32.mrb[47].mxu0 }
 0x240   :  { %v1122_v50 = vadd.f32 %v2627_v42, %v1025_v34  ;;  %v2630_v51 = vadd.f32 %v2629_v47, %v2628_v44  ;;  %v2589_v52 = vpop.f32.mrb[47].mxu1  ;;  %2940 = vmatprep.subr.bf16.mxu1 %v3513_v39  ;;  %2972 = vmatprep.subr.bf16.mxu0 %v3513_v39 }
 0x241   :  { %v3521_v37 = vadd.f32 %v2589_v52, %v2588_v46  ;;  %2941 = vmatpush3.bf16.msra.mxu1 %v3513_v39  ;;  %2973 = vmatpush3.bf16.msra.mxu0 %v3513_v39  ;;  %v1057_v35 = vadd.f32 %v3515_v45, %v3479_v41  ;;  %v3131_v52 = vld [vmem:[#allocation5 + $0x10] sm:$0xff]  }
 0x242   :  { %v1125_v53 = vadd.f32 %v2630_v51, %v1028_v48  ;;  %v1166_v54 = vmax.f32 %v1122_v50, 0.0  ;;  %v3151_v50 = vld [vmem:[#allocation10 + $0x140] sm:$0xff]   ;;  %v3130_v51 = vld [vmem:[#allocation5 + $0x48] sm:$0xff]  }
 0x243   :  { %v1060_v42 = vadd.f32 %v3521_v37, %v3479_v41  ;;  %v3129_v41 = vld [vmem:[#allocation5 + $0x8] sm:$0xff]   ;;  %v3134_v37 = vld [vmem:[#allocation5 + $0x50] sm:$0xff]  }
 0x244   :  { %v1167_v55 = vmax.f32 %v1125_v53, 0.0  ;;  %v2631_v57 = vpop.f32.mrb[48].mxu0  ;;  %v3152_v53 = vld [vmem:[#allocation10 + $0x100] sm:$0xff]  }
 0x245   :  { %v2632_v58 = vpop.f32.mrb[49].mxu0 }
 0x246   :  { %v3527_v59 = vpack.c.bf16 %v1167_v55, %v1166_v54  ;;  %v2633_v60 = vadd.f32 %v2632_v58, %v2631_v57  ;;  %v2634_v61 = vpop.f32.mrb[50].mxu0  ;;  %v3153_v54 = vld [vmem:[#allocation10 + $0x148] sm:$0xff]   ;;  %v3132_v57 = vld [vmem:[#allocation5 + $0x18] sm:$0xff]  }
 0x247   :  { %v2635_v62 = vpop.f32.mrb[51].mxu0  ;;  %v3154_v55 = vld [vmem:[#allocation10 + $0x108] sm:$0xff]   ;;  %v3136_v58 = vld [vmem:[#allocation5 + $0x58] sm:$0xff]  }
 0x248   :  { %v1130_v4 = vadd.f32 %v2633_v60, %v1033_v40  ;;  %v2636_v5 = vadd.f32 %v2635_v62, %v2634_v61  ;;  %2942 = vmatprep.subr.bf16.mxu1 %v3527_v59  ;;  %2974 = vmatprep.subr.bf16.mxu0 %v3527_v59  ;;  %v3133_v40 = vld [vmem:[#allocation5 + $0x20] sm:$0xff]   ;;  %v3155_v61 = vld [vmem:[#allocation10 + $0x150] sm:$0xff]  }
 0x249   :  { %2943 = vmatpush3.bf16.msra.mxu1 %v3527_v59  ;;  %2975 = vmatpush3.bf16.msra.mxu0 %v3527_v59  ;;  %v3139_v60 = vld [vmem:[#allocation5 + $0x60] sm:$0xff]   ;;  %v3156_v62 = vld [vmem:[#allocation10 + $0x110] sm:$0xff]  }
 0x24a   :  { %v1133_v10 = vadd.f32 %v2636_v5, %v1036_v63  ;;  %v1168_v49 = vmax.f32 %v1130_v4, 0.0  ;;  %v3157_v63 = vld [vmem:[#allocation10 + $0x158] sm:$0xff]   ;;  %v3135_v4 = vld [vmem:[#allocation5 + $0x28] sm:$0xff]  }
 0x24b   :  { %v3141_v5 = vld [vmem:[#allocation5 + $0x68] sm:$0xff]  }
 0x24c   :  { %v1169_v12 = vmax.f32 %v1133_v10, 0.0  ;;  %v2637_v13 = vpop.f32.mrb[52].mxu0  ;;  %v3137_v10 = vld [vmem:[#allocation5 + $0x30] sm:$0xff]  }
 0x24d   :  { %v2638_v14 = vpop.f32.mrb[53].mxu0 }
 0x24e   :  { %v3537_v1 = vpack.c.bf16 %v1169_v12, %v1168_v49  ;;  %v2639_v56 = vadd.f32 %v2638_v14, %v2637_v13  ;;  %v2640_v16 = vpop.f32.mrb[54].mxu0  ;;  %v3145_v49 = vld [vmem:[#allocation5 + $0x70] sm:$0xff]   ;;  %v3158_v12 = vld [vmem:[#allocation10 + $0x118] sm:$0xff]   ;;  %v3159_v13 = vld [vmem:[#allocation10 + $0x160] sm:$0xff]  }
 0x24f   :  { %v2641_v18 = vpop.f32.mrb[55].mxu0  ;;  %v3160_v14 = vld [vmem:[#allocation10 + $0x120] sm:$0xff]  }
 0x250   :  { %v1138_v20 = vadd.f32 %v2639_v56, %v1041_v15  ;;  %v2642_v2 = vadd.f32 %v2641_v18, %v2640_v16  ;;  %2944 = vmatprep.subr.bf16.mxu1 %v3537_v1  ;;  %2976 = vmatprep.subr.bf16.mxu0 %v3537_v1  ;;  %v3138_v15 = vld [vmem:[#allocation5 + $0x38] sm:$0xff]   ;;  %v3140_v16 = vld [vmem:[#allocation5 + $0x80] sm:$0xff]   ;;  %v3161_v18 = vld [vmem:[#allocation10 + $0x168] sm:$0xff]  }
 0x251   :  { %2945 = vmatpush3.bf16.msra.mxu1 %v3537_v1  ;;  %2977 = vmatpush3.bf16.msra.mxu0 %v3537_v1  ;;  %v3147_v56 = vld [vmem:[#allocation5 + $0x78] sm:$0xff]  }
 0x252   :  { %v1141_v3 = vadd.f32 %v2642_v2, %v1044_v19  ;;  %v1170_v11 = vmax.f32 %v1138_v20, 0.0  ;;  %v3162_v19 = vld [vmem:[#allocation10 + $0x128] sm:$0xff]   ;;  %v3163_v20 = vld [vmem:[#allocation10 + $0x170] sm:$0xff]  }
 0x253   :  { %v3142_v2 = vld [vmem:[#allocation5 + $0x88] sm:$0xff]  }
 0x254   :  { %v1171_v21 = vmax.f32 %v1141_v3, 0.0  ;;  %v2643_v22 = vpop.f32.mrb[56].mxu0  ;;  %v3143_v3 = vld [vmem:[#allocation5 + $0x90] sm:$0xff]  }
 0x255   :  { %v2644_v24 = vpop.f32.mrb[57].mxu0 }
 0x256   :  { %v3547_v6 = vpack.c.bf16 %v1171_v21, %v1170_v11  ;;  %v2645_v17 = vadd.f32 %v2644_v24, %v2643_v22  ;;  %v2646_v27 = vpop.f32.mrb[58].mxu0  ;;  %v3144_v11 = vld [vmem:[#allocation5 + $0x98] sm:$0xff]   ;;  %v3146_v21 = vld [vmem:[#allocation5 + $0xa0] sm:$0xff]   ;;  %v3148_v22 = vld [vmem:[#allocation5 + $0xa8] sm:$0xff]  }
 0x257   :  { %v2647_v7 = vpop.f32.mrb[59].mxu0  ;;  %v3149_v24 = vld [vmem:[#allocation5 + $0xb0] sm:$0xff]  }
 0x258   :  { %v1146_v29 = vadd.f32 %v2645_v17, %v1049_v25  ;;  %v2648_v8 = vadd.f32 %v2647_v7, %v2646_v27  ;;  %2946 = vmatprep.subr.bf16.mxu1 %v3547_v6  ;;  %2978 = vmatprep.subr.bf16.mxu0 %v3547_v6  ;;  %v3150_v25 = vld [vmem:[#allocation5 + $0xb8] sm:$0xff]   ;;  %v3164_v17 = vld [vmem:[#allocation10 + $0x130] sm:$0xff]  }
 0x259   :  { %2947 = vmatpush3.bf16.msra.mxu1 %v3547_v6  ;;  %2979 = vmatpush3.bf16.msra.mxu0 %v3547_v6  ;;  %v3165_v27 = vld [vmem:[#allocation10 + $0x178] sm:$0xff]  }
 0x25a   :  { %v1149_v30 = vadd.f32 %v2648_v8, %v1052_v28  ;;  %v1172_v26 = vmax.f32 %v1146_v29, 0.0  ;;  %v3166_v7 = vld [vmem:[#allocation10 + $0x138] sm:$0xff]   ;;  %v3167_v28 = vld [vmem:[#allocation10 + $0x1c0] sm:$0xff]   ;;  %v3169_v8 = vld [vmem:[#allocation10 + $0x1c8] sm:$0xff]  }
 0x25b   :  { %v3168_v29 = vld [vmem:[#allocation10 + $0x180] sm:$0xff]  }
 0x25c   :  { %v1173_v9 = vmax.f32 %v1149_v30, 0.0  ;;  %v2649_v32 = vpop.f32.mrb[60].mxu0  ;;  %v3170_v30 = vld [vmem:[#allocation10 + $0x188] sm:$0xff]  }
 0x25d   :  { %v2650_v33 = vpop.f32.mrb[61].mxu0 }
 0x25e   :  { %v3557_v36 = vpack.c.bf16 %v1173_v9, %v1172_v26  ;;  %v2651_v31 = vadd.f32 %v2650_v33, %v2649_v32  ;;  %v2652_v38 = vpop.f32.mrb[62].mxu0  ;;  %v3171_v26 = vld [vmem:[#allocation10 + $0x1d0] sm:$0xff]   ;;  %v3173_v32 = vld [vmem:[#allocation10 + $0x1d8] sm:$0xff]   ;;  %v3175_v33 = vld [vmem:[#allocation10 + $0x1e0] sm:$0xff]  }
 0x25f   :  { %v2653_v34 = vpop.f32.mrb[63].mxu0  ;;  %v3172_v9 = vld [vmem:[#allocation10 + $0x190] sm:$0xff]  }
 0x260   :  { %v1154_v43 = vadd.f32 %v2651_v31, %v1057_v35  ;;  %v2654_v44 = vadd.f32 %v2653_v34, %v2652_v38  ;;  %2948 = vmatprep.subr.bf16.mxu1 %v3557_v36  ;;  %2980 = vmatprep.subr.bf16.mxu0 %v3557_v36  ;;  %v3176_v35 = vld [vmem:[#allocation10 + $0x1a0] sm:$0xff]   ;;  %v3177_v31 = vld [vmem:[#allocation10 + $0x1e8] sm:$0xff]   ;;  %v3179_v34 = vld [vmem:[#allocation10 + $0x1f0] sm:$0xff]  }
 0x261   :  { %2949 = vmatpush3.bf16.msra.mxu1 %v3557_v36  ;;  %2981 = vmatpush3.bf16.msra.mxu0 %v3557_v36  ;;  %v3178_v38 = vld [vmem:[#allocation10 + $0x1a8] sm:$0xff]  }
 0x262   :  { %v1157_v46 = vadd.f32 %v2654_v44, %v1060_v42  ;;  %v1174_v45 = vmax.f32 %v1154_v43, 0.0  ;;  %v3180_v42 = vld [vmem:[#allocation10 + $0x1b0] sm:$0xff]   ;;  %v3181_v43 = vld [vmem:[#allocation10 + $0x1f8] sm:$0xff]  }
 0x263   :  { %v3182_v44 = vld [vmem:[#allocation10 + $0x1b8] sm:$0xff]  }
 0x264   :  { %v1175_v47 = vmax.f32 %v1157_v46, 0.0 }
 0x266   :  { %v3565_v48 = vpack.c.bf16 %v1175_v47, %v1174_v45 }
 0x268   :  { %2950 = vmatprep.subr.bf16.mxu1 %v3565_v48  ;;  %2982 = vmatprep.subr.bf16.mxu0 %v3565_v48 }
 0x269   :  { %2951 = vmatpush3.bf16.msra.mxu1 %v3565_v48  ;;  %2983 = vmatpush3.bf16.msra.mxu0 %v3565_v48 }
 0x26a   :  { %3000 = vmatprep.subr.bf16.mxu1 %v3488_v0  ;;  %2703 = vmatprep.subr.bf16.mxu0 %v3151_v50 }
 0x26c   :  { %2953 = vmatmul.mubr.bf16.vlgmr.msra.gmra.mrb[48].mxu1 %v3129_v41  ;;  %2985 = vmatmul.mubr.bf16.vlgmr.msra.gmra.mrb[64].mxu0 %v3130_v51 }
 0x26d   :  { %3001 = vmatpush3.bf16.msra.mxu1 %v3488_v0  ;;  %2956 = vmatprep.mubr.bf16.mxu1 %v3131_v52 }
 0x26e   :  { %3002 = vmatprep.subr.bf16.mxu1 %v3500_v23  ;;  %2988 = vmatprep.mubr.bf16.mxu0 %v3134_v37 }
 0x26f   :  { %2704 = vmatpush3.bf16.msra.mxu0 %v3152_v53 }
 0x270   :  { %2705 = vmatprep.subr.bf16.mxu0 %v3153_v54 }
 0x271   :  { %3003 = vmatpush3.bf16.msra.mxu1 %v3500_v23 }
 0x272   :  { %3004 = vmatprep.subr.bf16.mxu1 %v3513_v39 }
 0x273   :  { %2706 = vmatpush3.bf16.msra.mxu0 %v3154_v55 }
 0x274   :  { %2957 = vmatmul.mubr.bf16.gmra.mrb[52].mxu1 %v3132_v57  ;;  %2989 = vmatmul.mubr.bf16.gmra.mrb[68].mxu0 %v3136_v58 }
 0x275   :  { %3005 = vmatpush3.bf16.msra.mxu1 %v3513_v39  ;;  %2960 = vmatprep.mubr.bf16.mxu1 %v3133_v40 }
 0x276   :  { %3006 = vmatprep.subr.bf16.mxu1 %v3527_v59  ;;  %2992 = vmatprep.mubr.bf16.mxu0 %v3139_v60 }
 0x277   :  { %2707 = vmatprep.subr.bf16.mxu0 %v3155_v61 }
 0x278   :  { %2708 = vmatpush3.bf16.msra.mxu0 %v3156_v62 }
 0x279   :  { %3007 = vmatpush3.bf16.msra.mxu1 %v3527_v59  ;;  %2709 = vmatprep.subr.bf16.mxu0 %v3157_v63 }
 0x27a   :  { %3008 = vmatprep.subr.bf16.mxu1 %v3537_v1 }
 0x27c   :  { %2961 = vmatmul.mubr.bf16.gmra.mrb[56].mxu1 %v3135_v4  ;;  %2993 = vmatmul.mubr.bf16.gmra.mrb[72].mxu0 %v3141_v5 }
 0x27d   :  { %3009 = vmatpush3.bf16.msra.mxu1 %v3537_v1  ;;  %2964 = vmatprep.mubr.bf16.mxu1 %v3137_v10 }
 0x27e   :  { %3010 = vmatprep.subr.bf16.mxu1 %v3547_v6  ;;  %2996 = vmatprep.mubr.bf16.mxu0 %v3145_v49 }
 0x27f   :  { %2710 = vmatpush3.bf16.msra.mxu0 %v3158_v12 }
 0x280   :  { %2711 = vmatprep.subr.bf16.mxu0 %v3159_v13 }
 0x281   :  { %3011 = vmatpush3.bf16.msra.mxu1 %v3547_v6 }
 0x282   :  { %3012 = vmatprep.subr.bf16.mxu1 %v3557_v36 }
 0x283   :  { %2712 = vmatpush3.bf16.msra.mxu0 %v3160_v14 }
 0x284   :  { %2965 = vmatmul.mubr.bf16.gmra.mrb[60].mxu1 %v3138_v15  ;;  %2997 = vmatmul.mubr.bf16.gmra.mrb[76].mxu0 %v3147_v56 }
 0x285   :  { %3013 = vmatpush3.bf16.msra.mxu1 %v3557_v36  ;;  %3016 = vmatprep.mubr.bf16.mxu1 %v3140_v16 }
 0x286   :  { %3014 = vmatprep.subr.bf16.mxu1 %v3565_v48  ;;  %2713 = vmatprep.subr.bf16.mxu0 %v3161_v18 }
 0x287   :  { %2714 = vmatpush3.bf16.msra.mxu0 %v3162_v19 }
 0x288   :  { %2715 = vmatprep.subr.bf16.mxu0 %v3163_v20 }
 0x289   :  { %3015 = vmatpush3.bf16.msra.mxu1 %v3565_v48 }
 0x28a   :  { %2767 = vmatprep.subr.bf16.mxu1 %v3167_v28 }
 0x28b   :  { %2716 = vmatpush3.bf16.msra.mxu0 %v3164_v17 }
 0x28c   :  { %3017 = vmatmul.mubr.bf16.vlgmr.msra.gmra.mrb[64].mxu1 %v3142_v2  ;;  %2717 = vmatprep.subr.bf16.mxu0 %v3165_v27 }
 0x28d   :  { %3020 = vmatprep.mubr.bf16.mxu1 %v3143_v3  ;;  %2768 = vmatpush3.bf16.msra.mxu1 %v3168_v29 }
 0x28e   :  { %2769 = vmatprep.subr.bf16.mxu1 %v3169_v8 }
 0x28f   :  { %2718 = vmatpush3.bf16.msra.mxu0 %v3166_v7 }
 0x291   :  { %2770 = vmatpush3.bf16.msra.mxu1 %v3170_v30 }
 0x292   :  { %2771 = vmatprep.subr.bf16.mxu1 %v3171_v26 }
 0x294   :  { %3021 = vmatmul.mubr.bf16.gmra.mrb[68].mxu1 %v3144_v11 }
 0x295   :  { %3024 = vmatprep.mubr.bf16.mxu1 %v3146_v21  ;;  %2772 = vmatpush3.bf16.msra.mxu1 %v3172_v9 }
 0x296   :  { %2773 = vmatprep.subr.bf16.mxu1 %v3173_v32 }
 0x29c   :  { %3025 = vmatmul.mubr.bf16.gmra.mrb[72].mxu1 %v3148_v22 }
 0x29d   :  { %3028 = vmatprep.mubr.bf16.mxu1 %v3149_v24 }
 0x2a4   :  { %3029 = vmatmul.mubr.bf16.gmra.mrb[76].mxu1 %v3150_v25 }
 0x2a5   :  { %2165 = vmatprep.mubr.bf16.mxu1 %v3488_v0  ;;  %v3174_v0 = vld [vmem:[#allocation10 + $0x198] sm:$0xff]  }
 0x2a6   :  { %2774 = vmatpush3.bf16.msra.mxu1 %v3174_v0 }
 0x2a7   :  { %2775 = vmatprep.subr.bf16.mxu1 %v3175_v33 }
 0x2aa   :  { %2776 = vmatpush3.bf16.msra.mxu1 %v3176_v35 }
 0x2ab   :  { %2777 = vmatprep.subr.bf16.mxu1 %v3177_v31 }
 0x2ae   :  { %2778 = vmatpush3.bf16.msra.mxu1 %v3178_v38 }
 0x2af   :  { %2779 = vmatprep.subr.bf16.mxu1 %v3179_v34 }
 0x2b2   :  { %2780 = vmatpush3.bf16.msra.mxu1 %v3180_v42 }
 0x2b3   :  { %2781 = vmatprep.subr.bf16.mxu1 %v3181_v43 }
 0x2b6   :  { %2782 = vmatpush3.bf16.msra.mxu1 %v3182_v44 }
 0x33f   :  { %v2954_v46 = vpop.f32.mrb[48].mxu1  ;;  %v2986_v45 = vpop.f32.mrb[64].mxu0 }
 0x340   :  { %v1298_v47 = vpop.f32.mrb[49].mxu1  ;;  %v1475_v50 = vpop.f32.mrb[65].mxu0 }
 0x341   :  { %v2955_v41 = vpop.f32.mrb[50].mxu1  ;;  %v2987_v51 = vpop.f32.mrb[66].mxu0 }
 0x342   :  { %v1362_v52 = vpack.c.bf16 %v2955_v41, %v2954_v46  ;;  %v1539_v37 = vpack.c.bf16 %v2987_v51, %v2986_v45  ;;  %v1301_v53 = vpop.f32.mrb[51].mxu1  ;;  %v1478_v54 = vpop.f32.mrb[67].mxu0 }
 0x343   :  { %v1361_v55 = vpack.c.bf16 %v1301_v53, %v1298_v47  ;;  %v1538_v57 = vpack.c.bf16 %v1478_v54, %v1475_v50 }
 0x345   :  { %2068 = vmatprep.mubr.bf16.mxu0 %v1538_v57 }
 0x346   :  { %2069 = vmatmul.mubr.bf16.vlgmr.msra.gmra.mrb[80].mxu0 %v1361_v55 }
 0x347   :  { %v2958_v58 = vpop.f32.mrb[52].mxu1  ;;  %2076 = vmatprep.mubr.bf16.mxu0 %v1539_v37  ;;  %v2990_v40 = vpop.f32.mrb[68].mxu0 }
 0x348   :  { %v1314_v60 = vpop.f32.mrb[53].mxu1  ;;  %v1491_v61 = vpop.f32.mrb[69].mxu0 }
 0x349   :  { %v2959_v62 = vpop.f32.mrb[54].mxu1  ;;  %v2991_v63 = vpop.f32.mrb[70].mxu0 }
 0x34a   :  { %v1364_v4 = vpack.c.bf16 %v2959_v62, %v2958_v58  ;;  %v1317_v5 = vpop.f32.mrb[55].mxu1  ;;  %v1541_v10 = vpack.c.bf16 %v2991_v63, %v2990_v40  ;;  %v1494_v49 = vpop.f32.mrb[71].mxu0 }
 0x34b   :  { %v1363_v12 = vpack.c.bf16 %v1317_v5, %v1314_v60  ;;  %v1540_v13 = vpack.c.bf16 %v1494_v49, %v1491_v61 }
 0x34e   :  { %2077 = vmatmul.mubr.bf16.gmra.mrb[84].mxu0 %v1362_v52 }
 0x34f   :  { %v2962_v14 = vpop.f32.mrb[56].mxu1  ;;  %2084 = vmatprep.mubr.bf16.mxu0 %v1540_v13  ;;  %v2994_v15 = vpop.f32.mrb[72].mxu0 }
 0x350   :  { %v1330_v56 = vpop.f32.mrb[57].mxu1  ;;  %v1507_v16 = vpop.f32.mrb[73].mxu0 }
 0x351   :  { %v2963_v18 = vpop.f32.mrb[58].mxu1  ;;  %v2995_v19 = vpop.f32.mrb[74].mxu0 }
 0x352   :  { %v1366_v20 = vpack.c.bf16 %v2963_v18, %v2962_v14  ;;  %v1333_v2 = vpop.f32.mrb[59].mxu1  ;;  %v1543_v3 = vpack.c.bf16 %v2995_v19, %v2994_v15  ;;  %v1510_v11 = vpop.f32.mrb[75].mxu0 }
 0x353   :  { %v1365_v21 = vpack.c.bf16 %v1333_v2, %v1330_v56  ;;  %v1542_v22 = vpack.c.bf16 %v1510_v11, %v1507_v16  ;;  %v3604_v11 = vld [vmem:[%s3685_s3 + $0x1] ss:$0 sm:$0xff] }
 0x356   :  { %2085 = vmatmul.mubr.bf16.gmra.mrb[88].mxu0 %v1363_v12 }
 0x357   :  { %v2966_v24 = vpop.f32.mrb[60].mxu1  ;;  %2092 = vmatprep.mubr.bf16.mxu0 %v1541_v10  ;;  %v2998_v25 = vpop.f32.mrb[76].mxu0 }
 0x358   :  { %v1346_v17 = vpop.f32.mrb[61].mxu1  ;;  %v1523_v27 = vpop.f32.mrb[77].mxu0 }
 0x359   :  { %v2967_v7 = vpop.f32.mrb[62].mxu1  ;;  %v2999_v28 = vpop.f32.mrb[78].mxu0 }
 0x35a   :  { %v1368_v29 = vpack.c.bf16 %v2967_v7, %v2966_v24  ;;  %v1349_v8 = vpop.f32.mrb[63].mxu1  ;;  %v1545_v30 = vpack.c.bf16 %v2999_v28, %v2998_v25  ;;  %v1526_v26 = vpop.f32.mrb[79].mxu0 }
 0x35b   :  { %v1367_v9 = vpack.c.bf16 %v1349_v8, %v1346_v17  ;;  %v1544_v32 = vpack.c.bf16 %v1526_v26, %v1523_v27 }
 0x35e   :  { %2093 = vmatmul.mubr.bf16.gmra.mrb[92].mxu0 %v1364_v4 }
 0x35f   :  { %v3018_v0 = vpop.f32.mrb[64].mxu1  ;;  %2100 = vmatprep.mubr.bf16.mxu0 %v1542_v22 }
 0x360   :  { %v1652_v33 = vpop.f32.mrb[65].mxu1 }
 0x361   :  { %v3019_v35 = vpop.f32.mrb[66].mxu1 }
 0x362   :  { %v1716_v31 = vpack.c.bf16 %v3019_v35, %v3018_v0  ;;  %v1655_v38 = vpop.f32.mrb[67].mxu1 }
 0x363   :  { %v1715_v34 = vpack.c.bf16 %v1655_v38, %v1652_v33 }
 0x365   :  { %2166 = vmatmul.mubr.bf16.vlgmr.msra.gmra.mrb[80].mxu1 %v1715_v34 }
 0x366   :  { %2101 = vmatmul.mubr.bf16.gmra.mrb[96].mxu0 %v1365_v21  ;;  %2173 = vmatprep.mubr.bf16.mxu1 %v3500_v23 }
 0x367   :  { %v3022_v42 = vpop.f32.mrb[68].mxu1  ;;  %2108 = vmatprep.mubr.bf16.mxu0 %v1543_v3 }
 0x368   :  { %v1668_v43 = vpop.f32.mrb[69].mxu1 }
 0x369   :  { %v3023_v44 = vpop.f32.mrb[70].mxu1 }
 0x36a   :  { %v1718_v46 = vpack.c.bf16 %v3023_v44, %v3022_v42  ;;  %v1671_v45 = vpop.f32.mrb[71].mxu1 }
 0x36b   :  { %v1717_v47 = vpack.c.bf16 %v1671_v45, %v1668_v43 }
 0x36d   :  { %2174 = vmatmul.mubr.bf16.gmra.mrb[84].mxu1 %v1716_v31 }
 0x36e   :  { %2109 = vmatmul.mubr.bf16.gmra.mrb[100].mxu0 %v1366_v20  ;;  %2181 = vmatprep.mubr.bf16.mxu1 %v3513_v39  ;;  %v3307_v39 = vmov 0.0  }
 0x36f   :  { %2116 = vmatprep.mubr.bf16.mxu0 %v1544_v32  ;;  %v3026_v50 = vpop.f32.mrb[72].mxu1  ;;  %3032 = vmatprep.subr.bf16.mxu0 %v3307_v39 }
 0x370   :  { %v1684_v41 = vpop.f32.mrb[73].mxu1 }
 0x371   :  { %v3027_v51 = vpop.f32.mrb[74].mxu1 }
 0x372   :  { %v1720_v52 = vpack.c.bf16 %v3027_v51, %v3026_v50  ;;  %v1687_v37 = vpop.f32.mrb[75].mxu1 }
 0x373   :  { %v1719_v53 = vpack.c.bf16 %v1687_v37, %v1684_v41 }
 0x375   :  { %2182 = vmatmul.mubr.bf16.gmra.mrb[88].mxu1 %v1717_v47 }
 0x376   :  { %2117 = vmatmul.mubr.bf16.gmra.mrb[104].mxu0 %v1367_v9  ;;  %2189 = vmatprep.mubr.bf16.mxu1 %v3527_v59 }
 0x377   :  { %2124 = vmatprep.mubr.bf16.mxu0 %v1545_v30  ;;  %v3030_v23 = vpop.f32.mrb[76].mxu1 }
 0x378   :  { %v1700_v54 = vpop.f32.mrb[77].mxu1 }
 0x379   :  { %v3031_v55 = vpop.f32.mrb[78].mxu1 }
 0x37a   :  { %v1722_v57 = vpack.c.bf16 %v3031_v55, %v3030_v23  ;;  %v1703_v58 = vpop.f32.mrb[79].mxu1 }
 0x37b   :  { %v1721_v40 = vpack.c.bf16 %v1703_v58, %v1700_v54 }
 0x37d   :  { %2190 = vmatmul.mubr.bf16.gmra.mrb[92].mxu1 %v1718_v46 }
 0x37e   :  { %2125 = vmatmul.mubr.bf16.gmra.mrb[108].mxu0 %v1368_v29  ;;  %2197 = vmatprep.mubr.bf16.mxu1 %v3537_v1 }
 0x37f   :  { %3048 = vmatprep.mubr.msk.bf16.mxu0 %vm3308_vm0, %v3307_v39 }
 0x385   :  { %2198 = vmatmul.mubr.bf16.gmra.mrb[96].mxu1 %v1719_v53 }
 0x386   :  { %2205 = vmatprep.mubr.bf16.mxu1 %v3547_v6 }
 0x38d   :  { %2206 = vmatmul.mubr.bf16.gmra.mrb[100].mxu1 %v1720_v52 }
 0x38e   :  { %2213 = vmatprep.mubr.bf16.mxu1 %v3557_v36 }
 0x395   :  { %2214 = vmatmul.mubr.bf16.gmra.mrb[104].mxu1 %v1721_v40 }
 0x396   :  { %2221 = vmatprep.mubr.bf16.mxu1 %v3565_v48 }
 0x39d   :  { %2222 = vmatmul.mubr.bf16.gmra.mrb[108].mxu1 %v1722_v57 }
 0x419   :  { %v2719_v59 = vpop.f32.mrb[80].mxu0 }
 0x41a   :  { %v2720_v60 = vpop.f32.mrb[81].mxu0 }
 0x41b   :  { %v2721_v61 = vadd.f32 %v2720_v60, %v2719_v59  ;;  %v2722_v1 = vpop.f32.mrb[82].mxu0 }
 0x41c   :  { %v2723_v62 = vpop.f32.mrb[83].mxu0 }
 0x41d   :  { %v2724_v63 = vadd.f32 %v2723_v62, %v2722_v1  ;;  %v2071_v25 = vadd.f32 %v2721_v61, %v3604_v11 }
 0x41f   :  { %v2074_v30 = vadd.f32 %v2724_v63, %v3604_v11 }
 0x421   :  { %v2725_v6 = vpop.f32.mrb[84].mxu0 }
 0x422   :  { %v2726_v4 = vpop.f32.mrb[85].mxu0 }
 0x423   :  { %v2727_v5 = vadd.f32 %v2726_v4, %v2725_v6  ;;  %v2728_v36 = vpop.f32.mrb[86].mxu0 }
 0x424   :  { %v2729_v10 = vpop.f32.mrb[87].mxu0 }
 0x425   :  { %v2730_v49 = vadd.f32 %v2729_v10, %v2728_v36  ;;  %v2079_v43 = vadd.f32 %v2727_v5, %v3604_v11 }
 0x427   :  { %v2082_v52 = vadd.f32 %v2730_v49, %v3604_v11 }
 0x429   :  { %v2731_v48 = vpop.f32.mrb[88].mxu0 }
 0x42a   :  { %v2732_v12 = vpop.f32.mrb[89].mxu0 }
 0x42b   :  { %v2733_v13 = vadd.f32 %v2732_v12, %v2731_v48  ;;  %v2734_v14 = vpop.f32.mrb[90].mxu0 }
 0x42c   :  { %v2735_v15 = vpop.f32.mrb[91].mxu0 }
 0x42d   :  { %v2736_v56 = vadd.f32 %v2735_v15, %v2734_v14  ;;  %v2087_v61 = vadd.f32 %v2733_v13, %v3604_v11 }
 0x42f   :  { %v2090_v10 = vadd.f32 %v2736_v56, %v3604_v11 }
 0x431   :  { %v2737_v16 = vpop.f32.mrb[92].mxu0 }
 0x432   :  { %v2738_v18 = vpop.f32.mrb[93].mxu0 }
 0x433   :  { %v3597_v19 = vadd.f32 %v2738_v18, %v2737_v16  ;;  %v2740_v20 = vpop.f32.mrb[94].mxu0 }
 0x434   :  { %v2741_v2 = vpop.f32.mrb[95].mxu0 }
 0x435   :  { %v3599_v3 = vadd.f32 %v2741_v2, %v2740_v20 }
 0x438   :  { %v2783_v21 = vpop.f32.mrb[80].mxu1 }
 0x439   :  { %v2743_v22 = vpop.f32.mrb[96].mxu0  ;;  %v2784_v24 = vpop.f32.mrb[81].mxu1 }
 0x43a   :  { %v2785_v17 = vadd.f32 %v2784_v24, %v2783_v21  ;;  %v2744_v27 = vpop.f32.mrb[97].mxu0  ;;  %v2786_v7 = vpop.f32.mrb[82].mxu1  ;;  %v2095_v21 = vadd.f32 %v3597_v19, %v3604_v11 }
 0x43b   :  { %v3607_v28 = vadd.f32 %v2744_v27, %v2743_v22  ;;  %v2746_v29 = vpop.f32.mrb[98].mxu0  ;;  %v2787_v8 = vpop.f32.mrb[83].mxu1 }
 0x43c   :  { %v2168_v26 = vadd.f32 %v2785_v17, %v2071_v25  ;;  %v2788_v9 = vadd.f32 %v2787_v8, %v2786_v7  ;;  %v2747_v32 = vpop.f32.mrb[99].mxu0 }
 0x43d   :  { %v3610_v0 = vadd.f32 %v2747_v32, %v2746_v29  ;;  %v2098_v29 = vadd.f32 %v3599_v3, %v3604_v11 }
 0x43e   :  { %v2230_v33 = vmax.f32 %v2168_v26, 0.0  ;;  %v2171_v35 = vadd.f32 %v2788_v9, %v2074_v30 }
 0x440   :  { %2246 = vst [vmem:[#allocation11] sm:$0xff] %v2230_v33  ;;  %v2231_v31 = vmax.f32 %v2171_v35, 0.0  ;;  %v2789_v38 = vpop.f32.mrb[84].mxu1 }
 0x441   :  { %v2749_v34 = vpop.f32.mrb[100].mxu0  ;;  %v2790_v42 = vpop.f32.mrb[85].mxu1 }
 0x442   :  { %2247 = vst [vmem:[#allocation11 + $0x8] sm:$0xff] %v2231_v31  ;;  %v2264_v44 = vpack.c.bf16 %v2231_v31, %v2230_v33  ;;  %v2791_v46 = vadd.f32 %v2790_v42, %v2789_v38  ;;  %v2750_v45 = vpop.f32.mrb[101].mxu0  ;;  %v2792_v47 = vpop.f32.mrb[86].mxu1  ;;  %v2103_v38 = vadd.f32 %v3607_v28, %v3604_v11 }
 0x443   :  { %v3613_v50 = vadd.f32 %v2750_v45, %v2749_v34  ;;  %v2752_v41 = vpop.f32.mrb[102].mxu0  ;;  %v2793_v51 = vpop.f32.mrb[87].mxu1 }
 0x444   :  { %v2176_v37 = vadd.f32 %v2791_v46, %v2079_v43  ;;  %v2794_v53 = vadd.f32 %v2793_v51, %v2792_v47  ;;  %v2753_v23 = vpop.f32.mrb[103].mxu0  ;;  %3033 = vmatpush3.bf16.msra.mxu0 %v2264_v44  ;;  %v2106_v44 = vadd.f32 %v3610_v0, %v3604_v11 }
 0x445   :  { %v3616_v54 = vadd.f32 %v2753_v23, %v2752_v41  ;;  %3034 = vmatprep.subr.bf16.mxu0 %v3307_v39  ;;  %v2111_v28 = vadd.f32 %v3613_v50, %v3604_v11 }
 0x446   :  { %v2232_v55 = vmax.f32 %v2176_v37, 0.0  ;;  %v2179_v57 = vadd.f32 %v2794_v53, %v2082_v52 }
 0x447   :  { %v2114_v0 = vadd.f32 %v3616_v54, %v3604_v11 }
 0x448   :  { %2248 = vst [vmem:[#allocation11 + $0x10] sm:$0xff] %v2232_v55  ;;  %v2233_v58 = vmax.f32 %v2179_v57, 0.0  ;;  %v2795_v40 = vpop.f32.mrb[88].mxu1 }
 0x449   :  { %v2755_v59 = vpop.f32.mrb[104].mxu0  ;;  %v2796_v60 = vpop.f32.mrb[89].mxu1 }
 0x44a   :  { %2249 = vst [vmem:[#allocation11 + $0x18] sm:$0xff] %v2233_v58  ;;  %v2265_v1 = vpack.c.bf16 %v2233_v58, %v2232_v55  ;;  %v2797_v62 = vadd.f32 %v2796_v60, %v2795_v40  ;;  %v2756_v63 = vpop.f32.mrb[105].mxu0  ;;  %v2798_v6 = vpop.f32.mrb[90].mxu1 }
 0x44b   :  { %v3620_v4 = vadd.f32 %v2756_v63, %v2755_v59  ;;  %v2758_v5 = vpop.f32.mrb[106].mxu0  ;;  %v2799_v36 = vpop.f32.mrb[91].mxu1 }
 0x44c   :  { %v2184_v49 = vadd.f32 %v2797_v62, %v2087_v61  ;;  %v2800_v48 = vadd.f32 %v2799_v36, %v2798_v6  ;;  %v2759_v12 = vpop.f32.mrb[107].mxu0  ;;  %3035 = vmatpush3.bf16.msra.mxu0 %v2265_v1 }
 0x44d   :  { %v3623_v14 = vadd.f32 %v2759_v12, %v2758_v5  ;;  %3036 = vmatprep.subr.bf16.mxu0 %v3307_v39  ;;  %v2119_v50 = vadd.f32 %v3620_v4, %v3604_v11 }
 0x44e   :  { %v2234_v13 = vmax.f32 %v2184_v49, 0.0  ;;  %v2187_v15 = vadd.f32 %v2800_v48, %v2090_v10 }
 0x44f   :  { %v2122_v54 = vadd.f32 %v3623_v14, %v3604_v11 }
 0x450   :  { %2250 = vst [vmem:[#allocation11 + $0x20] sm:$0xff] %v2234_v13  ;;  %v2235_v16 = vmax.f32 %v2187_v15, 0.0  ;;  %v2801_v18 = vpop.f32.mrb[92].mxu1 }
 0x451   :  { %v2761_v20 = vpop.f32.mrb[108].mxu0  ;;  %v2802_v2 = vpop.f32.mrb[93].mxu1 }
 0x452   :  { %2251 = vst [vmem:[#allocation11 + $0x28] sm:$0xff] %v2235_v16  ;;  %v2266_v56 = vpack.c.bf16 %v2235_v16, %v2234_v13  ;;  %v2803_v22 = vadd.f32 %v2802_v2, %v2801_v18  ;;  %v2762_v24 = vpop.f32.mrb[109].mxu0  ;;  %v2804_v25 = vpop.f32.mrb[94].mxu1 }
 0x453   :  { %v3628_v17 = vadd.f32 %v2762_v24, %v2761_v20  ;;  %v2764_v27 = vpop.f32.mrb[110].mxu0  ;;  %v2805_v7 = vpop.f32.mrb[95].mxu1 }
 0x454   :  { %v2192_v8 = vadd.f32 %v2803_v22, %v2095_v21  ;;  %v2806_v30 = vadd.f32 %v2805_v7, %v2804_v25  ;;  %v2765_v26 = vpop.f32.mrb[111].mxu0  ;;  %3037 = vmatpush3.bf16.msra.mxu0 %v2266_v56 }
 0x455   :  { %v3632_v9 = vadd.f32 %v2765_v26, %v2764_v27  ;;  %3038 = vmatprep.subr.bf16.mxu0 %v3307_v39  ;;  %v2127_v4 = vadd.f32 %v3628_v17, %v3604_v11  ;;  %v3183_v17 = vld [vmem:[%s3686_s4] sm:$0xff]  }
 0x456   :  { %v2236_v19 = vmax.f32 %v2192_v8, 0.0  ;;  %v2195_v32 = vadd.f32 %v2806_v30, %v2098_v29 }
 0x457   :  { %v2130_v14 = vadd.f32 %v3632_v9, %v3604_v11 }
 0x458   :  { %2252 = vst [vmem:[#allocation11 + $0x30] sm:$0xff] %v2236_v19  ;;  %v2237_v33 = vmax.f32 %v2195_v32, 0.0  ;;  %v2807_v35 = vpop.f32.mrb[96].mxu1 }
 0x459   :  { %v2808_v31 = vpop.f32.mrb[97].mxu1 }
 0x45a   :  { %2253 = vst [vmem:[#allocation11 + $0x38] sm:$0xff] %v2237_v33  ;;  %v2267_v34 = vpack.c.bf16 %v2237_v33, %v2236_v19  ;;  %v2809_v3 = vadd.f32 %v2808_v31, %v2807_v35  ;;  %v2810_v42 = vpop.f32.mrb[98].mxu1 }
 0x45b   :  { %v2811_v43 = vpop.f32.mrb[99].mxu1 }
 0x45c   :  { %v2200_v46 = vadd.f32 %v2809_v3, %v2103_v38  ;;  %v2812_v45 = vadd.f32 %v2811_v43, %v2810_v42  ;;  %3039 = vmatpush3.bf16.msra.mxu0 %v2267_v34 }
 0x45d   :  { %3040 = vmatprep.subr.bf16.mxu0 %v3307_v39 }
 0x45e   :  { %v2238_v47 = vmax.f32 %v2200_v46, 0.0  ;;  %v2203_v41 = vadd.f32 %v2812_v45, %v2106_v44 }
 0x460   :  { %2254 = vst [vmem:[#allocation11 + $0x40] sm:$0xff] %v2238_v47  ;;  %v2239_v51 = vmax.f32 %v2203_v41, 0.0  ;;  %v2813_v52 = vpop.f32.mrb[100].mxu1 }
 0x461   :  { %v2814_v37 = vpop.f32.mrb[101].mxu1 }
 0x462   :  { %2255 = vst [vmem:[#allocation11 + $0x48] sm:$0xff] %v2239_v51  ;;  %v2268_v53 = vpack.c.bf16 %v2239_v51, %v2238_v47  ;;  %v2815_v23 = vadd.f32 %v2814_v37, %v2813_v52  ;;  %v2816_v55 = vpop.f32.mrb[102].mxu1 }
 0x463   :  { %v2817_v57 = vpop.f32.mrb[103].mxu1 }
 0x464   :  { %v2208_v58 = vadd.f32 %v2815_v23, %v2111_v28  ;;  %v2818_v40 = vadd.f32 %v2817_v57, %v2816_v55  ;;  %3041 = vmatpush3.bf16.msra.mxu0 %v2268_v53 }
 0x465   :  { %3042 = vmatprep.subr.bf16.mxu0 %v3307_v39 }
 0x466   :  { %v2240_v59 = vmax.f32 %v2208_v58, 0.0  ;;  %v2211_v60 = vadd.f32 %v2818_v40, %v2114_v0 }
 0x468   :  { %2256 = vst [vmem:[#allocation11 + $0x50] sm:$0xff] %v2240_v59  ;;  %v2241_v61 = vmax.f32 %v2211_v60, 0.0  ;;  %v2819_v1 = vpop.f32.mrb[104].mxu1 }
 0x469   :  { %v2820_v62 = vpop.f32.mrb[105].mxu1 }
 0x46a   :  { %2257 = vst [vmem:[#allocation11 + $0x58] sm:$0xff] %v2241_v61  ;;  %v2269_v63 = vpack.c.bf16 %v2241_v61, %v2240_v59  ;;  %v2821_v6 = vadd.f32 %v2820_v62, %v2819_v1  ;;  %v2822_v5 = vpop.f32.mrb[106].mxu1 }
 0x46b   :  { %v2823_v36 = vpop.f32.mrb[107].mxu1 }
 0x46c   :  { %v2216_v10 = vadd.f32 %v2821_v6, %v2119_v50  ;;  %v2824_v49 = vadd.f32 %v2823_v36, %v2822_v5  ;;  %3043 = vmatpush3.bf16.msra.mxu0 %v2269_v63 }
 0x46d   :  { %3044 = vmatprep.subr.bf16.mxu0 %v3307_v39 }
 0x46e   :  { %v2242_v48 = vmax.f32 %v2216_v10, 0.0  ;;  %v2219_v12 = vadd.f32 %v2824_v49, %v2122_v54 }
 0x470   :  { %2258 = vst [vmem:[#allocation11 + $0x60] sm:$0xff] %v2242_v48  ;;  %v2243_v13 = vmax.f32 %v2219_v12, 0.0  ;;  %v2825_v15 = vpop.f32.mrb[108].mxu1 }
 0x471   :  { %v2826_v16 = vpop.f32.mrb[109].mxu1 }
 0x472   :  { %2259 = vst [vmem:[#allocation11 + $0x68] sm:$0xff] %v2243_v13  ;;  %v2270_v18 = vpack.c.bf16 %v2243_v13, %v2242_v48  ;;  %v2827_v20 = vadd.f32 %v2826_v16, %v2825_v15  ;;  %v2828_v2 = vpop.f32.mrb[110].mxu1 }
 0x473   :  { %v2829_v21 = vpop.f32.mrb[111].mxu1 }
 0x474   :  { %v2224_v56 = vadd.f32 %v2827_v20, %v2127_v4  ;;  %v2830_v22 = vadd.f32 %v2829_v21, %v2828_v2  ;;  %3045 = vmatpush3.bf16.msra.mxu0 %v2270_v18 }
 0x475   :  { %3046 = vmatprep.subr.bf16.mxu0 %v3307_v39 }
 0x476   :  { %v2244_v24 = vmax.f32 %v2224_v56, 0.0  ;;  %v2227_v25 = vadd.f32 %v2830_v22, %v2130_v14 }
 0x478   :  { %2260 = vst [vmem:[#allocation11 + $0x70] sm:$0xff] %v2244_v24  ;;  %v2245_v27 = vmax.f32 %v2227_v25, 0.0 }
 0x47a   :  { %2261 = vst [vmem:[#allocation11 + $0x78] sm:$0xff] %v2245_v27  ;;  %v2271_v7 = vpack.c.bf16 %v2245_v27, %v2244_v24 }
 0x47c   :  { %3047 = vmatpush3.bf16.msra.mxu0 %v2271_v7 }
 0x47f   :  { %3049 = vmatmul.mubr.bf16.vlgmr.msra.gmra.mrb[112].mxu0 %v3183_v17 }
 0x480   :  { %3261 = shalt.err (!%p3258_p0)
}
 0x481   :  { %s3262_s18 = scalar_lea.hbm %s3687_s5, 2048 }
 0x482   :  { %p3263_p1 = scmp.ne.s32.totalorder %s3687_s5, %s3262_s18  ;;  %p3266_p2 = scmp.lt.u32.totalorder %s3262_s18, %s3687_s5 }
 0x484   :  { %p3268_p3 = pnand %p3266_p2, %p3263_p1 }
 0x486   :  { %3271 = shalt.err (!%p3268_p3)
}
 0x487   :  { %s3310_s21 = smov 128   ;;  %s3311_s22 = smov 8  }
 0x488   :  { %2332 = dma.vmem_to_hbm [thread:$0]  %s2327_s14, 2048, %s3687_s5, [#allocation7], %s3310_s21, %s3310_s21, %s3311_s22  }
 0x489   :  { %s3312_s26 = smov [#allocation12]  }
 0x48a   :  { %s2338_s27 = sshll.u32 %s3312_s26, 4  ;;  %s2339_s27 = int_to_ptr.vmem [resolvable:$true] %s2338_s27 }
 0x48b   :  { %s3272_s28 = scalar_lea.vmem %s2339_s27, 256  ;;  %p3277_p5 = scmp.lt.s32.totalorder %s2339_s27, %s2339_s27 }
 0x48c   :  { %p3273_p4 = scmp.ne.s32.totalorder %s2339_s27, %s3272_s28  ;;  %p3278_p6 = scmp.lt.s32.totalorder %s3272_s28, %s3272_s28 }
 0x48e   :  { %p3279_p7 = por %p3278_p6, %p3277_p5 }
 0x490   :  { %p3280_p8 = pnand %p3279_p7, %p3273_p4 }
 0x552   :  { %v2312_v39 = vpop.f32.mrb[112].mxu0 }
 0x553   :  { %2319 = vst [vmem:[#allocation12] sm:$0xff] %v2312_v39  ;;  %v3050_v11 = vpop.f32.mrb[113].mxu0 }
 0x554   :  { %v2315_v29 = vpop.f32.mrb[114].mxu0 }
 0x555   :  { %2320 = vst [vmem:[#allocation12 + $0x8] sm:$0xff] %v2315_v29  ;;  %v3051_v8 = vpop.f32.mrb[115].mxu0 }
 0x556   :  { %3283 = shalt.err (!%p3280_p8)
}
 0x557   :  { %s3284_s5 = scalar_lea.hbm %s3688_s6, 256 }
 0x558   :  { %p3285_p9 = scmp.ne.s32.totalorder %s3688_s6, %s3284_s5  ;;  %p3288_p10 = scmp.lt.u32.totalorder %s3284_s5, %s3688_s6 }
 0x55a   :  { %p3290_p11 = pnand %p3288_p10, %p3285_p9 }
 0x55c   :  { %3293 = shalt.err (!%p3290_p11)
}
 0x55d   :  { %2344 = dma.vmem_to_hbm [thread:$0]  %s2339_s27, 256, %s3688_s6, [#allocation13], %s3310_s21, %s3310_s21, %s3311_s22  }
 0x55e   :  { %3298 = dma.done.wait [#allocation7], 2048  }
 0x55f   :  { %3299 = vsyncadd [#allocation7], 4294965248 }
 0x560   :  { %3300 = dma.done.wait [#allocation13], 256  }
 0x561   :  { %3301 = vsyncadd [#allocation13], 4294967040 }
 0x562   :  { %2351 = vsyncpa [#allocation6], 1 }
 0x563   :  { %2352 = vsyncpa [#allocation9], 1 }
 0x564   :  { %2353 = vsyncpa [#allocation7], 1 }
 0x565   :  { %2354 = vsyncpa [#allocation13], 1 }

</bundles_post_ra>
